<compile_context>
chip_gen: v6e
topology: v6e:2x2x1
jax: 0.10.0
libtpu: 0.0.40
codegen_flags: <defaults>
</compile_context>

<pallas_src>
import functools

import jax
import jax.numpy as jnp
from jax.experimental import pallas as pl
from jax.experimental.pallas import tpu as pltpu

LN_EPS = 1e-6
_NEG_INF = -1e30


def _layernorm(h, w, b):
    mu = jnp.mean(h, axis=-1, keepdims=True)
    var = jnp.mean(jnp.square(h - mu), axis=-1, keepdims=True)
    return (h - mu) * jax.lax.rsqrt(var + LN_EPS) * w + b


# --------------------------------------------------------------------------- #
# Kernel 1: LN1 + fused QKV projection, one (batch, seq-tile) per grid step.
# W_qkv is pre-transposed (C, 3C) with the attention scale folded into the q
# columns; outputs are head-major (B, H, N, hd) so the flash kernel never
# re-lays-out heads inside the kv reduction loop.
# --------------------------------------------------------------------------- #
def _qkv_kernel(x_ref, ln1w_ref, ln1b_ref, wqkv_ref, bqkv_ref,
                q_ref, k_ref, v_ref, *, num_heads):
    tq, C = x_ref.shape[1], x_ref.shape[2]
    hd = C // num_heads

    x = x_ref[0].astype(jnp.float32)                              # (tq, C)
    h = _layernorm(x, ln1w_ref[...], ln1b_ref[...])
    qkv = jnp.dot(h.astype(wqkv_ref.dtype), wqkv_ref[...],
                  preferred_element_type=jnp.float32) + bqkv_ref[...]   # (tq, 3C)

    def to_heads(t):                                              # (tq, C) -> (H, tq, hd)
        return t.reshape(tq, num_heads, hd).transpose(1, 0, 2)

    q_ref[0] = to_heads(qkv[:, 0 * C:1 * C]).astype(q_ref.dtype)  # scale already folded
    k_ref[0] = to_heads(qkv[:, 1 * C:2 * C]).astype(k_ref.dtype)
    v_ref[0] = to_heads(qkv[:, 2 * C:3 * C]).astype(v_ref.dtype)


# --------------------------------------------------------------------------- #
# Kernel 2: flash-style attention over kv tiles + proj + residual-1.
# grid = (B, num_q_tiles, num_kv_tiles); kv axis is the reduction ("arbitrary").
# --------------------------------------------------------------------------- #
def _attn_kernel(x_ref, q_ref, k_ref, v_ref, projw_ref, projb_ref,
                 x1_ref, m_scr, l_scr, acc_scr,
                 *, n_actual, needs_mask, exp_dtype, recip_approx):
    kj = pl.program_id(2)
    H, tq, hd = q_ref.shape[1], q_ref.shape[2], q_ref.shape[3]
    tk = k_ref.shape[2]
    C = H * hd

    @pl.when(kj == 0)
    def _():
        m_scr[...] = jnp.full(m_scr.shape, _NEG_INF, dtype=m_scr.dtype)
        l_scr[...] = jnp.zeros(l_scr.shape, dtype=l_scr.dtype)
        acc_scr[...] = jnp.zeros(acc_scr.shape, dtype=acc_scr.dtype)

    q = q_ref[0]                                                  # (H, tq, hd), pre-scaled
    k = k_ref[0]                                                  # (H, tk, hd)
    v = v_ref[0]                                                  # (H, tk, hd)

    # scores only ever exist as (H, tq, tk) tiles
    s = jnp.einsum("hqd,hkd->hqk", q, k, preferred_element_type=jnp.float32)
    if needs_mask:
        kpos = kj * tk + jax.lax.broadcasted_iota(jnp.int32, (1, 1, tk), 2)
        s = jnp.where(kpos < n_actual, s, _NEG_INF)

    m_prev = m_scr[...]                                           # (H, tq)
    m_new = jnp.maximum(m_prev, jnp.max(s, axis=-1))
    alpha = jnp.exp(m_prev - m_new)                               # (H, tq)
    p = jnp.exp((s - m_new[:, :, None]).astype(exp_dtype))        # bf16 exp on v6e/v7x
    l_scr[...] = alpha * l_scr[...] + jnp.sum(p.astype(jnp.float32), axis=-1)
    acc_scr[...] = alpha[:, :, None] * acc_scr[...] + jnp.einsum(
        "hqk,hkd->hqd", p.astype(v.dtype), v, preferred_element_type=jnp.float32)
    m_scr[...] = m_new

    @pl.when(kj == pl.num_programs(2) - 1)
    def _():
        cdt = projw_ref.dtype
        inv_l = pl.reciprocal(l_scr[...], approx=recip_approx)    # (H, tq)
        attn = acc_scr[...] * inv_l[:, :, None]                   # (H, tq, hd)
        attn = attn.transpose(1, 0, 2).reshape(tq, C)             # one relayout per q tile
        attn = jnp.dot(attn.astype(cdt), projw_ref[...],
                       preferred_element_type=jnp.float32) + projb_ref[...]
        x1_ref[0] = (x_ref[0].astype(jnp.float32) + attn).astype(x1_ref.dtype)


# --------------------------------------------------------------------------- #
# Kernel 3: LN2 + MLP (fc1 -> GELU -> fc2) + residual-2, Hm tiled as the
# reduction grid axis so fc1/fc2 weight tiles are pipelined, never resident.
# --------------------------------------------------------------------------- #
def _mlp_kernel(x1_ref, ln2w_ref, ln2b_ref, fc1w_ref, fc1b_ref,
                fc2w_ref, fc2b_ref, o_ref, h2_scr, acc_scr):
    hj = pl.program_id(2)

    @pl.when(hj == 0)
    def _():
        x1 = x1_ref[0].astype(jnp.float32)
        h2 = _layernorm(x1, ln2w_ref[...], ln2b_ref[...])
        h2_scr[...] = h2.astype(h2_scr.dtype)                     # LN2 done once per q tile
        acc_scr[...] = x1                                         # residual seed

    a = jnp.dot(h2_scr[...], fc1w_ref[...],
                preferred_element_type=jnp.float32) + fc1b_ref[...]   # (tq, th)
    a = jax.nn.gelu(a, approximate=False)                         # exact (erf) GELU
    acc_scr[...] += jnp.dot(a.astype(fc2w_ref.dtype), fc2w_ref[...],
                            preferred_element_type=jnp.float32)

    @pl.when(hj == pl.num_programs(2) - 1)
    def _():
        o_ref[0] = (acc_scr[...] + fc2b_ref[...]).astype(o_ref.dtype)


# --------------------------------------------------------------------------- #
# Wrapper helpers
# --------------------------------------------------------------------------- #
def _rnd_up(v, m):
    return ((v + m - 1) // m) * m


def _padded_bytes(shape, itemsize):
    s = list(shape)
    if len(s) >= 1:
        s[-1] = _rnd_up(s[-1], 128)
    if len(s) >= 2:
        s[-2] = _rnd_up(s[-2], 8)
    n = 1
    for d in s:
        n *= d
    return n * itemsize


def _tpu_info():
    kind = ""
    try:
        kind = jax.devices()[0].device_kind.lower()
    except Exception:
        pass
    cap = 0
    try:
        cap = int(pltpu.get_tpu_info().vmem_capacity_bytes)
    except Exception:
        cap = 0
    if cap <= 0:
        cap = 64 * 2 ** 20 if "v7" in kind else 128 * 2 ** 20
    return kind, cap


def _vmem_limit(need_bytes, cap):
    lim = int(max(32 * 2 ** 20, 1.7 * need_bytes))
    return int(min(lim, cap - 8 * 2 ** 20))      # leave headroom (56 MiB cap on v7x)


def _pick_tile(total, target):
    for t in (512, 256, 128):
        if t <= target and total % t == 0:
            return t
    return total


def _pick_hidden_tile(hm):
    if hm <= 1024:
        return hm
    for t in (1024, 512, 256, 128):
        if hm % t == 0:
            return t
    return hm


def _prepare_params(params, num_heads, compute_dtype):
    """Pre-transpose (PyTorch (out,in) -> (in,out)), fold the attention scale into the
    q slice of the fused QKV weight/bias, cast weights to compute dtype."""
    C = params["proj_w"].shape[0]
    hd = C // num_heads
    scale = hd ** -0.5
    f32 = jnp.float32

    def row(v):
        return v.reshape(1, -1).astype(f32)

    w_qkv = params["qkv_w"].astype(f32).T                 # (C, 3C)
    w_qkv = w_qkv.at[:, :C].multiply(scale)               # fold 1/sqrt(hd) into Wq
    b_qkv = params["qkv_b"].astype(f32).at[:C].multiply(scale)   # middle third is the zero k_bias buffer

    return {
        "ln1_w": row(params["ln1_w"]), "ln1_b": row(params["ln1_b"]),
        "w_qkv": w_qkv.astype(compute_dtype), "b_qkv": row(b_qkv),
        "proj_w": params["proj_w"].T.astype(compute_dtype), "proj_b": row(params["proj_b"]),
        "ln2_w": row(params["ln2_w"]), "ln2_b": row(params["ln2_b"]),
        "fc1_w": params["fc1_w"].T.astype(compute_dtype), "fc1_b": row(params["fc1_b"]),
        "fc2_w": params["fc2_w"].T.astype(compute_dtype), "fc2_b": row(params["fc2_b"]),
    }


# --------------------------------------------------------------------------- #
# Wrapper
# --------------------------------------------------------------------------- #
def eva_block(x, params, num_heads: int, compute_dtype=jnp.bfloat16):
    B, N, C = x.shape
    Hm = params["fc1_w"].shape[0]
    hd = C // num_heads
    assert num_heads * hd == C
    p = _prepare_params(params, num_heads, compute_dtype)

    kind, vmem_cap = _tpu_info()
    cbytes = jnp.dtype(compute_dtype).itemsize
    xbytes = jnp.dtype(x.dtype).itemsize

    # ---- pad sequence to a multiple of 128 so flash tiles stay lane-dense ---- #
    N_pad = _rnd_up(N, 128)
    needs_mask = N_pad != N
    x_pad = jnp.pad(x, ((0, 0), (0, N_pad - N), (0, 0))) if needs_mask else x

    # tile sizes: 512 only when VMEM is large (v5e/v6e) and head count small; else 256
    tq_target = 512 if (vmem_cap > 100 * 2 ** 20 and num_heads < 16) else 256
    tq = _pick_tile(N_pad, tq_target)
    tk = tq
    nq, nk = N_pad // tq, N_pad // tk
    th = _pick_hidden_tile(Hm)
    nh = Hm // th

    # bf16 exp only where the EUP supports it and we're on the bf16 compute path
    use_bf16_exp = (compute_dtype == jnp.bfloat16) and (("v6" in kind) or ("v7" in kind))
    exp_dtype = jnp.bfloat16 if use_bf16_exp else jnp.float32
    recip_approx = compute_dtype == jnp.bfloat16    # exact reciprocal on the f32 check path

    wspec = pl.BlockSpec(memory_space=pltpu.MemorySpace.VMEM)   # small, VMEM-resident params

    # ---------------- call 1: LN1 + fused QKV projection ---------------- #
    resident1 = _padded_bytes((C, 3 * C), cbytes) + 3 * _padded_bytes((1, 3 * C), 4)
    tiles1 = 2 * (_padded_bytes((1, tq, C), xbytes)
                  + 3 * _padded_bytes((1, num_heads, tq, hd), cbytes))
    work1 = 3 * _padded_bytes((tq, 3 * C), 4)
    vmem1 = _vmem_limit(resident1 + tiles1 + work1, vmem_cap)
    cost1 = pl.CostEstimate(
        flops=int(2 * B * N_pad * C * 3 * C),
        transcendentals=int(B * N_pad),
        bytes_accessed=int(B * N_pad * C * (xbytes + 3 * cbytes) + 3 * C * C * cbytes))

    qkv_shape = jax.ShapeDtypeStruct((B, num_heads, N_pad, hd), compute_dtype)
    q, k, v = pl.pallas_call(
        functools.partial(_qkv_kernel, num_heads=num_heads),
        out_shape=(qkv_shape, qkv_shape, qkv_shape),
        grid_spec=pltpu.PrefetchScalarGridSpec(
            num_scalar_prefetch=0,
            grid=(B, nq),
            in_specs=[
                pl.BlockSpec((1, tq, C), lambda b, i: (b, i, 0)),   # x tile
                wspec, wspec,                                       # ln1 w, b
                wspec, wspec,                                       # W_qkv (C,3C), b_qkv (1,3C)
            ],
            out_specs=(
                pl.BlockSpec((1, num_heads, tq, hd), lambda b, i: (b, 0, i, 0)),
                pl.BlockSpec((1, num_heads, tq, hd), lambda b, i: (b, 0, i, 0)),
                pl.BlockSpec((1, num_heads, tq, hd), lambda b, i: (b, 0, i, 0)),
            ),
        ),
        compiler_params=pltpu.CompilerParams(
            dimension_semantics=("parallel", "parallel"),
            vmem_limit_bytes=vmem1),
        cost_estimate=cost1,
    )(x_pad, p["ln1_w"], p["ln1_b"], p["w_qkv"], p["b_qkv"])

    # -------- call 2: flash attention + proj + residual-1 -> x1 -------- #
    resident2 = _padded_bytes((C, C), cbytes) + _padded_bytes((1, C), 4)
    tiles2 = 2 * (_padded_bytes((1, tq, C), xbytes)
                  + _padded_bytes((1, num_heads, tq, hd), cbytes)
                  + 2 * _padded_bytes((1, num_heads, tk, hd), cbytes)
                  + _padded_bytes((1, tq, C), 4))
    scratch2 = (2 * _padded_bytes((num_heads, tq), 4)
                + _padded_bytes((num_heads, tq, hd), 4))
    work2 = 3 * num_heads * tq * _rnd_up(tk, 128) * 4      # s / p / exp temporaries
    vmem2 = _vmem_limit(resident2 + tiles2 + scratch2 + work2, vmem_cap)
    cost2 = pl.CostEstimate(
        flops=int(B * (4 * N_pad * N_pad * C + 2 * N_pad * C * C)),
        transcendentals=int(B * num_heads * N_pad * N_pad),
        bytes_accessed=int(B * N_pad * C * (xbytes + 3 * cbytes + 4) + C * C * cbytes))

    x1 = pl.pallas_call(
        functools.partial(_attn_kernel, n_actual=N, needs_mask=needs_mask,
                          exp_dtype=exp_dtype, recip_approx=recip_approx),
        out_shape=jax.ShapeDtypeStruct((B, N_pad, C), jnp.float32),
        grid_spec=pltpu.PrefetchScalarGridSpec(
            num_scalar_prefetch=0,
            grid=(B, nq, nk),
            in_specs=[
                pl.BlockSpec((1, tq, C), lambda b, i, j: (b, i, 0)),                  # x (residual)
                pl.BlockSpec((1, num_heads, tq, hd), lambda b, i, j: (b, 0, i, 0)),   # q tile
                pl.BlockSpec((1, num_heads, tk, hd), lambda b, i, j: (b, 0, j, 0)),   # k tile
                pl.BlockSpec((1, num_heads, tk, hd), lambda b, i, j: (b, 0, j, 0)),   # v tile
                wspec, wspec,                                                         # proj w, b
            ],
            out_specs=pl.BlockSpec((1, tq, C), lambda b, i, j: (b, i, 0)),
            scratch_shapes=[
                pltpu.VMEM((num_heads, tq), jnp.float32),       # running max (2-D, no lane pad)
                pltpu.VMEM((num_heads, tq), jnp.float32),       # running sum
                pltpu.VMEM((num_heads, tq, hd), jnp.float32),   # output accumulator
            ],
        ),
        compiler_params=pltpu.CompilerParams(
            dimension_semantics=("parallel", "parallel", "arbitrary"),
            vmem_limit_bytes=vmem2),
        cost_estimate=cost2,
    )(x_pad, q, k, v, p["proj_w"], p["proj_b"])

    # -------- call 3: LN2 + MLP (Hm-tiled) + residual-2 -------- #
    resident3 = 3 * _padded_bytes((1, C), 4)
    tiles3 = 2 * (_padded_bytes((1, tq, C), 4)
                  + _padded_bytes((C, th), cbytes)
                  + _padded_bytes((1, th), 4)
                  + _padded_bytes((th, C), cbytes)
                  + _padded_bytes((1, tq, C), xbytes))
    scratch3 = _padded_bytes((tq, C), cbytes) + _padded_bytes((tq, C), 4)
    work3 = 2 * tq * _rnd_up(th, 128) * 4
    vmem3 = _vmem_limit(resident3 + tiles3 + scratch3 + work3, vmem_cap)
    cost3 = pl.CostEstimate(
        flops=int(4 * B * N_pad * C * Hm),
        transcendentals=int(B * N_pad * Hm),
        bytes_accessed=int(B * N_pad * C * (4 + xbytes) + 2 * C * Hm * cbytes))

    out = pl.pallas_call(
        _mlp_kernel,
        out_shape=jax.ShapeDtypeStruct((B, N_pad, C), x.dtype),
        grid_spec=pltpu.PrefetchScalarGridSpec(
            num_scalar_prefetch=0,
            grid=(B, nq, nh),
            in_specs=[
                pl.BlockSpec((1, tq, C), lambda b, i, h: (b, i, 0)),   # x1 (LN2 input + residual)
                wspec, wspec,                                          # ln2 w, b
                pl.BlockSpec((C, th), lambda b, i, h: (0, h)),         # fc1 W chunk
                pl.BlockSpec((1, th), lambda b, i, h: (0, h)),         # fc1 b chunk
                pl.BlockSpec((th, C), lambda b, i, h: (h, 0)),         # fc2 W chunk
                wspec,                                                 # fc2 b
            ],
            out_specs=pl.BlockSpec((1, tq, C), lambda b, i, h: (b, i, 0)),
            scratch_shapes=[
                pltpu.VMEM((tq, C), compute_dtype),   # LN2(x1), computed once per q tile
                pltpu.VMEM((tq, C), jnp.float32),     # MLP / residual accumulator
            ],
        ),
        compiler_params=pltpu.CompilerParams(
            dimension_semantics=("parallel", "parallel", "arbitrary"),
            vmem_limit_bytes=vmem3),
        cost_estimate=cost3,
    )(x1, p["ln2_w"], p["ln2_b"], p["fc1_w"], p["fc1_b"], p["fc2_w"], p["fc2_b"])

    return out[:, :N, :] if needs_mask else out


# --------------------------------------------------------------------------- #
# Pure-JAX reference (mirrors the PyTorch forward, PyTorch weight layout)
# --------------------------------------------------------------------------- #
def eva_block_ref(x, params, num_heads: int):
    B, N, C = x.shape
    hd = C // num_heads
    scale = hd ** -0.5

    def ln(h, w, b):
        mu = jnp.mean(h, axis=-1, keepdims=True)
        var = jnp.mean((h - mu) ** 2, axis=-1, keepdims=True)
        return (h - mu) * jax.lax.rsqrt(var + LN_EPS) * w + b

    h = ln(x, params["ln1_w"], params["ln1_b"])
    qkv = h @ params["qkv_w"].T + params["qkv_b"]
    qkv = qkv.reshape(B, N, 3, num_heads, hd).transpose(2, 0, 3, 1, 4)
    q, k, v = qkv[0], qkv[1], qkv[2]                       # (B, H, N, hd)
    s = jnp.einsum("bhqd,bhkd->bhqk", q, k) * scale
    pr = jax.nn.softmax(s, axis=-1)
    o = jnp.einsum("bhqk,bhkd->bhqd", pr, v)
    o = o.transpose(0, 2, 1, 3).reshape(B, N, C)
    o = o @ params["proj_w"].T + params["proj_b"]
    x = x + o
    h2 = ln(x, params["ln2_w"], params["ln2_b"])
    a = jax.nn.gelu(h2 @ params["fc1_w"].T + params["fc1_b"], approximate=False)
    return x + (a @ params["fc2_w"].T + params["fc2_b"])


def make_params(key, dim, num_heads, mlp_ratio=4.0, dtype=jnp.float32):
    """Parameters in PyTorch layout: Linear weights are (out_features, in_features)."""
    hidden = int(dim * mlp_ratio)
    ks = jax.random.split(key, 8)
    s = 0.02
    q_bias = jnp.zeros((dim,), dtype)        # nn.Parameter(torch.zeros(...))
    k_bias = jnp.zeros((dim,), dtype)        # registered zero buffer
    v_bias = jnp.zeros((dim,), dtype)
    return {
        "ln1_w": jnp.ones((dim,), dtype), "ln1_b": jnp.zeros((dim,), dtype),
        "qkv_w": (s * jax.random.normal(ks[0], (3 * dim, dim))).astype(dtype),
        "qkv_b": jnp.concatenate([q_bias, k_bias, v_bias]),
        "proj_w": (s * jax.random.normal(ks[1], (dim, dim))).astype(dtype),
        "proj_b": (s * jax.random.normal(ks[2], (dim,))).astype(dtype),
        "ln2_w": jnp.ones((dim,), dtype), "ln2_b": jnp.zeros((dim,), dtype),
        "fc1_w": (s * jax.random.normal(ks[3], (hidden, dim))).astype(dtype),
        "fc1_b": (s * jax.random.normal(ks[4], (hidden,))).astype(dtype),
        "fc2_w": (s * jax.random.normal(ks[5], (dim, hidden))).astype(dtype),
        "fc2_b": (s * jax.random.normal(ks[6], (dim,))).astype(dtype),
    }


if __name__ == "__main__":
    # Small shapes consistent with the module: (B, N, C) tokens, 4 heads.
    # N=8 is not a multiple of 128, so the pad+mask flash path is exercised.
    B, N, C = 2, 8, 32
    NUM_HEADS = 4

    key = jax.random.PRNGKey(0)
    kx, kp = jax.random.split(key)
    x = jax.random.normal(kx, (B, N, C), dtype=jnp.float32)
    params = make_params(kp, C, NUM_HEADS)

    ref = eva_block_ref(x, params, NUM_HEADS)

    # Strict semantics check with f32 compute path (exact reciprocal, f32 exp).
    out_f32 = jax.block_until_ready(
        eva_block(x, params, NUM_HEADS, compute_dtype=jnp.float32))
    assert out_f32.shape == (B, N, C)
    assert jnp.allclose(out_f32, ref, atol=5e-3, rtol=5e-3), "f32 path mismatch"

    # Performance path: bf16 MXU matmuls with f32 accumulation (looser tolerance).
    out_bf16 = jax.block_until_ready(
        eva_block(x, params, NUM_HEADS, compute_dtype=jnp.bfloat16))
    assert out_bf16.shape == (B, N, C)
    assert jnp.allclose(out_bf16, ref, atol=5e-2, rtol=5e-2), "bf16 path mismatch"

    print("KERNEL_OK")
</pallas_src>

<mosaic_0001>
module attributes {stable_mosaic.version = 11 : i64} {
  func.func @_qkv_kernel(%arg0: i32, %arg1: i32, %arg2: memref<1x128x32xf32, #tpu.memory_space<vmem>>, %arg3: memref<1x32xf32, #tpu.memory_space<vmem>>, %arg4: memref<1x32xf32, #tpu.memory_space<vmem>>, %arg5: memref<32x96xf32, #tpu.memory_space<vmem>>, %arg6: memref<1x96xf32, #tpu.memory_space<vmem>>, %arg7: memref<1x4x128x8xf32, #tpu.memory_space<vmem>>, %arg8: memref<1x4x128x8xf32, #tpu.memory_space<vmem>>, %arg9: memref<1x4x128x8xf32, #tpu.memory_space<vmem>>) attributes {dimension_semantics = [#tpu.dimension_semantics<parallel>, #tpu.dimension_semantics<parallel>], iteration_bounds = array<i64: 2, 1>, scalar_prefetch = 0 : i64, scratch_operands = 0 : i64, tpu.core_type = #tpu.core_type<tc>, window_params = [{transform_indices = @transform_0, window_bounds = array<i64: 1, 128, 32>}, {pipeline_mode = #tpu.pipeline_mode<synchronous>, transform_indices = @transform_1, window_bounds = array<i64: 1, 32>}, {pipeline_mode = #tpu.pipeline_mode<synchronous>, transform_indices = @transform_2, window_bounds = array<i64: 1, 32>}, {pipeline_mode = #tpu.pipeline_mode<synchronous>, transform_indices = @transform_3, window_bounds = array<i64: 32, 96>}, {pipeline_mode = #tpu.pipeline_mode<synchronous>, transform_indices = @transform_4, window_bounds = array<i64: 1, 96>}, {transform_indices = @transform_5, window_bounds = array<i64: 1, 4, 128, 8>}, {transform_indices = @transform_6, window_bounds = array<i64: 1, 4, 128, 8>}, {transform_indices = @transform_7, window_bounds = array<i64: 1, 4, 128, 8>}]} {
    %c0 = arith.constant 0 : index
    %c0_0 = arith.constant 0 : index
    %c0_1 = arith.constant 0 : index
    %0 = vector.load %arg2[%c0, %c0_0, %c0_1] : memref<1x128x32xf32, #tpu.memory_space<vmem>>, vector<1x128x32xf32>
    %1 = vector.shape_cast %0 : vector<1x128x32xf32> to vector<128x32xf32>
    %c0_2 = arith.constant 0 : index
    %c0_3 = arith.constant 0 : index
    %2 = vector.load %arg3[%c0_2, %c0_3] : memref<1x32xf32, #tpu.memory_space<vmem>>, vector<1x32xf32>
    %c0_4 = arith.constant 0 : index
    %c0_5 = arith.constant 0 : index
    %3 = vector.load %arg4[%c0_4, %c0_5] : memref<1x32xf32, #tpu.memory_space<vmem>>, vector<1x32xf32>
    %cst = arith.constant dense<0.000000e+00> : vector<128xf32>
    %4 = vector.multi_reduction <add>, %1, %cst [1] : vector<128x32xf32> to vector<128xf32>
    %5 = vector.shape_cast %4 : vector<128xf32> to vector<128x1xf32>
    %cst_6 = arith.constant 3.200000e+01 : f32
    %6 = vector.broadcast %cst_6 : f32 to vector<128x1xf32>
    %7 = arith.divf %5, %6 : vector<128x1xf32>
    %8 = vector.broadcast %7 : vector<128x1xf32> to vector<128x32xf32>
    %9 = arith.subf %1, %8 : vector<128x32xf32>
    %10 = arith.mulf %9, %9 : vector<128x32xf32>
    %cst_7 = arith.constant dense<0.000000e+00> : vector<128xf32>
    %11 = vector.multi_reduction <add>, %10, %cst_7 [1] : vector<128x32xf32> to vector<128xf32>
    %12 = vector.shape_cast %11 : vector<128xf32> to vector<128x1xf32>
    %cst_8 = arith.constant 3.200000e+01 : f32
    %13 = vector.broadcast %cst_8 : f32 to vector<128x1xf32>
    %14 = arith.divf %12, %13 : vector<128x1xf32>
    %15 = vector.broadcast %7 : vector<128x1xf32> to vector<128x32xf32>
    %16 = arith.subf %1, %15 : vector<128x32xf32>
    %cst_9 = arith.constant 9.99999997E-7 : f32
    %17 = vector.broadcast %cst_9 : f32 to vector<128x1xf32>
    %18 = arith.addf %14, %17 : vector<128x1xf32>
    %19 = math.rsqrt %18 : vector<128x1xf32>
    %20 = vector.broadcast %19 : vector<128x1xf32> to vector<128x32xf32>
    %21 = arith.mulf %16, %20 : vector<128x32xf32>
    %22 = vector.broadcast %2 : vector<1x32xf32> to vector<128x32xf32>
    %23 = arith.mulf %21, %22 : vector<128x32xf32>
    %24 = vector.broadcast %3 : vector<1x32xf32> to vector<128x32xf32>
    %25 = arith.addf %23, %24 : vector<128x32xf32>
    %c0_10 = arith.constant 0 : index
    %c0_11 = arith.constant 0 : index
    %26 = vector.load %arg5[%c0_10, %c0_11] : memref<32x96xf32, #tpu.memory_space<vmem>>, vector<32x96xf32>
    %cst_12 = arith.constant dense<0.000000e+00> : vector<128x96xf32>
    %27 = tpu.matmul %25, %26, %cst_12 {dimension_numbers = #tpu.dot_dimension_numbers<[1], [0], [0], [1], [0, 0, 1, 1], [], []>} : vector<128x32xf32>, vector<32x96xf32>, vector<128x96xf32> -> vector<128x96xf32>
    %c0_13 = arith.constant 0 : index
    %c0_14 = arith.constant 0 : index
    %28 = vector.load %arg6[%c0_13, %c0_14] : memref<1x96xf32, #tpu.memory_space<vmem>>, vector<1x96xf32>
    %29 = vector.broadcast %28 : vector<1x96xf32> to vector<128x96xf32>
    %30 = arith.addf %27, %29 : vector<128x96xf32>
    %31 = vector.extract_strided_slice %30 {offsets = [0, 0], sizes = [128, 32], strides = [1, 1]} : vector<128x96xf32> to vector<128x32xf32>
    %32 = vector.shape_cast %31 : vector<128x32xf32> to vector<128x4x8xf32>
    %33 = tpu.transpose %32, [1, 0, 2] : vector<128x4x8xf32> -> vector<4x128x8xf32>
    %c0_15 = arith.constant 0 : index
    %c0_16 = arith.constant 0 : index
    %c0_17 = arith.constant 0 : index
    %c0_18 = arith.constant 0 : index
    %34 = vector.load %arg7[%c0_15, %c0_16, %c0_17, %c0_18] : memref<1x4x128x8xf32, #tpu.memory_space<vmem>>, vector<1x4x128x8xf32>
    %35 = vector.shape_cast %34 : vector<1x4x128x8xf32> to vector<4x128x8xf32>
    %36 = vector.shape_cast %33 : vector<4x128x8xf32> to vector<1x4x128x8xf32>
    tpu.vector_store %arg7[%c0_15, %c0_16, %c0_17, %c0_18], %36 {strides = array<i32>} : memref<1x4x128x8xf32, #tpu.memory_space<vmem>>, vector<1x4x128x8xf32>,
    %37 = vector.extract_strided_slice %30 {offsets = [0, 32], sizes = [128, 32], strides = [1, 1]} : vector<128x96xf32> to vector<128x32xf32>
    %38 = vector.shape_cast %37 : vector<128x32xf32> to vector<128x4x8xf32>
    %39 = tpu.transpose %38, [1, 0, 2] : vector<128x4x8xf32> -> vector<4x128x8xf32>
    %c0_19 = arith.constant 0 : index
    %c0_20 = arith.constant 0 : index
    %c0_21 = arith.constant 0 : index
    %c0_22 = arith.constant 0 : index
    %40 = vector.load %arg8[%c0_19, %c0_20, %c0_21, %c0_22] : memref<1x4x128x8xf32, #tpu.memory_space<vmem>>, vector<1x4x128x8xf32>
    %41 = vector.shape_cast %40 : vector<1x4x128x8xf32> to vector<4x128x8xf32>
    %42 = vector.shape_cast %39 : vector<4x128x8xf32> to vector<1x4x128x8xf32>
    tpu.vector_store %arg8[%c0_19, %c0_20, %c0_21, %c0_22], %42 {strides = array<i32>} : memref<1x4x128x8xf32, #tpu.memory_space<vmem>>, vector<1x4x128x8xf32>,
    %43 = vector.extract_strided_slice %30 {offsets = [0, 64], sizes = [128, 32], strides = [1, 1]} : vector<128x96xf32> to vector<128x32xf32>
    %44 = vector.shape_cast %43 : vector<128x32xf32> to vector<128x4x8xf32>
    %45 = tpu.transpose %44, [1, 0, 2] : vector<128x4x8xf32> -> vector<4x128x8xf32>
    %c0_23 = arith.constant 0 : index
    %c0_24 = arith.constant 0 : index
    %c0_25 = arith.constant 0 : index
    %c0_26 = arith.constant 0 : index
    %46 = vector.load %arg9[%c0_23, %c0_24, %c0_25, %c0_26] : memref<1x4x128x8xf32, #tpu.memory_space<vmem>>, vector<1x4x128x8xf32>
    %47 = vector.shape_cast %46 : vector<1x4x128x8xf32> to vector<4x128x8xf32>
    %48 = vector.shape_cast %45 : vector<4x128x8xf32> to vector<1x4x128x8xf32>
    tpu.vector_store %arg9[%c0_23, %c0_24, %c0_25, %c0_26], %48 {strides = array<i32>} : memref<1x4x128x8xf32, #tpu.memory_space<vmem>>, vector<1x4x128x8xf32>,
    return
  }
  func.func @transform_0(%arg0: i32, %arg1: i32) -> (i32, i32, i32) {
    %c0_i32 = arith.constant 0 : i32
    %c0_i32_0 = arith.constant 0 : i32
    return %arg0, %arg1, %c0_i32 : i32, i32, i32
  }
  func.func @transform_1(%arg0: i32, %arg1: i32) -> (i32, i32) {
    %c0_i32 = arith.constant 0 : i32
    %c0_i32_0 = arith.constant 0 : i32
    %c0_i32_1 = arith.constant 0 : i32
    return %c0_i32, %c0_i32_0 : i32, i32
  }
  func.func @transform_2(%arg0: i32, %arg1: i32) -> (i32, i32) {
    %c0_i32 = arith.constant 0 : i32
    %c0_i32_0 = arith.constant 0 : i32
    %c0_i32_1 = arith.constant 0 : i32
    return %c0_i32, %c0_i32_0 : i32, i32
  }
  func.func @transform_3(%arg0: i32, %arg1: i32) -> (i32, i32) {
    %c0_i32 = arith.constant 0 : i32
    %c0_i32_0 = arith.constant 0 : i32
    %c0_i32_1 = arith.constant 0 : i32
    return %c0_i32, %c0_i32_0 : i32, i32
  }
  func.func @transform_4(%arg0: i32, %arg1: i32) -> (i32, i32) {
    %c0_i32 = arith.constant 0 : i32
    %c0_i32_0 = arith.constant 0 : i32
    %c0_i32_1 = arith.constant 0 : i32
    return %c0_i32, %c0_i32_0 : i32, i32
  }
  func.func @transform_5(%arg0: i32, %arg1: i32) -> (i32, i32, i32, i32) {
    %c0_i32 = arith.constant 0 : i32
    %c0_i32_0 = arith.constant 0 : i32
    %c0_i32_1 = arith.constant 0 : i32
    return %arg0, %c0_i32, %arg1, %c0_i32_0 : i32, i32, i32, i32
  }
  func.func @transform_6(%arg0: i32, %arg1: i32) -> (i32, i32, i32, i32) {
    %c0_i32 = arith.constant 0 : i32
    %c0_i32_0 = arith.constant 0 : i32
    %c0_i32_1 = arith.constant 0 : i32
    return %arg0, %c0_i32, %arg1, %c0_i32_0 : i32, i32, i32, i32
  }
  func.func @transform_7(%arg0: i32, %arg1: i32) -> (i32, i32, i32, i32) {
    %c0_i32 = arith.constant 0 : i32
    %c0_i32_0 = arith.constant 0 : i32
    %c0_i32_1 = arith.constant 0 : i32
    return %arg0, %c0_i32, %arg1, %c0_i32_0 : i32, i32, i32, i32
  }
}

</mosaic_0001>

<bundles_post_ra>
// kernel: tpu_custom_call.1
= control target key start
LH: loop header
LB: loop body
LE: loop exit
PB: predicated region body
PF: predicated region fallthrough
CT: control target
= control target key end

     0   :  { %s8621_s24 = smov 0   ;;  %s8623_s25 = smov 0   ;;  %s11456_s0 = inlined_call_operand.vmem [shape: f32[2,128,32], index: 0, kind: input, shape index: {}]   ;;  %s11457_s1 = inlined_call_operand.vmem [shape: f32[1,32], index: 1, kind: input, shape index: {}]   ;;  %s11458_s2 = inlined_call_operand.vmem [shape: f32[1,32], index: 2, kind: input, shape index: {}]   ;;  %s11459_s3 = inlined_call_operand.vmem [shape: f32[32,96], index: 3, kind: input, shape index: {}]   ;;  %s11460_s4 = inlined_call_operand.vmem [shape: f32[1,96], index: 4, kind: input, shape index: {}]   ;;  %s11461_s5 = inlined_call_operand.vmem [shape: f32[2,4,128,8], index: 5, kind: output, shape index: {0}]   ;;  %s11462_s6 = inlined_call_operand.vmem [shape: f32[2,4,128,8], index: 6, kind: output, shape index: {1}]   ;;  %s11463_s7 = inlined_call_operand.vmem [shape: f32[2,4,128,8], index: 7, kind: output, shape index: {2}]  }
   0x1   :  { %s8625_s26 = smov 0  }
   0x2 LB: > { %s30_s27 = sadd.s32 1, %s8568_s25  ;;  %p8297_p0 = scmp.ge.s32.totalorder %s8572_s26, 1  ;;  %s8572_s26 = sphi %s8625_s26, %s18_s26   ;;  %s8568_s25 = sphi %s8623_s25, %s11522_s25   ;;  %s8564_s24 = sphi %s8621_s24, %s11521_s24  }
   0x3   : > { %p32_p1 = scmp.ge.s32.totalorder %s30_s27, 2  ;;  %p267_p2 = scmp.lt.s32.totalorder %s8572_s26, 3 }
   0x5   : > { %s11524_s27 = smov (%p32_p1, %s30_s27), 0  ;;  %p268_p3 = pnand %p8297_p0, %p267_p2 }
   0x7   : > { %271 = sbr.rel (%p268_p3) target bundleno = 1127 (0x467), region = 40 }
   0xc   : > { %p326_p4 = scmp.lt.s32.totalorder %s8564_s24, 1  ;;  %vm383_vm0 = vcmask 261120   ;;  %s8574_s23 = smov 120   ;;  %vm3177_vm1 = vcmask 64512  }
   0xd   : > { %s8576_s29 = smov 104   ;;  %s8577_s30 = smov 96  }
   0xe   : > { %s11526_s24 = smov (!%p326_p4, %s8564_s24), 1 }
   0xf   : > { %s8423_s28 = sshll.u32 %s11526_s24, 7  ;;  %s9171_s9 = sshll.u32 %s11526_s24, 9 }
  0x10   : > { %s8645_s8 = scalar_lea.vmem %s11456_s0, %s8423_s28  ;;  %s8575_s28 = smov 112  }
  0x11   : > { %v365_v0 = vld [vmem:[%s8645_s8] sm:$0xff]  ;;  %v366_v1 = vld [vmem:[%s8645_s8 + $0x8] sm:$0xff]  ;;  %v367_v8 = vld [vmem:[%s8645_s8 + $0x10] sm:$0xff]  ;;  %s9189_s11 = scalar_lea.vmem %s11461_s5, %s9171_s9  ;;  %s10071_s14 = scalar_lea.vmem %s11462_s6, %s9171_s9 }
  0x12   : > { %v373_v2 = vld [vmem:[%s8645_s8 + $0x40] sm:$0xff]  ;;  %v384_v3 = vsel %vm383_vm0, %v365_v0, 0.0  ;;  %v387_v4 = vsel %vm383_vm0, %v366_v1, 0.0  ;;  %v374_v5 = vld [vmem:[%s8645_s8 + $0x48] sm:$0xff]  ;;  %v375_v9 = vld [vmem:[%s8645_s8 + $0x50] sm:$0xff]  ;;  %v390_v10 = vsel %vm383_vm0, %v367_v8, 0.0  ;;  %s10285_s17 = scalar_lea.vmem %s11463_s7, %s9171_s9 }
  0x13   : > { %385 = vadd.xlane.f32.xlu0 %v384_v3  ;;  %388 = vadd.xlane.f32.xlu1 %v387_v4  ;;  %v408_v6 = vsel %vm383_vm0, %v373_v2, 0.0  ;;  %v411_v7 = vsel %vm383_vm0, %v374_v5, 0.0  ;;  %v414_v11 = vsel %vm383_vm0, %v375_v9, 0.0  ;;  %v8660_v12 = vld [vmem:[%s8645_s8 + $0x18] sm:$0xff]  ;;  %v8670_v16 = vld [vmem:[%s8645_s8 + $0x20] sm:$0xff]  ;;  %v8680_v20 = vld [vmem:[%s8645_s8 + $0x28] sm:$0xff] }
  0x14   : > { %v8663_v13 = vld [vmem:[%s8645_s8 + $0x58] sm:$0xff]  ;;  %v393_v14 = vsel %vm383_vm0, %v8660_v12, 0.0  ;;  %v8673_v17 = vld [vmem:[%s8645_s8 + $0x60] sm:$0xff]  ;;  %v396_v18 = vsel %vm383_vm0, %v8670_v16, 0.0  ;;  %v8683_v21 = vld [vmem:[%s8645_s8 + $0x68] sm:$0xff]  ;;  %v399_v22 = vsel %vm383_vm0, %v8680_v20, 0.0 }
  0x15   : > { %v417_v15 = vsel %vm383_vm0, %v8663_v13, 0.0  ;;  %v420_v19 = vsel %vm383_vm0, %v8673_v17, 0.0  ;;  %v423_v23 = vsel %vm383_vm0, %v8683_v21, 0.0  ;;  %v8690_v24 = vld [vmem:[%s8645_s8 + $0x30] sm:$0xff]  ;;  %v8700_v28 = vld [vmem:[%s8645_s8 + $0x38] sm:$0xff] }
  0x16   : > { %v8693_v25 = vld [vmem:[%s8645_s8 + $0x70] sm:$0xff]  ;;  %v402_v26 = vsel %vm383_vm0, %v8690_v24, 0.0  ;;  %v8703_v29 = vld [vmem:[%s8645_s8 + $0x78] sm:$0xff]  ;;  %v405_v30 = vsel %vm383_vm0, %v8700_v28, 0.0  ;;  %s8578_s8 = smov 64  }
  0x17   : > { %409 = vadd.xlane.f32.xlu0 %v408_v6  ;;  %412 = vadd.xlane.f32.xlu1 %v411_v7  ;;  %v426_v27 = vsel %vm383_vm0, %v8693_v25, 0.0  ;;  %v429_v31 = vsel %vm383_vm0, %v8703_v29, 0.0 }
  0x1b   : > { %391 = vadd.xlane.f32.xlu0 %v390_v10  ;;  %415 = vadd.xlane.f32.xlu1 %v414_v11 }
  0x1f   : > { %394 = vadd.xlane.f32.xlu0 %v393_v14  ;;  %418 = vadd.xlane.f32.xlu1 %v417_v15 }
  0x23   : > { %397 = vadd.xlane.f32.xlu0 %v396_v18  ;;  %421 = vadd.xlane.f32.xlu1 %v420_v19 }
  0x27   : > { %400 = vadd.xlane.f32.xlu0 %v399_v22  ;;  %424 = vadd.xlane.f32.xlu1 %v423_v23 }
  0x2b   : > { %403 = vadd.xlane.f32.xlu0 %v402_v26  ;;  %427 = vadd.xlane.f32.xlu1 %v426_v27 }
  0x2f   : > { %406 = vadd.xlane.f32.xlu0 %v405_v30  ;;  %430 = vadd.xlane.f32.xlu1 %v429_v31 }
  0x9c   : > { %v386_v32 = vpop.xlane.xlu0 %385  ;;  %v389_v33 = vpop.xlane.xlu1 %388 }
  0x9d   : > { %v433_v34 = vmul.f32 0.03125, %v386_v32  ;;  %v434_v35 = vmul.f32 0.03125, %v389_v33 }
  0x9f   : > { %v8709_v36 = vsub.f32 %v365_v0, %v433_v34  ;;  %v8711_v37 = vsub.f32 %v366_v1, %v434_v35 }
  0xa0   : > { %v410_v38 = vpop.xlane.xlu0 %409  ;;  %v413_v39 = vpop.xlane.xlu1 %412 }
  0xa1   : > { %v441_v40 = vmul.f32 0.03125, %v410_v38  ;;  %v442_v41 = vmul.f32 0.03125, %v413_v39  ;;  %v465_v42 = vmul.f32 %v8709_v36, %v8709_v36  ;;  %v466_v43 = vmul.f32 %v8711_v37, %v8711_v37 }
  0xa3   : > { %v8717_v44 = vsub.f32 %v373_v2, %v441_v40  ;;  %v8719_v45 = vsub.f32 %v374_v5, %v442_v41  ;;  %v481_v46 = vsel %vm383_vm0, %v465_v42, 0.0  ;;  %v484_v49 = vsel %vm383_vm0, %v466_v43, 0.0 }
  0xa4   : > { %482 = vadd.xlane.f32.xlu0 %v481_v46  ;;  %v392_v47 = vpop.xlane.xlu0 %391  ;;  %v416_v48 = vpop.xlane.xlu1 %415 }
  0xa5   : > { %v435_v50 = vmul.f32 0.03125, %v392_v47  ;;  %v443_v51 = vmul.f32 0.03125, %v416_v48  ;;  %v473_v52 = vmul.f32 %v8717_v44, %v8717_v44  ;;  %v474_v53 = vmul.f32 %v8719_v45, %v8719_v45 }
  0xa7   : > { %v8727_v54 = vsub.f32 %v367_v8, %v435_v50  ;;  %v8729_v55 = vsub.f32 %v375_v9, %v443_v51  ;;  %v505_v56 = vsel %vm383_vm0, %v473_v52, 0.0  ;;  %v508_v59 = vsel %vm383_vm0, %v474_v53, 0.0  ;;  %v639_v53 = vld [vmem:[%s11459_s3 + $0x10] sm:$0xff] }
  0xa8   : > { %485 = vadd.xlane.f32.xlu0 %v484_v49  ;;  %506 = vadd.xlane.f32.xlu1 %v505_v56  ;;  %v395_v57 = vpop.xlane.xlu0 %394  ;;  %v419_v58 = vpop.xlane.xlu1 %418  ;;  %v638_v56 = vld [vmem:[%s11459_s3 + $0x8] sm:$0xff] }
  0xa9   : > { %v436_v60 = vmul.f32 0.03125, %v395_v57  ;;  %v444_v61 = vmul.f32 0.03125, %v419_v58  ;;  %v467_v62 = vmul.f32 %v8727_v54, %v8727_v54  ;;  %v475_v63 = vmul.f32 %v8729_v55, %v8729_v55  ;;  %v637_v57 = vld [vmem:[%s11459_s3] sm:$0xff] }
  0xab   : > { %v8738_v0 = vsub.f32 %v8660_v12, %v436_v60  ;;  %v8741_v1 = vsub.f32 %v8663_v13, %v444_v61  ;;  %v487_v2 = vsel %vm383_vm0, %v467_v62, 0.0  ;;  %v511_v5 = vsel %vm383_vm0, %v475_v63, 0.0 }
  0xac   : > { %509 = vadd.xlane.f32.xlu1 %v508_v59  ;;  %488 = vadd.xlane.f32.xlu0 %v487_v2  ;;  %v398_v3 = vpop.xlane.xlu0 %397  ;;  %v422_v4 = vpop.xlane.xlu1 %421 }
  0xad   : > { %v437_v6 = vmul.f32 0.03125, %v398_v3  ;;  %v445_v7 = vmul.f32 0.03125, %v422_v4  ;;  %v468_v8 = vmul.f32 %v8738_v0, %v8738_v0  ;;  %v476_v9 = vmul.f32 %v8741_v1, %v8741_v1 }
  0xaf   : > { %v8750_v10 = vsub.f32 %v8670_v16, %v437_v6  ;;  %v8753_v11 = vsub.f32 %v8673_v17, %v445_v7  ;;  %v490_v12 = vsel %vm383_vm0, %v468_v8, 0.0  ;;  %v514_v15 = vsel %vm383_vm0, %v476_v9, 0.0 }
  0xb0   : > { %512 = vadd.xlane.f32.xlu1 %v511_v5  ;;  %491 = vadd.xlane.f32.xlu0 %v490_v12  ;;  %v401_v13 = vpop.xlane.xlu0 %400  ;;  %v425_v14 = vpop.xlane.xlu1 %424 }
  0xb1   : > { %v438_v18 = vmul.f32 0.03125, %v401_v13  ;;  %v446_v19 = vmul.f32 0.03125, %v425_v14  ;;  %v469_v22 = vmul.f32 %v8750_v10, %v8750_v10  ;;  %v477_v16 = vmul.f32 %v8753_v11, %v8753_v11 }
  0xb3   : > { %v8762_v23 = vsub.f32 %v8680_v20, %v438_v18  ;;  %v8765_v17 = vsub.f32 %v8683_v21, %v446_v19  ;;  %v493_v26 = vsel %vm383_vm0, %v469_v22, 0.0  ;;  %v517_v31 = vsel %vm383_vm0, %v477_v16, 0.0 }
  0xb4   : > { %515 = vadd.xlane.f32.xlu1 %v514_v15  ;;  %494 = vadd.xlane.f32.xlu0 %v493_v26  ;;  %v404_v27 = vpop.xlane.xlu0 %403  ;;  %v428_v30 = vpop.xlane.xlu1 %427 }
  0xb5   : > { %v439_v32 = vmul.f32 0.03125, %v404_v27  ;;  %v447_v33 = vmul.f32 0.03125, %v428_v30  ;;  %v470_v34 = vmul.f32 %v8762_v23, %v8762_v23  ;;  %v478_v20 = vmul.f32 %v8765_v17, %v8765_v17 }
  0xb7   : > { %v8774_v35 = vsub.f32 %v8690_v24, %v439_v32  ;;  %v8777_v21 = vsub.f32 %v8693_v25, %v447_v33  ;;  %v496_v38 = vsel %vm383_vm0, %v470_v34, 0.0  ;;  %v520_v41 = vsel %vm383_vm0, %v478_v20, 0.0  ;;  %v8814_v32 = vld [vmem:[%s11457_s1] ss:$0 sm:$0xff] }
  0xb8   : > { %518 = vadd.xlane.f32.xlu1 %v517_v31  ;;  %497 = vadd.xlane.f32.xlu0 %v496_v38  ;;  %v407_v39 = vpop.xlane.xlu0 %406  ;;  %v431_v40 = vpop.xlane.xlu1 %430 }
  0xb9   : > { %v440_v42 = vmul.f32 0.03125, %v407_v39  ;;  %v448_v43 = vmul.f32 0.03125, %v431_v40  ;;  %v471_v46 = vmul.f32 %v8774_v35, %v8774_v35  ;;  %v479_v24 = vmul.f32 %v8777_v21, %v8777_v21  ;;  %v8820_v40 = vld [vmem:[%s11458_s2] ss:$0 sm:$0xff] }
  0xbb   : > { %v8786_v47 = vsub.f32 %v8700_v28, %v440_v42  ;;  %v8789_v25 = vsub.f32 %v8703_v29, %v448_v43  ;;  %v499_v48 = vsel %vm383_vm0, %v471_v46, 0.0  ;;  %v523_v49 = vsel %vm383_vm0, %v479_v24, 0.0  ;;  %v640_v29 = vld [vmem:[%s11459_s3 + $0x18] sm:$0xff] }
  0xbc   : > { %521 = vadd.xlane.f32.xlu1 %v520_v41  ;;  %500 = vadd.xlane.f32.xlu0 %v499_v48 }
  0xbd   : > { %v472_v50 = vmul.f32 %v8786_v47, %v8786_v47  ;;  %v480_v51 = vmul.f32 %v8789_v25, %v8789_v25  ;;  %8447 = vmatprep.subr.mxu0 %v640_v29  ;;  %8479 = vmatprep.subr.mxu1 %v640_v29 }
  0xbe   : > { %8448 = vmatpush3.msra.mxu0 %v640_v29  ;;  %8483 = vmatpush3.msra.mxu1 %v640_v29 }
  0xbf   : > { %v502_v52 = vsel %vm383_vm0, %v472_v50, 0.0  ;;  %v526_v28 = vsel %vm383_vm0, %v480_v51, 0.0  ;;  %8449 = vmatprep.subr.mxu0 %v639_v53  ;;  %8480 = vmatprep.subr.mxu1 %v639_v53 }
  0xc0   : > { %524 = vadd.xlane.f32.xlu1 %v523_v49  ;;  %503 = vadd.xlane.f32.xlu0 %v502_v52 }
  0xc1   : > { %8450 = vmatpush3.msra.mxu0 %v639_v53  ;;  %8484 = vmatpush3.msra.mxu1 %v639_v53 }
  0xc2   : > { %8451 = vmatprep.subr.mxu0 %v638_v56  ;;  %8481 = vmatprep.subr.mxu1 %v638_v56 }
  0xc3   : > { %8452 = vmatpush3.msra.mxu0 %v638_v56  ;;  %8485 = vmatpush3.msra.mxu1 %v638_v56 }
  0xc4   : > { %527 = vadd.xlane.f32.xlu1 %v526_v28  ;;  %8453 = vmatprep.subr.mxu0 %v637_v57 }
  0xc5   : > { %8454 = vmatpush3.msra.mxu0 %v637_v57  ;;  %8482 = vmatprep.subr.mxu1 %v637_v57 }
  0xc6   : > { %8486 = vmatpush3.msra.mxu1 %v637_v57 }
 0x12d   : > { %v483_v58 = vpop.xlane.xlu0 %482 }
 0x12e   : > { %v529_v59 = vmul.f32 0.03125, %v483_v58 }
 0x130   : > { %v545_v60 = vadd.f32 1e-06, %v529_v59 }
 0x131   : > { %v507_v61 = vpop.xlane.xlu1 %506  ;;  %v486_v62 = vpop.xlane.xlu0 %485 }
 0x132   : > { %8518 = vrsqrt.f32 %v545_v60  ;;  %v537_v63 = vmul.f32 0.03125, %v507_v61  ;;  %v530_v2 = vmul.f32 0.03125, %v486_v62 }
 0x134   : > { %v553_v3 = vadd.f32 1e-06, %v537_v63  ;;  %v546_v4 = vadd.f32 1e-06, %v530_v2 }
 0x135   : > { %v510_v5 = vpop.xlane.xlu1 %509  ;;  %v489_v6 = vpop.xlane.xlu0 %488 }
 0x136   : > { %8520 = vrsqrt.f32 %v553_v3  ;;  %v538_v7 = vmul.f32 0.03125, %v510_v5  ;;  %v531_v8 = vmul.f32 0.03125, %v489_v6 }
 0x137   : > { %8522 = vrsqrt.f32 %v546_v4 }
 0x138   : > { %v554_v9 = vadd.f32 1e-06, %v538_v7  ;;  %v547_v12 = vadd.f32 1e-06, %v531_v8 }
 0x139   : > { %v513_v13 = vpop.xlane.xlu1 %512  ;;  %v492_v14 = vpop.xlane.xlu0 %491 }
 0x13a   : > { %8524 = vrsqrt.f32 %v554_v9  ;;  %v539_v15 = vmul.f32 0.03125, %v513_v13  ;;  %v532_v18 = vmul.f32 0.03125, %v492_v14 }
 0x13b   : > { %8526 = vrsqrt.f32 %v547_v12 }
 0x13c   : > { %v555_v19 = vadd.f32 1e-06, %v539_v15  ;;  %v548_v22 = vadd.f32 1e-06, %v532_v18 }
 0x13d   : > { %v516_v16 = vpop.xlane.xlu1 %515  ;;  %v495_v26 = vpop.xlane.xlu0 %494 }
 0x13e   : > { %8528 = vrsqrt.f32 %v555_v19  ;;  %v540_v27 = vmul.f32 0.03125, %v516_v16  ;;  %v533_v30 = vmul.f32 0.03125, %v495_v26 }
 0x13f   : > { %v8519_v31 = vpop.eup %8518  ;;  %8530 = vrsqrt.f32 %v548_v22 }
 0x140   : > { %v556_v33 = vadd.f32 1e-06, %v540_v27  ;;  %v549_v34 = vadd.f32 1e-06, %v533_v30  ;;  %v577_v20 = vmul.f32 %v8519_v31, %v8709_v36 }
 0x141   : > { %v519_v38 = vpop.xlane.xlu1 %518  ;;  %v498_v39 = vpop.xlane.xlu0 %497 }
 0x142   : > { %8532 = vrsqrt.f32 %v556_v33  ;;  %v541_v41 = vmul.f32 0.03125, %v519_v38  ;;  %v534_v42 = vmul.f32 0.03125, %v498_v39  ;;  %v599_v43 = vmul.f32 %v8814_v32, %v577_v20 }
 0x143   : > { %v8521_v46 = vpop.eup %8520  ;;  %8534 = vrsqrt.f32 %v549_v34 }
 0x144   : > { %v8523_v24 = vpop.eup %8522  ;;  %v557_v48 = vadd.f32 1e-06, %v541_v41  ;;  %v550_v49 = vadd.f32 1e-06, %v534_v42  ;;  %v621_v50 = vadd.f32 %v8820_v40, %v599_v43  ;;  %v585_v36 = vmul.f32 %v8521_v46, %v8717_v44 }
 0x145   : > { %v522_v51 = vpop.xlane.xlu1 %521  ;;  %v501_v52 = vpop.xlane.xlu0 %500  ;;  %v578_v28 = vmul.f32 %v8523_v24, %v8711_v37 }
 0x146   : > { %8536 = vrsqrt.f32 %v557_v48  ;;  %v542_v29 = vmul.f32 0.03125, %v522_v51  ;;  %v535_v53 = vmul.f32 0.03125, %v501_v52  ;;  %8455 = vmatprep.mubr.msk.f32.mxu0 %vm383_vm0, %v621_v50  ;;  %v607_v56 = vmul.f32 %v8814_v32, %v585_v36 }
 0x147   : > { %v8525_v57 = vpop.eup %8524  ;;  %8538 = vrsqrt.f32 %v550_v49  ;;  %v600_v58 = vmul.f32 %v8814_v32, %v578_v28 }
 0x148   : > { %v8527_v59 = vpop.eup %8526  ;;  %v558_v60 = vadd.f32 1e-06, %v542_v29  ;;  %v551_v61 = vadd.f32 1e-06, %v535_v53  ;;  %v629_v44 = vadd.f32 %v8820_v40, %v607_v56  ;;  %v586_v62 = vmul.f32 %v8525_v57, %v8719_v45 }
 0x149   : > { %v525_v63 = vpop.xlane.xlu1 %524  ;;  %v504_v37 = vpop.xlane.xlu0 %503  ;;  %v622_v2 = vadd.f32 %v8820_v40, %v600_v58  ;;  %v579_v3 = vmul.f32 %v8527_v59, %v8727_v54 }
 0x14a   : > { %8540 = vrsqrt.f32 %v558_v60  ;;  %v543_v4 = vmul.f32 0.03125, %v525_v63  ;;  %v536_v5 = vmul.f32 0.03125, %v504_v37  ;;  %8467 = vmatprep.mubr.msk.f32.mxu1 %vm383_vm0, %v629_v44  ;;  %v608_v6 = vmul.f32 %v8814_v32, %v586_v62  ;;  %v8888_v44 = vld [vmem:[%s11460_s4] ss:$0 sm:$0xff] }
 0x14b   : > { %v8529_v7 = vpop.eup %8528  ;;  %8542 = vrsqrt.f32 %v551_v61  ;;  %8456 = vmatmul.mubr.msk.f32.vlgmr.msra.gmra.mxu0 %vm383_vm0, %v622_v2  ;;  %v601_v8 = vmul.f32 %v8814_v32, %v579_v3 }
 0x14c   : > { %v8531_v45 = vpop.eup %8530  ;;  %v559_v9 = vadd.f32 1e-06, %v543_v4  ;;  %v552_v12 = vadd.f32 1e-06, %v536_v5  ;;  %v630_v13 = vadd.f32 %v8820_v40, %v608_v6  ;;  %v587_v54 = vmul.f32 %v8529_v7, %v8729_v55 }
 0x14d   : > { %v528_v14 = vpop.xlane.xlu1 %527  ;;  %v623_v15 = vadd.f32 %v8820_v40, %v601_v8  ;;  %v580_v18 = vmul.f32 %v8531_v45, %v8738_v0 }
 0x14e   : > { %8544 = vrsqrt.f32 %v559_v9  ;;  %v544_v19 = vmul.f32 0.03125, %v528_v14  ;;  %8468 = vmatmul.mubr.msk.f32.vlgmr.msra.gmra.mxu1 %vm383_vm0, %v630_v13  ;;  %v609_v22 = vmul.f32 %v8814_v32, %v587_v54 }
 0x14f   : > { %v8533_v16 = vpop.eup %8532  ;;  %8546 = vrsqrt.f32 %v552_v12  ;;  %8458 = vmatprep.mubr.msk.f32.mxu0 %vm383_vm0, %v623_v15  ;;  %v602_v26 = vmul.f32 %v8814_v32, %v580_v18 }
 0x150   : > { %v8535_v27 = vpop.eup %8534  ;;  %v560_v30 = vadd.f32 1e-06, %v544_v19  ;;  %v631_v55 = vadd.f32 %v8820_v40, %v609_v22  ;;  %v588_v31 = vmul.f32 %v8533_v16, %v8741_v1 }
 0x151   : > { %v624_v0 = vadd.f32 %v8820_v40, %v602_v26  ;;  %v581_v33 = vmul.f32 %v8535_v27, %v8750_v10 }
 0x152   : > { %8548 = vrsqrt.f32 %v560_v30  ;;  %8470 = vmatprep.mubr.msk.f32.mxu1 %vm383_vm0, %v631_v55  ;;  %v610_v34 = vmul.f32 %v8814_v32, %v588_v31 }
 0x153   : > { %v8537_v20 = vpop.eup %8536  ;;  %8459 = vmatmul.mubr.msk.f32.gmra.mxu0 %vm383_vm0, %v624_v0  ;;  %v603_v38 = vmul.f32 %v8814_v32, %v581_v33 }
 0x154   : > { %v8539_v39 = vpop.eup %8538  ;;  %v632_v41 = vadd.f32 %v8820_v40, %v610_v34  ;;  %v589_v42 = vmul.f32 %v8537_v20, %v8753_v11  ;;  %v8579_v20 = vmov 1983009808  }
 0x155   : > { %v625_v1 = vadd.f32 %v8820_v40, %v603_v38  ;;  %v582_v43 = vmul.f32 %v8539_v39, %v8762_v23  ;;  %v1004_v38 = vunpack.c.l.s4 %v8579_v20  ;;  %v1006_v39 = vlaneseq }
 0x156   : > { %8471 = vmatmul.mubr.msk.f32.gmra.mxu1 %vm383_vm0, %v632_v41  ;;  %v611_v10 = vmul.f32 %v8814_v32, %v589_v42 }
 0x157   : > { %v8541_v46 = vpop.eup %8540  ;;  %8461 = vmatprep.mubr.msk.f32.mxu0 %vm383_vm0, %v625_v1  ;;  %v604_v24 = vmul.f32 %v8814_v32, %v582_v43 }
 0x158   : > { %v8543_v48 = vpop.eup %8542  ;;  %v633_v49 = vadd.f32 %v8820_v40, %v611_v10  ;;  %v590_v50 = vmul.f32 %v8541_v46, %v8765_v17  ;;  %v1005_v10 = vunpack.c.0.s8 %v1004_v38  ;;  %v1007_v46 = vshrl.u32 %v1006_v39, 7 }
 0x159   : > { %v626_v11 = vadd.f32 %v8820_v40, %v604_v24  ;;  %v583_v36 = vmul.f32 %v8543_v48, %v8774_v35  ;;  %v8580_v24 = vmov 1934713408  }
 0x15a   : > { %8473 = vmatprep.mubr.msk.f32.mxu1 %vm383_vm0, %v633_v49  ;;  %v612_v23 = vmul.f32 %v8814_v32, %v590_v50  ;;  %v1036_v48 = vunpack.c.l.s4 %v8580_v24 }
 0x15b   : > { %v8545_v51 = vpop.eup %8544  ;;  %8462 = vmatmul.mubr.msk.f32.gmra.mxu0 %vm383_vm0, %v626_v11  ;;  %v605_v52 = vmul.f32 %v8814_v32, %v583_v36  ;;  %v9080_v36 = vsub.s32 %v1005_v10, %v1007_v46 }
 0x15c   : > { %v8547_v28 = vpop.eup %8546  ;;  %v634_v29 = vadd.f32 %v8820_v40, %v612_v23  ;;  %v591_v53 = vmul.f32 %v8545_v51, %v8777_v21  ;;  %v1037_v23 = vunpack.c.0.s8 %v1036_v48 }
 0x15d   : > { %v627_v17 = vadd.f32 %v8820_v40, %v605_v52  ;;  %v584_v56 = vmul.f32 %v8547_v28, %v8786_v47 }
 0x15e   : > { %8474 = vmatmul.mubr.msk.f32.gmra.mxu1 %vm383_vm0, %v634_v29  ;;  %v613_v35 = vmul.f32 %v8814_v32, %v591_v53 }
 0x15f   : > { %v8549_v57 = vpop.eup %8548  ;;  %8464 = vmatprep.mubr.msk.f32.mxu0 %vm383_vm0, %v627_v17  ;;  %v606_v58 = vmul.f32 %v8814_v32, %v584_v56 }
 0x160   : > { %v635_v59 = vadd.f32 %v8820_v40, %v613_v35  ;;  %v592_v60 = vmul.f32 %v8549_v57, %v8789_v25  ;;  %v9102_v57 = vsub.s32 %v1037_v23, %v1007_v46 }
 0x161   : > { %v628_v61 = vadd.f32 %v8820_v40, %v606_v58 }
 0x162   : > { %8476 = vmatprep.mubr.msk.f32.mxu1 %vm383_vm0, %v635_v59  ;;  %v614_v21 = vmul.f32 %v8814_v32, %v592_v60 }
 0x163   : > { %8465 = vmatmul.mubr.msk.f32.gmra.mxu0 %vm383_vm0, %v628_v61 }
 0x164   : > { %v636_v47 = vadd.f32 %v8820_v40, %v614_v21 }
 0x166   : > { %8477 = vmatmul.mubr.msk.f32.gmra.mxu1 %vm383_vm0, %v636_v47 }
 0x20b   : > { %v8457_v62 = vpop.f32.mrf.mxu0 }
 0x20c   : > { %v8891_v25 = vadd.f32 %v8457_v62, %v8888_v44 }
 0x20d   : > { %v762_v63 = vpop.f32.mrf.mxu0 }
 0x20e   : > { %v8894_v37 = vadd.f32 %v8888_v44, %v762_v63  ;;  %859 = vrot.lane.b32.xlu1 %v8891_v25, %s8574_s23  ;;  %v8469_v32 = vpop.f32.mrf.mxu1 }
 0x20f   : > { %v8899_v40 = vadd.f32 %v8469_v32, %v8888_v44 }
 0x210   : > { %857 = vrot.lane.b32.xlu0 %v8894_v37, %s8574_s23  ;;  %v802_v2 = vpop.f32.mrf.mxu1 }
 0x211   : > { %v8904_v3 = vadd.f32 %v8888_v44, %v802_v2 }
 0x212   : > { %875 = vrot.lane.b32.xlu1 %v8899_v40, %s8574_s23 }
 0x213   : > { %v8460_v5 = vpop.f32.mrf.mxu0 }
 0x214   : > { %873 = vrot.lane.b32.xlu0 %v8904_v3, %s8574_s23  ;;  %v8941_v7 = vadd.f32 %v8460_v5, %v8888_v44 }
 0x215   : > { %v772_v45 = vpop.f32.mrf.mxu0 }
 0x216   : > { %907 = vrot.lane.b32.xlu1 %v8891_v25, %s8575_s28  ;;  %v8472_v4 = vpop.f32.mrf.mxu1  ;;  %v8956_v12 = vadd.f32 %v8888_v44, %v772_v45 }
 0x217   : > { %v8951_v9 = vadd.f32 %v8472_v4, %v8888_v44 }
 0x218   : > { %905 = vrot.lane.b32.xlu0 %v8894_v37, %s8575_s28  ;;  %v812_v6 = vpop.f32.mrf.mxu1 }
 0x219   : > { %v8946_v8 = vadd.f32 %v8888_v44, %v812_v6 }
 0x21a   : > { %923 = vrot.lane.b32.xlu1 %v8899_v40, %s8575_s28 }
 0x21b   : > { %v8463_v13 = vpop.f32.mrf.mxu0 }
 0x21c   : > { %921 = vrot.lane.b32.xlu0 %v8904_v3, %s8575_s28  ;;  %v9003_v22 = vadd.f32 %v8463_v13, %v8888_v44 }
 0x21d   : > { %v782_v54 = vpop.f32.mrf.mxu0 }
 0x21e   : > { %955 = vrot.lane.b32.xlu1 %v8891_v25, %s8576_s29  ;;  %v8475_v14 = vpop.f32.mrf.mxu1  ;;  %v8991_v15 = vadd.f32 %v8888_v44, %v782_v54 }
 0x21f   : > { %v9010_v16 = vadd.f32 %v8475_v14, %v8888_v44 }
 0x220   : > { %953 = vrot.lane.b32.xlu0 %v8894_v37, %s8576_s29  ;;  %v822_v18 = vpop.f32.mrf.mxu1 }
 0x221   : > { %v8998_v19 = vadd.f32 %v8888_v44, %v822_v18 }
 0x222   : > { %971 = vrot.lane.b32.xlu1 %v8899_v40, %s8576_s29 }
 0x223   : > { %v8466_v26 = vpop.f32.mrf.mxu0 }
 0x224   : > { %969 = vrot.lane.b32.xlu0 %v8904_v3, %s8576_s29  ;;  %v9063_v1 = vadd.f32 %v8466_v26, %v8888_v44 }
 0x225   : > { %v792_v27 = vpop.f32.mrf.mxu0 }
 0x226   : > { %3244 = vrot.lane.b32.xlu1 %v8891_v25, %s8577_s30  ;;  %v8478_v30 = vpop.f32.mrf.mxu1  ;;  %v9045_v31 = vadd.f32 %v8888_v44, %v792_v27 }
 0x227   : > { %v9074_v50 = vadd.f32 %v8478_v30, %v8888_v44 }
 0x228   : > { %3242 = vrot.lane.b32.xlu0 %v8894_v37, %s8577_s30  ;;  %v832_v33 = vpop.f32.mrf.mxu1 }
 0x229   : > { %v9056_v41 = vadd.f32 %v8888_v44, %v832_v33 }
 0x22a   : > { %3260 = vrot.lane.b32.xlu1 %v8899_v40, %s8577_s30 }
 0x22c   : > { %3258 = vrot.lane.b32.xlu0 %v8904_v3, %s8577_s30 }
 0x22e   : > { %5676 = vrot.lane.b32.xlu1 %v8891_v25, %s8578_s8 }
 0x230   : > { %5674 = vrot.lane.b32.xlu0 %v8894_v37, %s8578_s8 }
 0x232   : > { %5692 = vrot.lane.b32.xlu1 %v8899_v40, %s8578_s8 }
 0x234   : > { %5690 = vrot.lane.b32.xlu0 %v8904_v3, %s8578_s8 }
 0x236   : > { %863 = vrot.lane.b32.xlu1 %v8941_v7, %s8574_s23 }
 0x238   : > { %877 = vrot.lane.b32.xlu0 %v8946_v8, %s8574_s23 }
 0x23a   : > { %879 = vrot.lane.b32.xlu1 %v8951_v9, %s8574_s23 }
 0x23c   : > { %909 = vrot.lane.b32.xlu0 %v8956_v12, %s8575_s28 }
 0x23e   : > { %911 = vrot.lane.b32.xlu1 %v8941_v7, %s8575_s28 }
 0x240   : > { %925 = vrot.lane.b32.xlu0 %v8946_v8, %s8575_s28 }
 0x242   : > { %927 = vrot.lane.b32.xlu1 %v8951_v9, %s8575_s28 }
 0x244   : > { %957 = vrot.lane.b32.xlu0 %v8956_v12, %s8576_s29 }
 0x246   : > { %959 = vrot.lane.b32.xlu1 %v8941_v7, %s8576_s29 }
 0x248   : > { %973 = vrot.lane.b32.xlu0 %v8946_v8, %s8576_s29 }
 0x24a   : > { %975 = vrot.lane.b32.xlu1 %v8951_v9, %s8576_s29 }
 0x24c   : > { %3246 = vrot.lane.b32.xlu0 %v8956_v12, %s8577_s30 }
 0x24e   : > { %3248 = vrot.lane.b32.xlu1 %v8941_v7, %s8577_s30 }
 0x250   : > { %3262 = vrot.lane.b32.xlu0 %v8946_v8, %s8577_s30 }
 0x252   : > { %3264 = vrot.lane.b32.xlu1 %v8951_v9, %s8577_s30 }
 0x254   : > { %5678 = vrot.lane.b32.xlu0 %v8956_v12, %s8578_s8 }
 0x256   : > { %5680 = vrot.lane.b32.xlu1 %v8941_v7, %s8578_s8 }
 0x258   : > { %5694 = vrot.lane.b32.xlu0 %v8946_v8, %s8578_s8 }
 0x25a   : > { %5696 = vrot.lane.b32.xlu1 %v8951_v9, %s8578_s8 }
 0x25c   : > { %865 = vrot.lane.b32.xlu0 %v8991_v15, %s8574_s23 }
 0x25e   : > { %861 = vrot.lane.b32.xlu1 %v8956_v12, %s8574_s23 }
 0x260   : > { %881 = vrot.lane.b32.xlu0 %v8998_v19, %s8574_s23 }
 0x262   : > { %867 = vrot.lane.b32.xlu1 %v9003_v22, %s8574_s23 }
 0x264   : > { %913 = vrot.lane.b32.xlu0 %v8991_v15, %s8575_s28 }
 0x266   : > { %883 = vrot.lane.b32.xlu1 %v9010_v16, %s8574_s23 }
 0x268   : > { %929 = vrot.lane.b32.xlu0 %v8998_v19, %s8575_s28 }
 0x26a   : > { %915 = vrot.lane.b32.xlu1 %v9003_v22, %s8575_s28 }
 0x26c   : > { %961 = vrot.lane.b32.xlu0 %v8991_v15, %s8576_s29 }
 0x26e   : > { %931 = vrot.lane.b32.xlu1 %v9010_v16, %s8575_s28 }
 0x270   : > { %977 = vrot.lane.b32.xlu0 %v8998_v19, %s8576_s29 }
 0x272   : > { %963 = vrot.lane.b32.xlu1 %v9003_v22, %s8576_s29 }
 0x274   : > { %3250 = vrot.lane.b32.xlu0 %v8991_v15, %s8577_s30 }
 0x276   : > { %979 = vrot.lane.b32.xlu1 %v9010_v16, %s8576_s29 }
 0x278   : > { %3266 = vrot.lane.b32.xlu0 %v8998_v19, %s8577_s30 }
 0x27a   : > { %3252 = vrot.lane.b32.xlu1 %v9003_v22, %s8577_s30 }
 0x27c   : > { %5682 = vrot.lane.b32.xlu0 %v8991_v15, %s8578_s8 }
 0x27e   : > { %3268 = vrot.lane.b32.xlu1 %v9010_v16, %s8577_s30 }
 0x280   : > { %v9040_v55 = vpop.permute.xlu1 %859  ;;  %5698 = vrot.lane.b32.xlu0 %v8998_v19, %s8578_s8 }
 0x282   : > { %5684 = vrot.lane.b32.xlu1 %v9003_v22, %s8578_s8  ;;  %v9049_v0 = vpop.permute.xlu0 %857 }
 0x284   : > { %v9051_v34 = vpop.permute.xlu1 %875  ;;  %869 = vrot.lane.b32.xlu0 %v9045_v31, %s8574_s23 }
 0x286   : > { %5700 = vrot.lane.b32.xlu1 %v9010_v16, %s8578_s8  ;;  %v9060_v42 = vpop.permute.xlu0 %873 }
 0x288   : > { %v9065_v43 = vpop.permute.xlu1 %907  ;;  %885 = vrot.lane.b32.xlu0 %v9056_v41, %s8574_s23 }
 0x289   : > { %v1069_v51 = vcombine.low %v8891_v25, %v9065_v43  ;;  %v1070_v52 = vcombine.high %v8891_v25, %v9065_v43 }
 0x28a   : > { %871 = vrot.lane.b32.xlu1 %v9063_v1, %s8574_s23  ;;  %v9071_v49 = vpop.permute.xlu0 %905 }
 0x28b   : > { %v1001_v28 = vcombine.low %v8894_v37, %v9071_v49  ;;  %v1002_v29 = vcombine.high %v8894_v37, %v9071_v49  ;;  %v1077_v60 = vrot.slane %v1069_v51, %v9080_v36  ;;  %v1084_v61 = vrot.slane %v1070_v52, %v9080_v36 }
 0x28c   : > { %v9076_v11 = vpop.permute.xlu1 %923  ;;  %917 = vrot.lane.b32.xlu0 %v9045_v31, %s8575_s28 }
 0x28d   : > { %v1613_v17 = vcombine.low %v8899_v40, %v9076_v11  ;;  %v1614_v56 = vcombine.high %v8899_v40, %v9076_v11  ;;  %v1009_v21 = vrot.slane %v1001_v28, %v9080_v36  ;;  %v1016_v47 = vrot.slane %v1002_v29, %v9080_v36 }
 0x28e   : > { %887 = vrot.lane.b32.xlu1 %v9074_v50, %s8574_s23  ;;  %v9092_v53 = vpop.permute.xlu0 %921 }
 0x28f   : > { %v9123_v32 = vrot.slane %v1613_v17, %v9080_v36  ;;  %v9126_v40 = vrot.slane %v1614_v56, %v9080_v36  ;;  %v1545_v2 = vcombine.low %v8904_v3, %v9092_v53  ;;  %v1546_v4 = vcombine.high %v8904_v3, %v9092_v53 }
 0x290   : > { %v9098_v35 = vpop.permute.xlu1 %955  ;;  %933 = vrot.lane.b32.xlu0 %v9056_v41, %s8575_s28 }
 0x291   : > { %v1085_v58 = vcombine.low %v9040_v55, %v9098_v35  ;;  %v1086_v59 = vcombine.high %v9040_v55, %v9098_v35 }
 0x292   : > { %919 = vrot.lane.b32.xlu1 %v9063_v1, %s8575_s28  ;;  %v9114_v44 = vpop.permute.xlu0 %953 }
 0x293   : > { %v1093_v62 = vrot.slane %v1085_v58, %v9080_v36  ;;  %v1100_v25 = vrot.slane %v1086_v59, %v9080_v36  ;;  %v1017_v63 = vcombine.low %v9049_v0, %v9114_v44  ;;  %v1018_v37 = vcombine.high %v9049_v0, %v9114_v44 }
 0x294   : > { %v9132_v5 = vpop.permute.xlu1 %971  ;;  %965 = vrot.lane.b32.xlu0 %v9045_v31, %s8576_s29 }
 0x295   : > { %v1101_v6 = vcombine.low %v1077_v60, %v1093_v62  ;;  %v1102_v45 = vcombine.high %v1077_v60, %v1093_v62  ;;  %v1117_v13 = vcombine.low %v1084_v61, %v1100_v25  ;;  %v1118_v54 = vcombine.high %v1084_v61, %v1100_v25 }
 0x296   : > { %v1025_v14 = vrot.slane %v1017_v63, %v9080_v36  ;;  %v1032_v18 = vrot.slane %v1018_v37, %v9080_v36  ;;  %v1629_v26 = vcombine.low %v9051_v34, %v9132_v5  ;;  %v1630_v27 = vcombine.high %v9051_v34, %v9132_v5  ;;  %935 = vrot.lane.b32.xlu1 %v9074_v50, %s8575_s28  ;;  %v9144_v30 = vpop.permute.xlu0 %969 }
 0x297   : > { %v1109_v33 = vrot.slane %v1101_v6, %v9102_v57  ;;  %v1116_v20 = vrot.slane %v1102_v45, %v9102_v57  ;;  %v1125_v38 = vrot.slane %v1117_v13, %v9102_v57  ;;  %v1132_v39 = vrot.slane %v1118_v54, %v9102_v57 }
 0x298   : > { %v1033_v10 = vcombine.low %v1009_v21, %v1025_v14  ;;  %v1034_v46 = vcombine.high %v1009_v21, %v1025_v14  ;;  %v1049_v24 = vcombine.low %v1016_v47, %v1032_v18  ;;  %v1050_v48 = vcombine.high %v1016_v47, %v1032_v18  ;;  %v9150_v23 = vpop.permute.xlu1 %3244  ;;  %981 = vrot.lane.b32.xlu0 %v9056_v41, %s8576_s29 }
 0x299   : > { %v2157_v51 = vcombine.low %v1109_v33, %v1116_v20  ;;  %v8327_v52 = vcombine.high %v1109_v33, %v1116_v20  ;;  %v2173_v28 = vcombine.low %v1125_v38, %v1132_v39  ;;  %v8328_v29 = vcombine.high %v1125_v38, %v1132_v39 }
 0x29a   : > { %v1041_v17 = vrot.slane %v1033_v10, %v9102_v57  ;;  %v1048_v56 = vrot.slane %v1034_v46, %v9102_v57  ;;  %v1057_v58 = vrot.slane %v1049_v24, %v9102_v57  ;;  %v1064_v59 = vrot.slane %v1050_v48, %v9102_v57  ;;  %967 = vrot.lane.b32.xlu1 %v9063_v1, %s8576_s29  ;;  %v9160_v60 = vpop.permute.xlu0 %3242 }
 0x29b   : > { %v2164_v61 = vrot.slane %v2157_v51, %v9080_v36  ;;  %v2172_v21 = vrot.slane %v8327_v52, %v9080_v36  ;;  %v2180_v47 = vrot.slane %v2173_v28, %v9080_v36  ;;  %v2188_v62 = vrot.slane %v8328_v29, %v9080_v36 }
 0x29c   : > { %v2089_v25 = vcombine.low %v1041_v17, %v1048_v56  ;;  %v8325_v63 = vcombine.high %v1041_v17, %v1048_v56  ;;  %v2105_v37 = vcombine.low %v1057_v58, %v1064_v59  ;;  %v8326_v6 = vcombine.high %v1057_v58, %v1064_v59  ;;  %v9166_v45 = vpop.permute.xlu1 %3260  ;;  %3254 = vrot.lane.b32.xlu0 %v9045_v31, %s8577_s30 }
 0x29d   : > { %v2189_v13 = vcombine.low %v2164_v61, %v2172_v21  ;;  %v2190_v54 = vcombine.high %v2164_v61, %v2172_v21  ;;  %v2205_v14 = vcombine.low %v2180_v47, %v2188_v62  ;;  %v2206_v18 = vcombine.high %v2180_v47, %v2188_v62 }
 0x29e   : > { %v2096_v33 = vrot.slane %v2089_v25, %v9080_v36  ;;  %v2104_v20 = vrot.slane %v8325_v63, %v9080_v36  ;;  %v2112_v38 = vrot.slane %v2105_v37, %v9080_v36  ;;  %v2120_v39 = vrot.slane %v8326_v6, %v9080_v36  ;;  %983 = vrot.lane.b32.xlu1 %v9074_v50, %s8576_s29  ;;  %v9179_v10 = vpop.permute.xlu0 %3258 }
 0x29f   : > { %v2197_v46 = vrot.slane %v2189_v13, %v9102_v57  ;;  %v2204_v24 = vrot.slane %v2190_v54, %v9102_v57  ;;  %v2213_v48 = vrot.slane %v2205_v14, %v9102_v57  ;;  %v2220_v51 = vrot.slane %v2206_v18, %v9102_v57 }
 0x2a0   : > { %v2121_v52 = vcombine.low %v2096_v33, %v2104_v20  ;;  %v2122_v28 = vcombine.high %v2096_v33, %v2104_v20  ;;  %v2137_v29 = vcombine.low %v2112_v38, %v2120_v39  ;;  %v2138_v17 = vcombine.high %v2112_v38, %v2120_v39  ;;  %v9191_v56 = vpop.permute.xlu1 %5676  ;;  %3270 = vrot.lane.b32.xlu0 %v9056_v41, %s8577_s30 }
 0x2a1   : > { %v2221_v58 = vcombine.low %v2197_v46, %v2213_v48  ;;  %v2222_v59 = vcombine.high %v2197_v46, %v2213_v48  ;;  %v2223_v61 = vcombine.low %v2204_v24, %v2220_v51  ;;  %v2224_v21 = vcombine.high %v2204_v24, %v2220_v51 }
 0x2a2   : > { %v2129_v47 = vrot.slane %v2121_v52, %v9102_v57  ;;  %v2136_v62 = vrot.slane %v2122_v28, %v9102_v57  ;;  %v2145_v25 = vrot.slane %v2137_v29, %v9102_v57  ;;  %v2152_v63 = vrot.slane %v2138_v17, %v9102_v57  ;;  %3256 = vrot.lane.b32.xlu1 %v9063_v1, %s8577_s30  ;;  %v9201_v37 = vpop.permute.xlu0 %5674 }
 0x2a3   : > { %3179 = vst.msk [vmem:[%s9189_s11 + $0x8] sm:$0xff] %vm3177_vm1, %v2221_v58  ;;  %3195 = vst.msk [vmem:[%s9189_s11 + $0x88] sm:$0xff] %vm3177_vm1, %v2222_v59  ;;  %v1637_v6 = vrot.slane %v1629_v26, %v9080_v36  ;;  %v1644_v13 = vrot.slane %v1630_v27, %v9080_v36  ;;  %v1561_v54 = vcombine.low %v9060_v42, %v9144_v30 }
 0x2a4   : > { %3211 = vst.msk [vmem:[%s9189_s11 + $0x108] sm:$0xff] %vm3177_vm1, %v2223_v61  ;;  %3227 = vst.msk [vmem:[%s9189_s11 + $0x188] sm:$0xff] %vm3177_vm1, %v2224_v21  ;;  %v1562_v14 = vcombine.high %v9060_v42, %v9144_v30  ;;  %v2153_v18 = vcombine.low %v2129_v47, %v2145_v25  ;;  %v2154_v33 = vcombine.high %v2129_v47, %v2145_v25  ;;  %v9223_v26 = vpop.permute.xlu1 %5692  ;;  %5686 = vrot.lane.b32.xlu0 %v9045_v31, %s8578_s8 }
 0x2a5   : > { %v2155_v20 = vcombine.low %v2136_v62, %v2152_v63  ;;  %v2156_v38 = vcombine.high %v2136_v62, %v2152_v63  ;;  %v1645_v27 = vcombine.low %v9123_v32, %v1637_v6  ;;  %v1646_v39 = vcombine.high %v9123_v32, %v1637_v6 }
 0x2a6   : > { %v1661_v46 = vcombine.low %v9126_v40, %v1644_v13  ;;  %v1662_v24 = vcombine.high %v9126_v40, %v1644_v13  ;;  %v1553_v48 = vrot.slane %v1545_v2, %v9080_v36  ;;  %v1560_v51 = vrot.slane %v1546_v4, %v9080_v36  ;;  %3178 = vst.msk [vmem:[%s9189_s11] sm:$0xff] %vm3177_vm1, %v2153_v18  ;;  %v9251_v2 = vpop.permute.xlu0 %5690 }
 0x2a7   : > { %3194 = vst.msk [vmem:[%s9189_s11 + $0x80] sm:$0xff] %vm3177_vm1, %v2154_v33  ;;  %3210 = vst.msk [vmem:[%s9189_s11 + $0x100] sm:$0xff] %vm3177_vm1, %v2155_v20  ;;  %v1569_v32 = vrot.slane %v1561_v54, %v9080_v36  ;;  %v1576_v40 = vrot.slane %v1562_v14, %v9080_v36  ;;  %3272 = vrot.lane.b32.xlu1 %v9074_v50, %s8577_s30  ;;  %v1653_v3 = vrot.slane %v1645_v27, %v9102_v57 }
 0x2a8   : > { %3226 = vst.msk [vmem:[%s9189_s11 + $0x180] sm:$0xff] %vm3177_vm1, %v2156_v38  ;;  %v1660_v4 = vrot.slane %v1646_v39, %v9102_v57  ;;  %v1669_v52 = vrot.slane %v1661_v46, %v9102_v57  ;;  %v1676_v28 = vrot.slane %v1662_v24, %v9102_v57  ;;  %v9257_v61 = vpop.permute.xlu1 %863  ;;  %5702 = vrot.lane.b32.xlu0 %v9056_v41, %s8578_s8 }
 0x2a9   : > { %v1577_v29 = vcombine.low %v1553_v48, %v1569_v32  ;;  %v1578_v17 = vcombine.high %v1553_v48, %v1569_v32  ;;  %v1593_v58 = vcombine.low %v1560_v51, %v1576_v40  ;;  %v1594_v59 = vcombine.high %v1560_v51, %v1576_v40 }
 0x2aa   : > { %v2701_v21 = vcombine.low %v1653_v3, %v1660_v4  ;;  %v8343_v47 = vcombine.high %v1653_v3, %v1660_v4  ;;  %v2717_v62 = vcombine.low %v1669_v52, %v1676_v28  ;;  %v8344_v25 = vcombine.high %v1669_v52, %v1676_v28  ;;  %v9267_v14 = vpop.permute.xlu0 %877 }
 0x2ab   : > { %v1585_v63 = vrot.slane %v1577_v29, %v9102_v57  ;;  %v1592_v6 = vrot.slane %v1578_v17, %v9102_v57  ;;  %v1601_v13 = vrot.slane %v1593_v58, %v9102_v57  ;;  %v1608_v54 = vrot.slane %v1594_v59, %v9102_v57  ;;  %5688 = vrot.lane.b32.xlu1 %v9063_v1, %s8578_s8 }
 0x2ac   : > { %v2708_v18 = vrot.slane %v2701_v21, %v9080_v36  ;;  %v2716_v33 = vrot.slane %v8343_v47, %v9080_v36  ;;  %v2724_v20 = vrot.slane %v2717_v62, %v9080_v36  ;;  %v2732_v38 = vrot.slane %v8344_v25, %v9080_v36  ;;  %v9273_v48 = vpop.permute.xlu1 %879  ;;  %3274 = vrot.lane.b32.xlu0 %v9049_v0, %s8577_s30 }
 0x2ad   : > { %v2633_v27 = vcombine.low %v1585_v63, %v1592_v6  ;;  %v8341_v39 = vcombine.high %v1585_v63, %v1592_v6  ;;  %v2649_v46 = vcombine.low %v1601_v13, %v1608_v54  ;;  %v8342_v24 = vcombine.high %v1601_v13, %v1608_v54 }
 0x2ae   : > { %v2733_v51 = vcombine.low %v2708_v18, %v2716_v33  ;;  %v2734_v32 = vcombine.high %v2708_v18, %v2716_v33  ;;  %v2749_v40 = vcombine.low %v2724_v20, %v2732_v38  ;;  %v2750_v3 = vcombine.high %v2724_v20, %v2732_v38  ;;  %v9283_v17 = vpop.permute.xlu0 %909 }
 0x2af   : > { %v2640_v4 = vrot.slane %v2633_v27, %v9080_v36  ;;  %v2648_v52 = vrot.slane %v8341_v39, %v9080_v36  ;;  %v2656_v28 = vrot.slane %v2649_v46, %v9080_v36  ;;  %v2664_v29 = vrot.slane %v8342_v24, %v9080_v36  ;;  %5704 = vrot.lane.b32.xlu1 %v9074_v50, %s8578_s8 }
 0x2b0   : > { %v2741_v58 = vrot.slane %v2733_v51, %v9102_v57  ;;  %v2748_v59 = vrot.slane %v2734_v32, %v9102_v57  ;;  %v2757_v21 = vrot.slane %v2749_v40, %v9102_v57  ;;  %v2764_v47 = vrot.slane %v2750_v3, %v9102_v57  ;;  %v9289_v13 = vpop.permute.xlu1 %911  ;;  %3290 = vrot.lane.b32.xlu0 %v9060_v42, %s8577_s30 }
 0x2b1   : > { %v2665_v62 = vcombine.low %v2640_v4, %v2648_v52  ;;  %v2666_v25 = vcombine.high %v2640_v4, %v2648_v52  ;;  %v2681_v63 = vcombine.low %v2656_v28, %v2664_v29  ;;  %v2682_v6 = vcombine.high %v2656_v28, %v2664_v29 }
 0x2b2   : > { %v2765_v54 = vcombine.low %v2741_v58, %v2757_v21  ;;  %v2766_v18 = vcombine.high %v2741_v58, %v2757_v21  ;;  %v2767_v33 = vcombine.low %v2748_v59, %v2764_v47  ;;  %v2768_v20 = vcombine.high %v2748_v59, %v2764_v47  ;;  %v9299_v24 = vpop.permute.xlu0 %925 }
 0x2b3   : > { %v2673_v38 = vrot.slane %v2665_v62, %v9102_v57  ;;  %v2680_v27 = vrot.slane %v2666_v25, %v9102_v57  ;;  %v2689_v39 = vrot.slane %v2681_v63, %v9102_v57  ;;  %v2696_v46 = vrot.slane %v2682_v6, %v9102_v57  ;;  %3276 = vrot.lane.b32.xlu1 %v9040_v55, %s8577_s30 }
 0x2b4   : > { %3187 = vst.msk [vmem:[%s9189_s11 + $0x48] sm:$0xff] %vm3177_vm1, %v2765_v54  ;;  %3203 = vst.msk [vmem:[%s9189_s11 + $0xc8] sm:$0xff] %vm3177_vm1, %v2766_v18  ;;  %v9309_v4 = vpop.permute.xlu1 %927  ;;  %3306 = vrot.lane.b32.xlu0 %v9071_v49, %s8577_s30  ;;  %v1205_v52 = vcombine.low %v8941_v7, %v9289_v13  ;;  %v1206_v28 = vcombine.high %v8941_v7, %v9289_v13  ;;  %v1681_v58 = vcombine.low %v8946_v8, %v9299_v24 }
 0x2b5   : > { %3219 = vst.msk [vmem:[%s9189_s11 + $0x148] sm:$0xff] %vm3177_vm1, %v2767_v33  ;;  %3235 = vst.msk [vmem:[%s9189_s11 + $0x1c8] sm:$0xff] %vm3177_vm1, %v2768_v20  ;;  %v2697_v51 = vcombine.low %v2673_v38, %v2689_v39  ;;  %v2698_v32 = vcombine.high %v2673_v38, %v2689_v39  ;;  %v2699_v40 = vcombine.low %v2680_v27, %v2696_v46 }
 0x2b6   : > { %v2700_v3 = vcombine.high %v2680_v27, %v2696_v46  ;;  %v9327_v29 = vpop.permute.xlu0 %957  ;;  %v1682_v59 = vcombine.high %v8946_v8, %v9299_v24  ;;  %v1213_v62 = vrot.slane %v1205_v52, %v9080_v36  ;;  %v1220_v25 = vrot.slane %v1206_v28, %v9080_v36 }
 0x2b7   : > { %3186 = vst.msk [vmem:[%s9189_s11 + $0x40] sm:$0xff] %vm3177_vm1, %v2697_v51  ;;  %3202 = vst.msk [vmem:[%s9189_s11 + $0xc0] sm:$0xff] %vm3177_vm1, %v2698_v32  ;;  %3292 = vrot.lane.b32.xlu1 %v9051_v34, %s8577_s30  ;;  %v1689_v33 = vrot.slane %v1681_v58, %v9080_v36 }
 0x2b8   : > { %3218 = vst.msk [vmem:[%s9189_s11 + $0x140] sm:$0xff] %vm3177_vm1, %v2699_v40  ;;  %3234 = vst.msk [vmem:[%s9189_s11 + $0x1c0] sm:$0xff] %vm3177_vm1, %v2700_v3  ;;  %v9333_v21 = vpop.permute.xlu1 %959  ;;  %3322 = vrot.lane.b32.xlu0 %v9092_v53, %s8577_s30  ;;  %v1696_v20 = vrot.slane %v1682_v59, %v9080_v36 }
 0x2b9   : > { %v1221_v47 = vcombine.low %v9257_v61, %v9333_v21  ;;  %v1222_v7 = vcombine.high %v9257_v61, %v9333_v21 }
 0x2ba   : > { %v9345_v63 = vpop.permute.xlu0 %973 }
 0x2bb   : > { %3308 = vrot.lane.b32.xlu1 %v9065_v43, %s8577_s30  ;;  %v1229_v8 = vrot.slane %v1221_v47, %v9080_v36  ;;  %v1236_v6 = vrot.slane %v1222_v7, %v9080_v36  ;;  %v1697_v54 = vcombine.low %v9267_v14, %v9345_v63  ;;  %v1698_v18 = vcombine.high %v9267_v14, %v9345_v63 }
 0x2bc   : > { %v9359_v39 = vpop.permute.xlu1 %975  ;;  %3338 = vrot.lane.b32.xlu0 %v9114_v44, %s8577_s30 }
 0x2bd   : > { %v1237_v46 = vcombine.low %v1213_v62, %v1229_v8  ;;  %v1238_v51 = vcombine.high %v1213_v62, %v1229_v8  ;;  %v1253_v32 = vcombine.low %v1220_v25, %v1236_v6  ;;  %v1254_v40 = vcombine.high %v1220_v25, %v1236_v6 }
 0x2be   : > { %v1705_v3 = vrot.slane %v1697_v54, %v9080_v36  ;;  %v1712_v52 = vrot.slane %v1698_v18, %v9080_v36  ;;  %v9371_v59 = vpop.permute.xlu0 %3246 }
 0x2bf   : > { %3324 = vrot.lane.b32.xlu1 %v9076_v11, %s8577_s30  ;;  %11481 = vst [vmem:[#allocation2_spill] sm:$0xff] %v9371_v59  ;;  %v1245_v47 = vrot.slane %v1237_v46, %v9102_v57  ;;  %v1252_v7 = vrot.slane %v1238_v51, %v9102_v57  ;;  %v1261_v62 = vrot.slane %v1253_v32, %v9102_v57 }
 0x2c0   : > { %v1268_v25 = vrot.slane %v1254_v40, %v9102_v57  ;;  %v1713_v8 = vcombine.low %v1689_v33, %v1705_v3  ;;  %v1714_v6 = vcombine.high %v1689_v33, %v1705_v3  ;;  %v1729_v54 = vcombine.low %v1696_v20, %v1712_v52  ;;  %v9377_v28 = vpop.permute.xlu1 %3248  ;;  %3354 = vrot.lane.b32.xlu0 %v9144_v30, %s8577_s30 }
 0x2c1   : > { %v1730_v18 = vcombine.high %v1696_v20, %v1712_v52  ;;  %11482 = vst [vmem:[#allocation3_spill] sm:$0xff] %v9377_v28  ;;  %v2293_v58 = vcombine.low %v1245_v47, %v1252_v7  ;;  %v8331_v27 = vcombine.high %v1245_v47, %v1252_v7 }
 0x2c2   : > { %v2309_v38 = vcombine.low %v1261_v62, %v1268_v25  ;;  %v8332_v59 = vcombine.high %v1261_v62, %v1268_v25  ;;  %v1721_v46 = vrot.slane %v1713_v8, %v9102_v57  ;;  %v1728_v51 = vrot.slane %v1714_v6, %v9102_v57  ;;  %v9387_v33 = vpop.permute.xlu0 %3262 }
 0x2c3   : > { %v1737_v32 = vrot.slane %v1729_v54, %v9102_v57  ;;  %v1744_v40 = vrot.slane %v1730_v18, %v9102_v57  ;;  %3340 = vrot.lane.b32.xlu1 %v9098_v35, %s8577_s30  ;;  %11483 = vst [vmem:[#allocation4_spill] sm:$0xff] %v9387_v33  ;;  %v2300_v20 = vrot.slane %v2293_v58, %v9080_v36 }
 0x2c4   : > { %v2308_v3 = vrot.slane %v8331_v27, %v9080_v36  ;;  %v2316_v52 = vrot.slane %v2309_v38, %v9080_v36  ;;  %v2324_v47 = vrot.slane %v8332_v59, %v9080_v36  ;;  %v2769_v7 = vcombine.low %v1721_v46, %v1728_v51  ;;  %v9393_v6 = vpop.permute.xlu1 %3264  ;;  %5706 = vrot.lane.b32.xlu0 %v9049_v0, %s8578_s8 }
 0x2c5   : > { %v8345_v62 = vcombine.high %v1721_v46, %v1728_v51  ;;  %v2785_v25 = vcombine.low %v1737_v32, %v1744_v40  ;;  %v8346_v8 = vcombine.high %v1737_v32, %v1744_v40 }
 0x2c6   : > { %v2325_v54 = vcombine.low %v2300_v20, %v2308_v3  ;;  %v2326_v18 = vcombine.high %v2300_v20, %v2308_v3  ;;  %v2341_v28 = vcombine.low %v2316_v52, %v2324_v47  ;;  %v2342_v33 = vcombine.high %v2316_v52, %v2324_v47  ;;  %v9403_v46 = vpop.permute.xlu0 %5678 }
 0x2c7   : > { %v2776_v58 = vrot.slane %v2769_v7, %v9080_v36  ;;  %v2784_v27 = vrot.slane %v8345_v62, %v9080_v36  ;;  %v2792_v38 = vrot.slane %v2785_v25, %v9080_v36  ;;  %v2800_v59 = vrot.slane %v8346_v8, %v9080_v36  ;;  %3356 = vrot.lane.b32.xlu1 %v9132_v5, %s8577_s30 }
 0x2c8   : > { %11484 = vst [vmem:[#allocation5_spill] sm:$0xff] %v9403_v46  ;;  %v2333_v51 = vrot.slane %v2325_v54, %v9102_v57  ;;  %v2340_v0 = vrot.slane %v2326_v18, %v9102_v57  ;;  %v2349_v32 = vrot.slane %v2341_v28, %v9102_v57  ;;  %v2356_v40 = vrot.slane %v2342_v33, %v9102_v57  ;;  %v9409_v7 = vpop.permute.xlu1 %5680 }
 0x2c9   : > { %v2801_v20 = vcombine.low %v2776_v58, %v2784_v27  ;;  %v2802_v3 = vcombine.high %v2776_v58, %v2784_v27  ;;  %v2817_v52 = vcombine.low %v2792_v38, %v2800_v59  ;;  %v2818_v47 = vcombine.high %v2792_v38, %v2800_v59  ;;  %11485 = vst [vmem:[#allocation6_spill] sm:$0xff] %v9409_v7 }
 0x2ca   : > { %5722 = vrot.lane.b32.xlu0 %v9060_v42, %s8578_s8  ;;  %v2357_v62 = vcombine.low %v2333_v51, %v2349_v32  ;;  %v2358_v25 = vcombine.high %v2333_v51, %v2349_v32  ;;  %v2359_v8 = vcombine.low %v2340_v0, %v2356_v40  ;;  %v2360_v54 = vcombine.high %v2340_v0, %v2356_v40  ;;  %v9419_v27 = vpop.permute.xlu0 %5694 }
 0x2cb   : > { %v2809_v28 = vrot.slane %v2801_v20, %v9102_v57  ;;  %v2816_v33 = vrot.slane %v2802_v3, %v9102_v57  ;;  %v2825_v18 = vrot.slane %v2817_v52, %v9102_v57  ;;  %v2832_v58 = vrot.slane %v2818_v47, %v9102_v57  ;;  %5708 = vrot.lane.b32.xlu1 %v9040_v55, %s8578_s8 }
 0x2cc   : > { %11486 = vst [vmem:[#allocation7_spill] sm:$0xff] %v9419_v27  ;;  %v11487_v42 = vcombine.low %v8951_v9, %v9309_v4  ;;  %v11488_v59 = vcombine.high %v8951_v9, %v9309_v4  ;;  %3181 = vst.msk [vmem:[%s9189_s11 + $0x18] sm:$0xff] %vm3177_vm1, %v2357_v62  ;;  %v11489_v55 = vcombine.low %v9273_v48, %v9359_v39  ;;  %v9445_v47 = vpop.permute.xlu1 %5696 }
 0x2cd   : > { %3197 = vst.msk [vmem:[%s9189_s11 + $0x98] sm:$0xff] %vm3177_vm1, %v2358_v25  ;;  %3213 = vst.msk [vmem:[%s9189_s11 + $0x118] sm:$0xff] %vm3177_vm1, %v2359_v8  ;;  %v11490_v9 = vcombine.high %v9273_v48, %v9359_v39  ;;  %v2833_v40 = vcombine.low %v2809_v28, %v2825_v18  ;;  %v2834_v20 = vcombine.high %v2809_v28, %v2825_v18 }
 0x2ce   : > { %v1757_v38 = vrot.slane %v11487_v42, %v9080_v36  ;;  %v1764_v51 = vrot.slane %v11488_v59, %v9080_v36  ;;  %3229 = vst.msk [vmem:[%s9189_s11 + $0x198] sm:$0xff] %vm3177_vm1, %v2360_v54  ;;  %v1773_v0 = vrot.slane %v11489_v55, %v9080_v36  ;;  %v2835_v3 = vcombine.low %v2816_v33, %v2832_v58  ;;  %v9459_v28 = vpop.permute.xlu0 %865 }
 0x2cf   : > { %v1780_v32 = vrot.slane %v11490_v9, %v9080_v36  ;;  %v2836_v52 = vcombine.high %v2816_v33, %v2832_v58  ;;  %11491 = vst [vmem:[#allocation8_spill] sm:$0xff] %v9445_v47  ;;  %5738 = vrot.lane.b32.xlu0 %v9071_v49, %s8578_s8  ;;  %3188 = vst.msk [vmem:[%s9189_s11 + $0x50] sm:$0xff] %vm3177_vm1, %v2833_v40  ;;  %5724 = vrot.lane.b32.xlu1 %v9051_v34, %s8578_s8 }
 0x2d0   : > { %v1781_v62 = vcombine.low %v1757_v38, %v1773_v0  ;;  %v1782_v25 = vcombine.high %v1757_v38, %v1773_v0  ;;  %3204 = vst.msk [vmem:[%s9189_s11 + $0xd0] sm:$0xff] %vm3177_vm1, %v2834_v20  ;;  %3220 = vst.msk [vmem:[%s9189_s11 + $0x150] sm:$0xff] %vm3177_vm1, %v2835_v3  ;;  %v1137_v42 = vcombine.low %v8956_v12, %v9283_v17  ;;  %v9469_v59 = vpop.permute.xlu1 %861 }
 0x2d1   : > { %v1797_v8 = vcombine.low %v1764_v51, %v1780_v32  ;;  %v1798_v54 = vcombine.high %v1764_v51, %v1780_v32  ;;  %3236 = vst.msk [vmem:[%s9189_s11 + $0x1d0] sm:$0xff] %vm3177_vm1, %v2836_v52  ;;  %v1138_v38 = vcombine.high %v8956_v12, %v9283_v17  ;;  %v1153_v9 = vcombine.low %v9469_v59, %v9327_v29 }
 0x2d2   : > { %v1789_v33 = vrot.slane %v1781_v62, %v9102_v57  ;;  %v1796_v49 = vrot.slane %v1782_v25, %v9102_v57  ;;  %v1154_v32 = vcombine.high %v9469_v59, %v9327_v29  ;;  %v9479_v40 = vpop.permute.xlu0 %881  ;;  %v1145_v52 = vrot.slane %v1137_v42, %v9080_v36 }
 0x2d3   : > { %v1805_v18 = vrot.slane %v1797_v8, %v9102_v57  ;;  %v1812_v58 = vrot.slane %v1798_v54, %v9102_v57  ;;  %5754 = vrot.lane.b32.xlu0 %v9092_v53, %s8578_s8  ;;  %5740 = vrot.lane.b32.xlu1 %v9065_v43, %s8578_s8  ;;  %v1152_v62 = vrot.slane %v1138_v38, %v9080_v36 }
 0x2d4   : > { %v2837_v34 = vcombine.low %v1789_v33, %v1796_v49  ;;  %v8347_v51 = vcombine.high %v1789_v33, %v1796_v49  ;;  %v1161_v25 = vrot.slane %v1153_v9, %v9080_v36  ;;  %v1168_v8 = vrot.slane %v1154_v32, %v9080_v36  ;;  %v9489_v54 = vpop.permute.xlu1 %867 }
 0x2d5   : > { %v2853_v55 = vcombine.low %v1805_v18, %v1812_v58  ;;  %v8348_v0 = vcombine.high %v1805_v18, %v1812_v58 }
 0x2d6   : > { %v2844_v12 = vrot.slane %v2837_v34, %v9080_v36  ;;  %v2852_v20 = vrot.slane %v8347_v51, %v9080_v36  ;;  %v1169_v58 = vcombine.low %v1145_v52, %v1161_v25  ;;  %v1170_v34 = vcombine.high %v1145_v52, %v1161_v25  ;;  %v9495_v42 = vpop.permute.xlu0 %913 }
 0x2d7   : > { %v2860_v53 = vrot.slane %v2853_v55, %v9080_v36  ;;  %v2868_v3 = vrot.slane %v8348_v0, %v9080_v36  ;;  %5770 = vrot.lane.b32.xlu0 %v9114_v44, %s8578_s8  ;;  %v1185_v51 = vcombine.low %v1152_v62, %v1168_v8  ;;  %v1186_v55 = vcombine.high %v1152_v62, %v1168_v8 }
 0x2d8   : > { %v2869_v43 = vcombine.low %v2844_v12, %v2852_v20  ;;  %v2870_v33 = vcombine.high %v2844_v12, %v2852_v20  ;;  %5756 = vrot.lane.b32.xlu1 %v9076_v11, %s8578_s8  ;;  %v1177_v32 = vrot.slane %v1169_v58, %v9102_v57  ;;  %v1184_v12 = vrot.slane %v1170_v34, %v9102_v57 }
 0x2d9   : > { %v2885_v49 = vcombine.low %v2860_v53, %v2868_v3  ;;  %v2886_v18 = vcombine.high %v2860_v53, %v2868_v3  ;;  %v1193_v20 = vrot.slane %v1185_v51, %v9102_v57  ;;  %v1200_v11 = vrot.slane %v1186_v55, %v9102_v57  ;;  %v9505_v53 = vpop.permute.xlu1 %883 }
 0x2da   : > { %v2877_v38 = vrot.slane %v2869_v43, %v9102_v57  ;;  %v2884_v0 = vrot.slane %v2870_v33, %v9102_v57  ;;  %v2225_v8 = vcombine.low %v1177_v32, %v1184_v12  ;;  %v8329_v43 = vcombine.high %v1177_v32, %v1184_v12 }
 0x2db   : > { %v2893_v9 = vrot.slane %v2885_v49, %v9102_v57  ;;  %v2900_v44 = vrot.slane %v2886_v18, %v9102_v57  ;;  %5786 = vrot.lane.b32.xlu0 %v9144_v30, %s8578_s8  ;;  %v2241_v33 = vcombine.low %v1193_v20, %v1200_v11  ;;  %v8330_v49 = vcombine.high %v1193_v20, %v1200_v11  ;;  %v9511_v18 = vpop.permute.xlu0 %929 }
 0x2dc   : > { %5772 = vrot.lane.b32.xlu1 %v9098_v35, %s8578_s8  ;;  %v1273_v30 = vcombine.low %v8991_v15, %v9495_v42  ;;  %v1274_v58 = vcombine.high %v8991_v15, %v9495_v42  ;;  %v1817_v34 = vcombine.low %v8998_v19, %v9511_v18  ;;  %v1818_v35 = vcombine.high %v8998_v19, %v9511_v18 }
 0x2dd   : > { %v2901_v3 = vcombine.low %v2877_v38, %v2893_v9  ;;  %v2902_v52 = vcombine.high %v2877_v38, %v2893_v9  ;;  %v2903_v62 = vcombine.low %v2884_v0, %v2900_v44  ;;  %v2904_v25 = vcombine.high %v2884_v0, %v2900_v44  ;;  %v9533_v9 = vpop.permute.xlu1 %915 }
 0x2de   : > { %v2232_v51 = vrot.slane %v2225_v8, %v9080_v36  ;;  %v2240_v55 = vrot.slane %v8329_v43, %v9080_v36  ;;  %v2248_v38 = vrot.slane %v2241_v33, %v9080_v36  ;;  %v2256_v0 = vrot.slane %v8330_v49, %v9080_v36 }
 0x2df   : > { %3189 = vst.msk [vmem:[%s9189_s11 + $0x58] sm:$0xff] %vm3177_vm1, %v2901_v3  ;;  %3205 = vst.msk [vmem:[%s9189_s11 + $0xd8] sm:$0xff] %vm3177_vm1, %v2902_v52  ;;  %3278 = vrot.lane.b32.xlu0 %v9469_v59, %s8577_s30  ;;  %v1281_v15 = vrot.slane %v1273_v30, %v9080_v36  ;;  %v1288_v44 = vrot.slane %v1274_v58, %v9080_v36  ;;  %v9540_v32 = vrot.slane %v1817_v34, %v9080_v36  ;;  %v9547_v52 = vpop.permute.xlu0 %961 }
 0x2e0   : > { %3221 = vst.msk [vmem:[%s9189_s11 + $0x158] sm:$0xff] %vm3177_vm1, %v2903_v62  ;;  %3237 = vst.msk [vmem:[%s9189_s11 + $0x1d8] sm:$0xff] %vm3177_vm1, %v2904_v25  ;;  %v9543_v19 = vrot.slane %v1818_v35, %v9080_v36  ;;  %v2257_v12 = vcombine.low %v2232_v51, %v2240_v55  ;;  %v2258_v20 = vcombine.high %v2232_v51, %v2240_v55  ;;  %5788 = vrot.lane.b32.xlu1 %v9132_v5, %s8578_s8 }
 0x2e1   : > { %v2273_v11 = vcombine.low %v2248_v38, %v2256_v0  ;;  %v2274_v3 = vcombine.high %v2248_v38, %v2256_v0  ;;  %v1341_v62 = vcombine.low %v9003_v22, %v9533_v9  ;;  %v1342_v25 = vcombine.high %v9003_v22, %v9533_v9  ;;  %v9561_v58 = vpop.permute.xlu1 %931 }
 0x2e2   : > { %v1289_v8 = vcombine.low %v9459_v28, %v9547_v52  ;;  %v1290_v43 = vcombine.high %v9459_v28, %v9547_v52  ;;  %v2265_v33 = vrot.slane %v2257_v12, %v9102_v57  ;;  %v2272_v49 = vrot.slane %v2258_v20, %v9102_v57 }
 0x2e3   : > { %v2281_v5 = vrot.slane %v2273_v11, %v9102_v57  ;;  %v2288_v30 = vrot.slane %v2274_v3, %v9102_v57  ;;  %3294 = vrot.lane.b32.xlu0 %v9267_v14, %s8577_s30  ;;  %v9566_v22 = vrot.slane %v1341_v62, %v9080_v36  ;;  %v9569_v34 = vrot.slane %v1342_v25, %v9080_v36  ;;  %v9575_v20 = vpop.permute.xlu0 %977 }
 0x2e4   : > { %v1297_v35 = vrot.slane %v1289_v8, %v9080_v36  ;;  %v1304_v51 = vrot.slane %v1290_v43, %v9080_v36  ;;  %3280 = vrot.lane.b32.xlu1 %v9257_v61, %s8577_s30  ;;  %v1885_v25 = vcombine.low %v9010_v16, %v9561_v58  ;;  %v1886_v8 = vcombine.high %v9010_v16, %v9561_v58 }
 0x2e5   : > { %v2289_v55 = vcombine.low %v2265_v33, %v2281_v5  ;;  %v2290_v38 = vcombine.high %v2265_v33, %v2281_v5  ;;  %v2291_v0 = vcombine.low %v2272_v49, %v2288_v30  ;;  %v2292_v12 = vcombine.high %v2272_v49, %v2288_v30 }
 0x2e6   : > { %v1305_v11 = vcombine.low %v1281_v15, %v1297_v35  ;;  %v1306_v3 = vcombine.high %v1281_v15, %v1297_v35  ;;  %v1321_v62 = vcombine.low %v1288_v44, %v1304_v51  ;;  %v1322_v47 = vcombine.high %v1288_v44, %v1304_v51  ;;  %v9593_v44 = vpop.permute.xlu1 %963 }
 0x2e7   : > { %3180 = vst.msk [vmem:[%s9189_s11 + $0x10] sm:$0xff] %vm3177_vm1, %v2289_v55  ;;  %3196 = vst.msk [vmem:[%s9189_s11 + $0x90] sm:$0xff] %vm3177_vm1, %v2290_v38  ;;  %v1833_v43 = vcombine.low %v9479_v40, %v9575_v20  ;;  %v1834_v15 = vcombine.high %v9479_v40, %v9575_v20  ;;  %3310 = vrot.lane.b32.xlu0 %v9283_v17, %s8577_s30  ;;  %v9602_v16 = vrot.slane %v1885_v25, %v9080_v36  ;;  %v9611_v38 = vpop.permute.xlu0 %3250 }
 0x2e8   : > { %3212 = vst.msk [vmem:[%s9189_s11 + $0x110] sm:$0xff] %vm3177_vm1, %v2291_v0  ;;  %3228 = vst.msk [vmem:[%s9189_s11 + $0x190] sm:$0xff] %vm3177_vm1, %v2292_v12  ;;  %v1313_v33 = vrot.slane %v1305_v11, %v9102_v57  ;;  %v1320_v49 = vrot.slane %v1306_v3, %v9102_v57  ;;  %v1329_v5 = vrot.slane %v1321_v62, %v9102_v57  ;;  %3296 = vrot.lane.b32.xlu1 %v9273_v48, %s8577_s30 }
 0x2e9   : > { %v1336_v30 = vrot.slane %v1322_v47, %v9102_v57  ;;  %v9605_v35 = vrot.slane %v1886_v8, %v9080_v36  ;;  %v1841_v51 = vrot.slane %v1833_v43, %v9080_v36  ;;  %v1848_v55 = vrot.slane %v1834_v15, %v9080_v36  ;;  %11492 = vst [vmem:[#allocation9_spill] sm:$0xff] %v9611_v38 }
 0x2ea   : > { %v2361_v0 = vcombine.low %v1313_v33, %v1320_v49  ;;  %v8333_v12 = vcombine.high %v1313_v33, %v1320_v49  ;;  %v9617_v43 = vpop.permute.xlu1 %979 }
 0x2eb   : > { %v2377_v11 = vcombine.low %v1329_v5, %v1336_v30  ;;  %v8334_v3 = vcombine.high %v1329_v5, %v1336_v30  ;;  %v1849_v47 = vcombine.low %v9540_v32, %v1841_v51  ;;  %v1850_v62 = vcombine.high %v9540_v32, %v1841_v51  ;;  %3326 = vrot.lane.b32.xlu0 %v9299_v24, %s8577_s30  ;;  %v9631_v51 = vpop.permute.xlu0 %3266 }
 0x2ec   : > { %v1865_v25 = vcombine.low %v9543_v19, %v1848_v55  ;;  %v1866_v8 = vcombine.high %v9543_v19, %v1848_v55  ;;  %v2368_v15 = vrot.slane %v2361_v0, %v9080_v36  ;;  %v2376_v38 = vrot.slane %v8333_v12, %v9080_v36  ;;  %3312 = vrot.lane.b32.xlu1 %v9289_v13, %s8577_s30 }
 0x2ed   : > { %v2384_v33 = vrot.slane %v2377_v11, %v9080_v36  ;;  %v2392_v49 = vrot.slane %v8334_v3, %v9080_v36  ;;  %v1857_v5 = vrot.slane %v1849_v47, %v9102_v57  ;;  %v1864_v32 = vrot.slane %v1850_v62, %v9102_v57  ;;  %11493 = vst [vmem:[#allocation10_spill] sm:$0xff] %v9631_v51 }
 0x2ee   : > { %v1873_v30 = vrot.slane %v1865_v25, %v9102_v57  ;;  %v1880_v19 = vrot.slane %v1866_v8, %v9102_v57  ;;  %v2393_v55 = vcombine.low %v2368_v15, %v2376_v38  ;;  %v2394_v0 = vcombine.high %v2368_v15, %v2376_v38  ;;  %v9633_v47 = vpop.permute.xlu1 %3252 }
 0x2ef   : > { %v2409_v12 = vcombine.low %v2384_v33, %v2392_v49  ;;  %v2410_v7 = vcombine.high %v2384_v33, %v2392_v49  ;;  %v2905_v11 = vcombine.low %v1857_v5, %v1864_v32  ;;  %v8349_v27 = vcombine.high %v1857_v5, %v1864_v32  ;;  %3342 = vrot.lane.b32.xlu0 %v9327_v29, %s8577_s30  ;;  %v9647_v5 = vpop.permute.xlu0 %5682 }
 0x2f0   : > { %v2921_v3 = vcombine.low %v1873_v30, %v1880_v19  ;;  %v8350_v46 = vcombine.high %v1873_v30, %v1880_v19  ;;  %v2401_v62 = vrot.slane %v2393_v55, %v9102_v57  ;;  %v2408_v25 = vrot.slane %v2394_v0, %v9102_v57  ;;  %3328 = vrot.lane.b32.xlu1 %v9309_v4, %s8577_s30 }
 0x2f1   : > { %v2417_v8 = vrot.slane %v2409_v12, %v9102_v57  ;;  %v2424_v51 = vrot.slane %v2410_v7, %v9102_v57  ;;  %v2912_v38 = vrot.slane %v2905_v11, %v9080_v36  ;;  %v2920_v15 = vrot.slane %v8349_v27, %v9080_v36  ;;  %11494 = vst [vmem:[#allocation11_spill] sm:$0xff] %v9647_v5 }
 0x2f2   : > { %v2928_v33 = vrot.slane %v2921_v3, %v9080_v36  ;;  %v2936_v49 = vrot.slane %v8350_v46, %v9080_v36  ;;  %v9649_v11 = vpop.permute.xlu1 %3268  ;;  %v1357_v46 = vcombine.low %v9489_v54, %v9593_v44  ;;  %v1901_v3 = vcombine.low %v9505_v53, %v9617_v43 }
 0x2f3   : > { %v2425_v32 = vcombine.low %v2401_v62, %v2417_v8  ;;  %v2426_v30 = vcombine.high %v2401_v62, %v2417_v8  ;;  %v2427_v7 = vcombine.low %v2408_v25, %v2424_v51  ;;  %v2428_v19 = vcombine.high %v2408_v25, %v2424_v51  ;;  %3358 = vrot.lane.b32.xlu0 %v9345_v63, %s8577_s30 }
 0x2f4   : > { %v2937_v55 = vcombine.low %v2912_v38, %v2920_v15  ;;  %v2938_v0 = vcombine.high %v2912_v38, %v2920_v15  ;;  %v2953_v12 = vcombine.low %v2928_v33, %v2936_v49  ;;  %v2954_v27 = vcombine.high %v2928_v33, %v2936_v49  ;;  %3344 = vrot.lane.b32.xlu1 %v9333_v21, %s8577_s30  ;;  %v9675_v33 = vpop.permute.xlu0 %5698 }
 0x2f5   : > { %3182 = vst.msk [vmem:[%s9189_s11 + $0x20] sm:$0xff] %vm3177_vm1, %v2425_v32  ;;  %3198 = vst.msk [vmem:[%s9189_s11 + $0xa0] sm:$0xff] %vm3177_vm1, %v2426_v30  ;;  %v1358_v51 = vcombine.high %v9489_v54, %v9593_v44  ;;  %v1902_v62 = vcombine.high %v9505_v53, %v9617_v43  ;;  %v1365_v49 = vrot.slane %v1357_v46, %v9080_v36 }
 0x2f6   : > { %3214 = vst.msk [vmem:[%s9189_s11 + $0x120] sm:$0xff] %vm3177_vm1, %v2427_v7  ;;  %3230 = vst.msk [vmem:[%s9189_s11 + $0x1a0] sm:$0xff] %vm3177_vm1, %v2428_v19  ;;  %v2945_v25 = vrot.slane %v2937_v55, %v9102_v57  ;;  %v2952_v8 = vrot.slane %v2938_v0, %v9102_v57  ;;  %v2961_v38 = vrot.slane %v2953_v12, %v9102_v57 }
 0x2f7   : > { %v2968_v15 = vrot.slane %v2954_v27, %v9102_v57  ;;  %11495 = vst [vmem:[#allocation12_spill] sm:$0xff] %v9675_v33  ;;  %v1372_v32 = vrot.slane %v1358_v51, %v9080_v36  ;;  %v1909_v30 = vrot.slane %v1901_v3, %v9080_v36  ;;  %v1916_v7 = vrot.slane %v1902_v62, %v9080_v36  ;;  %v9681_v27 = vpop.permute.xlu1 %5684 }
 0x2f8   : > { %v2969_v19 = vcombine.low %v2945_v25, %v2961_v38  ;;  %v2970_v55 = vcombine.high %v2945_v25, %v2961_v38  ;;  %5710 = vrot.lane.b32.xlu0 %v9469_v59, %s8578_s8  ;;  %v1373_v33 = vcombine.low %v9566_v22, %v1365_v49  ;;  %v1374_v46 = vcombine.high %v9566_v22, %v1365_v49 }
 0x2f9   : > { %v2971_v0 = vcombine.low %v2952_v8, %v2968_v15  ;;  %v2972_v12 = vcombine.high %v2952_v8, %v2968_v15  ;;  %v1389_v51 = vcombine.low %v9569_v34, %v1372_v32  ;;  %v1390_v5 = vcombine.high %v9569_v34, %v1372_v32  ;;  %3360 = vrot.lane.b32.xlu1 %v9359_v39, %s8577_s30  ;;  %v9703_v34 = vpop.permute.xlu0 %869 }
 0x2fa   : > { %3190 = vst.msk [vmem:[%s9189_s11 + $0x60] sm:$0xff] %vm3177_vm1, %v2969_v19  ;;  %3206 = vst.msk [vmem:[%s9189_s11 + $0xe0] sm:$0xff] %vm3177_vm1, %v2970_v55  ;;  %v1917_v3 = vcombine.low %v9602_v16, %v1909_v30  ;;  %v1918_v59 = vcombine.high %v9602_v16, %v1909_v30  ;;  %v1933_v62 = vcombine.low %v9605_v35, %v1916_v7 }
 0x2fb   : > { %3222 = vst.msk [vmem:[%s9189_s11 + $0x160] sm:$0xff] %vm3177_vm1, %v2971_v0  ;;  %3238 = vst.msk [vmem:[%s9189_s11 + $0x1e0] sm:$0xff] %vm3177_vm1, %v2972_v12  ;;  %v1934_v22 = vcombine.high %v9605_v35, %v1916_v7  ;;  %v1381_v25 = vrot.slane %v1373_v33, %v9102_v57  ;;  %v1388_v8 = vrot.slane %v1374_v46, %v9102_v57  ;;  %v9713_v30 = vpop.permute.xlu1 %5700 }
 0x2fc   : > { %v1397_v38 = vrot.slane %v1389_v51, %v9102_v57  ;;  %v1404_v15 = vrot.slane %v1390_v5, %v9102_v57  ;;  %v1925_v49 = vrot.slane %v1917_v3, %v9102_v57  ;;  %v1932_v16 = vrot.slane %v1918_v59, %v9102_v57  ;;  %11496 = vst [vmem:[#allocation13_spill] sm:$0xff] %v9713_v30 }
 0x2fd   : > { %v1941_v32 = vrot.slane %v1933_v62, %v9102_v57  ;;  %v1948_v35 = vrot.slane %v1934_v22, %v9102_v57  ;;  %5726 = vrot.lane.b32.xlu0 %v9267_v14, %s8578_s8  ;;  %v2429_v33 = vcombine.low %v1381_v25, %v1388_v8  ;;  %v8335_v7 = vcombine.high %v1381_v25, %v1388_v8  ;;  %v9719_v51 = vpop.permute.xlu0 %885 }
 0x2fe   : > { %v2445_v19 = vcombine.low %v1397_v38, %v1404_v15  ;;  %v8336_v55 = vcombine.high %v1397_v38, %v1404_v15  ;;  %v2973_v0 = vcombine.low %v1925_v49, %v1932_v16  ;;  %v8351_v12 = vcombine.high %v1925_v49, %v1932_v16  ;;  %5712 = vrot.lane.b32.xlu1 %v9257_v61, %s8578_s8 }
 0x2ff   : > { %v2989_v5 = vcombine.low %v1941_v32, %v1948_v35  ;;  %v8352_v46 = vcombine.high %v1941_v32, %v1948_v35  ;;  %v2436_v3 = vrot.slane %v2429_v33, %v9080_v36  ;;  %v2444_v59 = vrot.slane %v8335_v7, %v9080_v36  ;;  %v9729_v15 = vpop.permute.xlu1 %871 }
 0x300   : > { %v2452_v62 = vrot.slane %v2445_v19, %v9080_v36  ;;  %v2460_v14 = vrot.slane %v8336_v55, %v9080_v36  ;;  %v2980_v22 = vrot.slane %v2973_v0, %v9080_v36  ;;  %v2988_v25 = vrot.slane %v8351_v12, %v9080_v36 }
 0x301   : > { %v2996_v8 = vrot.slane %v2989_v5, %v9080_v36  ;;  %v3004_v38 = vrot.slane %v8352_v46, %v9080_v36  ;;  %5742 = vrot.lane.b32.xlu0 %v9283_v17, %s8578_s8  ;;  %v2461_v61 = vcombine.low %v2436_v3, %v2444_v59  ;;  %v2462_v49 = vcombine.high %v2436_v3, %v2444_v59  ;;  %v9735_v55 = vpop.permute.xlu0 %917 }
 0x302   : > { %v2477_v16 = vcombine.low %v2452_v62, %v2460_v14  ;;  %v2478_v32 = vcombine.high %v2452_v62, %v2460_v14  ;;  %v3005_v35 = vcombine.low %v2980_v22, %v2988_v25  ;;  %v3006_v33 = vcombine.high %v2980_v22, %v2988_v25  ;;  %5728 = vrot.lane.b32.xlu1 %v9273_v48, %s8578_s8 }
 0x303   : > { %v3021_v7 = vcombine.low %v2996_v8, %v3004_v38  ;;  %v3022_v19 = vcombine.high %v2996_v8, %v3004_v38  ;;  %v2469_v0 = vrot.slane %v2461_v61, %v9102_v57  ;;  %v2476_v12 = vrot.slane %v2462_v49, %v9102_v57  ;;  %v9745_v62 = vpop.permute.xlu1 %887 }
 0x304   : > { %v2485_v5 = vrot.slane %v2477_v16, %v9102_v57  ;;  %v2492_v17 = vrot.slane %v2478_v32, %v9102_v57  ;;  %v3013_v46 = vrot.slane %v3005_v35, %v9102_v57  ;;  %v3020_v3 = vrot.slane %v3006_v33, %v9102_v57 }
 0x305   : > { %v3029_v59 = vrot.slane %v3021_v7, %v9102_v57  ;;  %v3036_v48 = vrot.slane %v3022_v19, %v9102_v57  ;;  %5758 = vrot.lane.b32.xlu0 %v9299_v24, %s8578_s8  ;;  %v9751_v32 = vpop.permute.xlu0 %933  ;;  %v1410_v35 = vcombine.high %v9045_v31, %v9735_v55 }
 0x306   : > { %v2493_v14 = vcombine.low %v2469_v0, %v2485_v5  ;;  %v2494_v22 = vcombine.high %v2469_v0, %v2485_v5  ;;  %v2495_v25 = vcombine.low %v2476_v12, %v2492_v17  ;;  %v2496_v8 = vcombine.high %v2476_v12, %v2492_v17  ;;  %5744 = vrot.lane.b32.xlu1 %v9289_v13, %s8578_s8 }
 0x307   : > { %v3037_v38 = vcombine.low %v3013_v46, %v3029_v59  ;;  %v3038_v61 = vcombine.high %v3013_v46, %v3029_v59  ;;  %v3039_v49 = vcombine.low %v3020_v3, %v3036_v48  ;;  %v3040_v16 = vcombine.high %v3020_v3, %v3036_v48  ;;  %v9769_v24 = vpop.permute.xlu1 %919 }
 0x308   : > { %3183 = vst.msk [vmem:[%s9189_s11 + $0x28] sm:$0xff] %vm3177_vm1, %v2493_v14  ;;  %3199 = vst.msk [vmem:[%s9189_s11 + $0xa8] sm:$0xff] %vm3177_vm1, %v2494_v22  ;;  %v1409_v13 = vcombine.low %v9045_v31, %v9735_v55  ;;  %v1953_v33 = vcombine.low %v9056_v41, %v9751_v32  ;;  %v1954_v7 = vcombine.high %v9056_v41, %v9751_v32 }
 0x309   : > { %3215 = vst.msk [vmem:[%s9189_s11 + $0x128] sm:$0xff] %vm3177_vm1, %v2495_v25  ;;  %3231 = vst.msk [vmem:[%s9189_s11 + $0x1a8] sm:$0xff] %vm3177_vm1, %v2496_v8  ;;  %5774 = vrot.lane.b32.xlu0 %v9327_v29, %s8578_s8  ;;  %v1477_v19 = vcombine.low %v9063_v1, %v9769_v24  ;;  %v1478_v0 = vcombine.high %v9063_v1, %v9769_v24  ;;  %v9787_v29 = vpop.permute.xlu0 %965  ;;  %v1424_v1 = vrot.slane %v1410_v35, %v9080_v36 }
 0x30a   : > { %3191 = vst.msk [vmem:[%s9189_s11 + $0x68] sm:$0xff] %vm3177_vm1, %v3037_v38  ;;  %3207 = vst.msk [vmem:[%s9189_s11 + $0xe8] sm:$0xff] %vm3177_vm1, %v3038_v61  ;;  %5760 = vrot.lane.b32.xlu1 %v9309_v4, %s8578_s8  ;;  %v1425_v31 = vcombine.low %v9703_v34, %v9787_v29  ;;  %v1426_v12 = vcombine.high %v9703_v34, %v9787_v29  ;;  %v1417_v41 = vrot.slane %v1409_v13, %v9080_v36 }
 0x30b   : > { %3223 = vst.msk [vmem:[%s9189_s11 + $0x168] sm:$0xff] %vm3177_vm1, %v3039_v49  ;;  %3239 = vst.msk [vmem:[%s9189_s11 + $0x1e8] sm:$0xff] %vm3177_vm1, %v3040_v16  ;;  %v9793_v5 = vpop.permute.xlu1 %935  ;;  %v1961_v46 = vrot.slane %v1953_v33, %v9080_v36  ;;  %v1968_v3 = vrot.slane %v1954_v7, %v9080_v36  ;;  %v9804_v59 = vrot.slane %v1477_v19, %v9080_v36 }
 0x30c   : > { %v1433_v17 = vrot.slane %v1425_v31, %v9080_v36  ;;  %v1440_v4 = vrot.slane %v1426_v12, %v9080_v36  ;;  %v9807_v48 = vrot.slane %v1478_v0, %v9080_v36 }
 0x30d   : > { %5790 = vrot.lane.b32.xlu0 %v9345_v63, %s8578_s8  ;;  %v9811_v63 = vpop.permute.xlu0 %981 }
 0x30e   : > { %5776 = vrot.lane.b32.xlu1 %v9333_v21, %s8578_s8  ;;  %v1441_v14 = vcombine.low %v1417_v41, %v1433_v17  ;;  %v1442_v22 = vcombine.high %v1417_v41, %v1433_v17  ;;  %v1457_v25 = vcombine.low %v1424_v1, %v1440_v4  ;;  %v1458_v8 = vcombine.high %v1424_v1, %v1440_v4 }
 0x30f   : > { %v1969_v49 = vcombine.low %v9719_v51, %v9811_v63  ;;  %v1970_v16 = vcombine.high %v9719_v51, %v9811_v63  ;;  %v9821_v13 = vpop.permute.xlu1 %967 }
 0x310   : > { %v1449_v21 = vrot.slane %v1441_v14, %v9102_v57  ;;  %v1456_v35 = vrot.slane %v1442_v22, %v9102_v57  ;;  %v1465_v33 = vrot.slane %v1457_v25, %v9102_v57  ;;  %v1472_v7 = vrot.slane %v1458_v8, %v9102_v57 }
 0x311   : > { %3282 = vrot.lane.b32.xlu0 %v9459_v28, %s8577_s30  ;;  %v1977_v19 = vrot.slane %v1969_v49, %v9080_v36  ;;  %v1984_v0 = vrot.slane %v1970_v16, %v9080_v36  ;;  %v1493_v31 = vcombine.low %v9729_v15, %v9821_v13  ;;  %v1494_v12 = vcombine.high %v9729_v15, %v9821_v13  ;;  %v9837_v41 = vpop.permute.xlu0 %3254 }
 0x312   : > { %5792 = vrot.lane.b32.xlu1 %v9359_v39, %s8578_s8  ;;  %11497 = vst [vmem:[#allocation14_spill] sm:$0xff] %v9837_v41  ;;  %v2497_v1 = vcombine.low %v1449_v21, %v1456_v35  ;;  %v8337_v17 = vcombine.high %v1449_v21, %v1456_v35  ;;  %v2513_v4 = vcombine.low %v1465_v33, %v1472_v7 }
 0x313   : > { %v8338_v14 = vcombine.high %v1465_v33, %v1472_v7  ;;  %v1985_v22 = vcombine.low %v1961_v46, %v1977_v19  ;;  %v1986_v25 = vcombine.high %v1961_v46, %v1977_v19  ;;  %v2001_v8 = vcombine.low %v1968_v3, %v1984_v0  ;;  %v9839_v16 = vpop.permute.xlu1 %983 }
 0x314   : > { %v2002_v49 = vcombine.high %v1968_v3, %v1984_v0  ;;  %v2504_v61 = vrot.slane %v2497_v1, %v9080_v36  ;;  %v2512_v38 = vrot.slane %v8337_v17, %v9080_v36  ;;  %v2520_v39 = vrot.slane %v2513_v4, %v9080_v36 }
 0x315   : > { %3298 = vrot.lane.b32.xlu0 %v9479_v40, %s8577_s30  ;;  %v2528_v41 = vrot.slane %v8338_v14, %v9080_v36  ;;  %v1993_v21 = vrot.slane %v1985_v22, %v9102_v57  ;;  %v2000_v35 = vrot.slane %v1986_v25, %v9102_v57  ;;  %v2009_v46 = vrot.slane %v2001_v8, %v9102_v57  ;;  %v9853_v33 = vpop.permute.xlu0 %3270 }
 0x316   : > { %v2016_v3 = vrot.slane %v2002_v49, %v9102_v57  ;;  %3284 = vrot.lane.b32.xlu1 %v9489_v54, %s8577_s30  ;;  %11498 = vst [vmem:[#allocation15_spill] sm:$0xff] %v9853_v33  ;;  %v2529_v7 = vcombine.low %v2504_v61, %v2512_v38  ;;  %v2530_v19 = vcombine.high %v2504_v61, %v2512_v38 }
 0x317   : > { %v2545_v0 = vcombine.low %v2520_v39, %v2528_v41  ;;  %v2546_v1 = vcombine.high %v2520_v39, %v2528_v41  ;;  %v3041_v17 = vcombine.low %v1993_v21, %v2000_v35  ;;  %v8353_v4 = vcombine.high %v1993_v21, %v2000_v35  ;;  %v9855_v22 = vpop.permute.xlu1 %3256 }
 0x318   : > { %v3057_v14 = vcombine.low %v2009_v46, %v2016_v3  ;;  %v8354_v30 = vcombine.high %v2009_v46, %v2016_v3  ;;  %v2537_v25 = vrot.slane %v2529_v7, %v9102_v57  ;;  %v2544_v8 = vrot.slane %v2530_v19, %v9102_v57 }
 0x319   : > { %3314 = vrot.lane.b32.xlu0 %v9495_v42, %s8577_s30  ;;  %v2553_v49 = vrot.slane %v2545_v0, %v9102_v57  ;;  %v2560_v33 = vrot.slane %v2546_v1, %v9102_v57  ;;  %v3048_v38 = vrot.slane %v3041_v17, %v9080_v36  ;;  %v3056_v61 = vrot.slane %v8353_v4, %v9080_v36  ;;  %v9869_v21 = vpop.permute.xlu0 %5686 }
 0x31a   : > { %v3064_v41 = vrot.slane %v3057_v14, %v9080_v36  ;;  %v3072_v39 = vrot.slane %v8354_v30, %v9080_v36  ;;  %3300 = vrot.lane.b32.xlu1 %v9505_v53, %s8577_s30  ;;  %v1501_v30 = vrot.slane %v1493_v31, %v9080_v36  ;;  %v2037_v14 = vcombine.low %v9745_v62, %v9839_v16 }
 0x31b   : > { %v2561_v35 = vcombine.low %v2537_v25, %v2553_v49  ;;  %v2562_v46 = vcombine.high %v2537_v25, %v2553_v49  ;;  %v2563_v3 = vcombine.low %v2544_v8, %v2560_v33  ;;  %v2564_v7 = vcombine.high %v2544_v8, %v2560_v33  ;;  %v9871_v4 = vpop.permute.xlu1 %3272 }
 0x31c   : > { %v3073_v19 = vcombine.low %v3048_v38, %v3056_v61  ;;  %v3074_v0 = vcombine.high %v3048_v38, %v3056_v61  ;;  %v3089_v1 = vcombine.low %v3064_v41, %v3072_v39  ;;  %v3090_v17 = vcombine.high %v3064_v41, %v3072_v39 }
 0x31d   : > { %3330 = vrot.lane.b32.xlu0 %v9511_v18, %s8577_s30  ;;  %3184 = vst.msk [vmem:[%s9189_s11 + $0x30] sm:$0xff] %vm3177_vm1, %v2561_v35  ;;  %3200 = vst.msk [vmem:[%s9189_s11 + $0xb0] sm:$0xff] %vm3177_vm1, %v2562_v46  ;;  %v1508_v33 = vrot.slane %v1494_v12, %v9080_v36  ;;  %v2038_v25 = vcombine.high %v9745_v62, %v9839_v16  ;;  %v9895_v31 = vpop.permute.xlu0 %5702  ;;  %v1509_v12 = vcombine.low %v9804_v59, %v1501_v30 }
 0x31e   : > { %3216 = vst.msk [vmem:[%s9189_s11 + $0x130] sm:$0xff] %vm3177_vm1, %v2563_v3  ;;  %3232 = vst.msk [vmem:[%s9189_s11 + $0x1b0] sm:$0xff] %vm3177_vm1, %v2564_v7  ;;  %v3081_v8 = vrot.slane %v3073_v19, %v9102_v57  ;;  %v3088_v49 = vrot.slane %v3074_v0, %v9102_v57  ;;  %v3097_v38 = vrot.slane %v3089_v1, %v9102_v57  ;;  %3316 = vrot.lane.b32.xlu1 %v9533_v9, %s8577_s30 }
 0x31f   : > { %v3104_v61 = vrot.slane %v3090_v17, %v9102_v57  ;;  %11499 = vst [vmem:[#allocation16_spill] sm:$0xff] %v9895_v31  ;;  %v1510_v41 = vcombine.high %v9804_v59, %v1501_v30  ;;  %v1525_v39 = vcombine.low %v9807_v48, %v1508_v33  ;;  %v1526_v35 = vcombine.high %v9807_v48, %v1508_v33  ;;  %v9901_v0 = vpop.permute.xlu1 %5688 }
 0x320   : > { %v3105_v46 = vcombine.low %v3081_v8, %v3097_v38  ;;  %v3106_v3 = vcombine.high %v3081_v8, %v3097_v38  ;;  %11500 = vst [vmem:[#allocation17_spill] sm:$0xff] %v9901_v0  ;;  %v1517_v1 = vrot.slane %v1509_v12, %v9102_v57  ;;  %v11501_v48 = vcombine.low %v9074_v50, %v9793_v5 }
 0x321   : > { %v3107_v7 = vcombine.low %v3088_v49, %v3104_v61  ;;  %v3108_v19 = vcombine.high %v3088_v49, %v3104_v61  ;;  %3346 = vrot.lane.b32.xlu0 %v9547_v52, %s8577_s30  ;;  %v1524_v59 = vrot.slane %v1510_v41, %v9102_v57  ;;  %v1533_v17 = vrot.slane %v1525_v39, %v9102_v57  ;;  %v9929_v12 = vpop.permute.xlu0 %3274 }
 0x322   : > { %v1540_v30 = vrot.slane %v1526_v35, %v9102_v57  ;;  %v2029_v33 = vrot.slane %v11501_v48, %v9080_v36  ;;  %v11502_v8 = vcombine.high %v9074_v50, %v9793_v5  ;;  %3192 = vst.msk [vmem:[%s9189_s11 + $0x70] sm:$0xff] %vm3177_vm1, %v3105_v46  ;;  %3208 = vst.msk [vmem:[%s9189_s11 + $0xf0] sm:$0xff] %vm3177_vm1, %v3106_v3  ;;  %3332 = vrot.lane.b32.xlu1 %v9561_v58, %s8577_s30 }
 0x323   : > { %3224 = vst.msk [vmem:[%s9189_s11 + $0x170] sm:$0xff] %vm3177_vm1, %v3107_v7  ;;  %3240 = vst.msk [vmem:[%s9189_s11 + $0x1f0] sm:$0xff] %vm3177_vm1, %v3108_v19  ;;  %v2045_v38 = vrot.slane %v2037_v14, %v9080_v36  ;;  %v2052_v61 = vrot.slane %v2038_v25, %v9080_v36  ;;  %v2565_v41 = vcombine.low %v1517_v1, %v1524_v59  ;;  %v9931_v7 = vpop.permute.xlu1 %5704 }
 0x324   : > { %v2036_v49 = vrot.slane %v11502_v8, %v9080_v36  ;;  %v8339_v50 = vcombine.high %v1517_v1, %v1524_v59  ;;  %v2581_v39 = vcombine.low %v1533_v17, %v1540_v30  ;;  %v8340_v35 = vcombine.high %v1533_v17, %v1540_v30  ;;  %11503 = vst [vmem:[#allocation18_spill] sm:$0xff] %v9931_v7 }
 0x325   : > { %v2053_v46 = vcombine.low %v2029_v33, %v2045_v38  ;;  %v2054_v48 = vcombine.high %v2029_v33, %v2045_v38  ;;  %3362 = vrot.lane.b32.xlu0 %v9575_v20, %s8577_s30  ;;  %v2572_v14 = vrot.slane %v2565_v41, %v9080_v36  ;;  %v9945_v33 = vpop.permute.xlu0 %3290 }
 0x326   : > { %v2069_v3 = vcombine.low %v2036_v49, %v2052_v61  ;;  %v2070_v8 = vcombine.high %v2036_v49, %v2052_v61  ;;  %v2580_v25 = vrot.slane %v8339_v50, %v9080_v36  ;;  %v2588_v19 = vrot.slane %v2581_v39, %v9080_v36  ;;  %3348 = vrot.lane.b32.xlu1 %v9593_v44, %s8577_s30 }
 0x327   : > { %v2596_v0 = vrot.slane %v8340_v35, %v9080_v36  ;;  %v2061_v1 = vrot.slane %v2053_v46, %v9102_v57  ;;  %v2068_v59 = vrot.slane %v2054_v48, %v9102_v57  ;;  %v9947_v46 = vpop.permute.xlu1 %3276 }
 0x328   : > { %v2077_v17 = vrot.slane %v2069_v3, %v9102_v57  ;;  %v2084_v30 = vrot.slane %v2070_v8, %v9102_v57  ;;  %v2597_v49 = vcombine.low %v2572_v14, %v2580_v25  ;;  %v2598_v38 = vcombine.high %v2572_v14, %v2580_v25 }
 0x329   : > { %v2613_v61 = vcombine.low %v2588_v19, %v2596_v0  ;;  %v2614_v41 = vcombine.high %v2588_v19, %v2596_v0  ;;  %v3109_v50 = vcombine.low %v2061_v1, %v2068_v59  ;;  %v8355_v39 = vcombine.high %v2061_v1, %v2068_v59  ;;  %5714 = vrot.lane.b32.xlu0 %v9459_v28, %s8578_s8  ;;  %v3307_v28 = vpop.permute.xlu0 %3306 }
 0x32a   : > { %v3125_v35 = vcombine.low %v2077_v17, %v2084_v30  ;;  %v8356_v7 = vcombine.high %v2077_v17, %v2084_v30  ;;  %v2605_v48 = vrot.slane %v2597_v49, %v9102_v57  ;;  %v2612_v3 = vrot.slane %v2598_v38, %v9102_v57  ;;  %3364 = vrot.lane.b32.xlu1 %v9617_v43, %s8577_s30 }
 0x32b   : > { %v2621_v8 = vrot.slane %v2613_v61, %v9102_v57  ;;  %v2628_v31 = vrot.slane %v2614_v41, %v9102_v57  ;;  %v3116_v14 = vrot.slane %v3109_v50, %v9080_v36  ;;  %v3124_v0 = vrot.slane %v8355_v39, %v9080_v36  ;;  %v9961_v50 = vpop.permute.xlu1 %3292 }
 0x32c   : > { %v3132_v25 = vrot.slane %v3125_v35, %v9080_v36  ;;  %v3140_v19 = vrot.slane %v8356_v7, %v9080_v36 }
 0x32d   : > { %v2629_v1 = vcombine.low %v2605_v48, %v2621_v8  ;;  %v2630_v59 = vcombine.high %v2605_v48, %v2621_v8  ;;  %v2631_v17 = vcombine.low %v2612_v3, %v2628_v31  ;;  %v2632_v30 = vcombine.high %v2612_v3, %v2628_v31  ;;  %5730 = vrot.lane.b32.xlu0 %v9479_v40, %s8578_s8  ;;  %v3323_v35 = vpop.permute.xlu0 %3322 }
 0x32e   : > { %v3141_v49 = vcombine.low %v3116_v14, %v3124_v0  ;;  %v3142_v38 = vcombine.high %v3116_v14, %v3124_v0  ;;  %v3157_v61 = vcombine.low %v3132_v25, %v3140_v19  ;;  %v3158_v41 = vcombine.high %v3132_v25, %v3140_v19  ;;  %5716 = vrot.lane.b32.xlu1 %v9489_v54, %s8578_s8 }
 0x32f   : > { %3185 = vst.msk [vmem:[%s9189_s11 + $0x38] sm:$0xff] %vm3177_vm1, %v2629_v1  ;;  %3201 = vst.msk [vmem:[%s9189_s11 + $0xb8] sm:$0xff] %vm3177_vm1, %v2630_v59  ;;  %v3434_v48 = vcombine.low %v9160_v60, %v3307_v28  ;;  %v3435_v3 = vcombine.high %v9160_v60, %v3307_v28  ;;  %v3309_v19 = vpop.permute.xlu1 %3308  ;;  %v3978_v54 = vcombine.low %v9179_v10, %v3323_v35 }
 0x330   : > { %3217 = vst.msk [vmem:[%s9189_s11 + $0x138] sm:$0xff] %vm3177_vm1, %v2631_v17  ;;  %3233 = vst.msk [vmem:[%s9189_s11 + $0x1b8] sm:$0xff] %vm3177_vm1, %v2632_v30  ;;  %v3149_v31 = vrot.slane %v3141_v49, %v9102_v57  ;;  %v3156_v7 = vrot.slane %v3142_v38, %v9102_v57  ;;  %v3165_v39 = vrot.slane %v3157_v61, %v9102_v57 }
 0x331   : > { %v3172_v40 = vrot.slane %v3158_v41, %v9102_v57  ;;  %5746 = vrot.lane.b32.xlu0 %v9495_v42, %s8578_s8  ;;  %v3979_v60 = vcombine.high %v9179_v10, %v3323_v35  ;;  %v3502_v28 = vcombine.low %v9150_v23, %v3309_v19  ;;  %v3503_v1 = vcombine.high %v9150_v23, %v3309_v19  ;;  %v3339_v42 = vpop.permute.xlu0 %3338 }
 0x332   : > { %v3173_v8 = vcombine.low %v3149_v31, %v3165_v39  ;;  %v3174_v14 = vcombine.high %v3149_v31, %v3165_v39  ;;  %5732 = vrot.lane.b32.xlu1 %v9505_v53, %s8578_s8  ;;  %v3450_v59 = vcombine.low %v9929_v12, %v3339_v42  ;;  %v3451_v17 = vcombine.high %v9929_v12, %v3339_v42 }
 0x333   : > { %v3175_v0 = vcombine.low %v3156_v7, %v3172_v40  ;;  %v3176_v25 = vcombine.high %v3156_v7, %v3172_v40  ;;  %v3442_v30 = vrot.slane %v3434_v48, %v9080_v36  ;;  %v3449_v49 = vrot.slane %v3435_v3, %v9080_v36  ;;  %v3325_v38 = vpop.permute.xlu1 %3324 }
 0x334   : > { %3193 = vst.msk [vmem:[%s9189_s11 + $0x78] sm:$0xff] %vm3177_vm1, %v3173_v8  ;;  %3209 = vst.msk [vmem:[%s9189_s11 + $0xf8] sm:$0xff] %vm3177_vm1, %v3174_v14  ;;  %v3458_v10 = vrot.slane %v3450_v59, %v9080_v36  ;;  %v3465_v23 = vrot.slane %v3451_v17, %v9080_v36  ;;  %v4046_v61 = vcombine.low %v9166_v45, %v3325_v38 }
 0x335   : > { %3225 = vst.msk [vmem:[%s9189_s11 + $0x178] sm:$0xff] %vm3177_vm1, %v3175_v0  ;;  %3241 = vst.msk [vmem:[%s9189_s11 + $0x1f8] sm:$0xff] %vm3177_vm1, %v3176_v25  ;;  %5762 = vrot.lane.b32.xlu0 %v9511_v18, %s8578_s8  ;;  %v4047_v53 = vcombine.high %v9166_v45, %v3325_v38  ;;  %v3986_v41 = vrot.slane %v3978_v54, %v9080_v36  ;;  %v3993_v12 = vrot.slane %v3979_v60, %v9080_v36  ;;  %v3355_v18 = vpop.permute.xlu0 %3354 }
 0x336   : > { %v10010_v31 = vrot.slane %v3502_v28, %v9080_v36  ;;  %v10013_v7 = vrot.slane %v3503_v1, %v9080_v36  ;;  %5748 = vrot.lane.b32.xlu1 %v9533_v9, %s8578_s8  ;;  %v3466_v39 = vcombine.low %v3442_v30, %v3458_v10  ;;  %v3467_v40 = vcombine.high %v3442_v30, %v3458_v10 }
 0x337   : > { %v3482_v35 = vcombine.low %v3449_v49, %v3465_v23  ;;  %v3483_v48 = vcombine.high %v3449_v49, %v3465_v23  ;;  %v10018_v45 = vrot.slane %v4046_v61, %v9080_v36  ;;  %v10021_v3 = vrot.slane %v4047_v53, %v9080_v36  ;;  %v10025_v0 = vpop.permute.xlu1 %3340 }
 0x338   : > { %v3994_v8 = vcombine.low %v9945_v33, %v3355_v18  ;;  %v3995_v14 = vcombine.high %v9945_v33, %v3355_v18  ;;  %v3474_v9 = vrot.slane %v3466_v39, %v9102_v57  ;;  %v3481_v25 = vrot.slane %v3467_v40, %v9102_v57 }
 0x339   : > { %5778 = vrot.lane.b32.xlu0 %v9547_v52, %s8578_s8  ;;  %v3490_v19 = vrot.slane %v3482_v35, %v9102_v57  ;;  %v3497_v54 = vrot.slane %v3483_v48, %v9102_v57  ;;  %v3518_v33 = vcombine.low %v9947_v46, %v10025_v0  ;;  %v3519_v1 = vcombine.high %v9947_v46, %v10025_v0  ;;  %v10041_v52 = vpop.permute.xlu0 %5706 }
 0x33a   : > { %v4002_v60 = vrot.slane %v3994_v8, %v9080_v36  ;;  %v4009_v28 = vrot.slane %v3995_v14, %v9080_v36  ;;  %5764 = vrot.lane.b32.xlu1 %v9561_v58, %s8578_s8  ;;  %v4522_v42 = vcombine.low %v3474_v9, %v3481_v25  ;;  %v8357_v59 = vcombine.high %v3474_v9, %v3481_v25 }
 0x33b   : > { %v4538_v17 = vcombine.low %v3490_v19, %v3497_v54  ;;  %v8358_v30 = vcombine.high %v3490_v19, %v3497_v54  ;;  %v10043_v61 = vpop.permute.xlu1 %3356 }
 0x33c   : > { %v4010_v49 = vcombine.low %v3986_v41, %v4002_v60  ;;  %v4011_v38 = vcombine.high %v3986_v41, %v4002_v60  ;;  %v4026_v10 = vcombine.low %v3993_v12, %v4009_v28  ;;  %v4027_v23 = vcombine.high %v3993_v12, %v4009_v28 }
 0x33d   : > { %5794 = vrot.lane.b32.xlu0 %v9575_v20, %s8578_s8  ;;  %v4529_v46 = vrot.slane %v4522_v42, %v9080_v36  ;;  %v4537_v53 = vrot.slane %v8357_v59, %v9080_v36  ;;  %v4545_v58 = vrot.slane %v4538_v17, %v9080_v36  ;;  %v4553_v18 = vrot.slane %v8358_v30, %v9080_v36  ;;  %v10057_v20 = vpop.permute.xlu0 %5722 }
 0x33e   : > { %v4018_v39 = vrot.slane %v4010_v49, %v9102_v57  ;;  %v4025_v40 = vrot.slane %v4011_v38, %v9102_v57  ;;  %v4034_v41 = vrot.slane %v4026_v10, %v9102_v57  ;;  %v4041_v12 = vrot.slane %v4027_v23, %v9102_v57  ;;  %5780 = vrot.lane.b32.xlu1 %v9593_v44, %s8578_s8 }
 0x33f   : > { %v4554_v35 = vcombine.low %v4529_v46, %v4537_v53  ;;  %v4555_v48 = vcombine.high %v4529_v46, %v4537_v53  ;;  %v4570_v8 = vcombine.low %v4545_v58, %v4553_v18  ;;  %v4571_v14 = vcombine.high %v4545_v58, %v4553_v18  ;;  %v10065_v42 = vpop.permute.xlu1 %5708 }
 0x340   : > { %v5066_v0 = vcombine.low %v4018_v39, %v4025_v40  ;;  %v8373_v9 = vcombine.high %v4018_v39, %v4025_v40  ;;  %v5082_v25 = vcombine.low %v4034_v41, %v4041_v12  ;;  %v8374_v19 = vcombine.high %v4034_v41, %v4041_v12 }
 0x341   : > { %3286 = vrot.lane.b32.xlu0 %v9703_v34, %s8577_s30  ;;  %v4562_v54 = vrot.slane %v4554_v35, %v9102_v57  ;;  %v4569_v60 = vrot.slane %v4555_v48, %v9102_v57  ;;  %v4578_v44 = vrot.slane %v4570_v8, %v9102_v57  ;;  %v4585_v28 = vrot.slane %v4571_v14, %v9102_v57  ;;  %v10079_v38 = vpop.permute.xlu0 %5738 }
 0x342   : > { %v5073_v59 = vrot.slane %v5066_v0, %v9080_v36  ;;  %v5081_v17 = vrot.slane %v8373_v9, %v9080_v36  ;;  %v5089_v30 = vrot.slane %v5082_v25, %v9080_v36  ;;  %v5097_v49 = vrot.slane %v8374_v19, %v9080_v36  ;;  %5796 = vrot.lane.b32.xlu1 %v9617_v43, %s8578_s8 }
 0x343   : > { %v4586_v10 = vcombine.low %v4562_v54, %v4578_v44  ;;  %v4587_v23 = vcombine.high %v4562_v54, %v4578_v44  ;;  %v4588_v46 = vcombine.low %v4569_v60, %v4585_v28  ;;  %v4589_v53 = vcombine.high %v4569_v60, %v4585_v28  ;;  %v10107_v9 = vpop.permute.xlu1 %5724 }
 0x344   : > { %v5098_v58 = vcombine.low %v5073_v59, %v5081_v17  ;;  %v5099_v18 = vcombine.high %v5073_v59, %v5081_v17  ;;  %v5114_v39 = vcombine.low %v5089_v30, %v5097_v49  ;;  %v5115_v40 = vcombine.high %v5089_v30, %v5097_v49 }
 0x345   : > { %3302 = vrot.lane.b32.xlu0 %v9719_v51, %s8577_s30  ;;  %5610 = vst.msk [vmem:[%s10071_s14] sm:$0xff] %vm3177_vm1, %v4586_v10  ;;  %5626 = vst.msk [vmem:[%s10071_s14 + $0x80] sm:$0xff] %vm3177_vm1, %v4587_v23  ;;  %v3526_v43 = vrot.slane %v3518_v33, %v9080_v36  ;;  %v3533_v41 = vrot.slane %v3519_v1, %v9080_v36  ;;  %v4062_v12 = vcombine.low %v9961_v50, %v10043_v61  ;;  %v10109_v25 = vpop.permute.xlu0 %5754 }
 0x346   : > { %5642 = vst.msk [vmem:[%s10071_s14 + $0x100] sm:$0xff] %vm3177_vm1, %v4588_v46  ;;  %5658 = vst.msk [vmem:[%s10071_s14 + $0x180] sm:$0xff] %vm3177_vm1, %v4589_v53  ;;  %v4063_v35 = vcombine.high %v9961_v50, %v10043_v61  ;;  %v5106_v48 = vrot.slane %v5098_v58, %v9102_v57  ;;  %v5113_v8 = vrot.slane %v5099_v18, %v9102_v57  ;;  %3288 = vrot.lane.b32.xlu1 %v9729_v15, %s8577_s30 }
 0x347   : > { %v5122_v14 = vrot.slane %v5114_v39, %v9102_v57  ;;  %v5129_v0 = vrot.slane %v5115_v40, %v9102_v57  ;;  %v3534_v33 = vcombine.low %v10010_v31, %v3526_v43  ;;  %v3535_v1 = vcombine.high %v10010_v31, %v3526_v43 }
 0x348   : > { %v3550_v50 = vcombine.low %v10013_v7, %v3533_v41  ;;  %v3551_v61 = vcombine.high %v10013_v7, %v3533_v41  ;;  %v4070_v7 = vrot.slane %v4062_v12, %v9080_v36  ;;  %v4077_v30 = vrot.slane %v4063_v35, %v9080_v36 }
 0x349   : > { %v5130_v19 = vcombine.low %v5106_v48, %v5122_v14  ;;  %v5131_v54 = vcombine.high %v5106_v48, %v5122_v14  ;;  %v5132_v60 = vcombine.low %v5113_v8, %v5129_v0  ;;  %v5133_v44 = vcombine.high %v5113_v8, %v5129_v0  ;;  %3318 = vrot.lane.b32.xlu0 %v9735_v55, %s8577_s30  ;;  %v10143_v8 = vpop.permute.xlu1 %5740  ;;  %v10145_v14 = vpop.permute.xlu0 %5770 }
 0x34a   : > { %v3542_v28 = vrot.slane %v3534_v33, %v9102_v57  ;;  %v3549_v31 = vrot.slane %v3535_v1, %v9102_v57  ;;  %v3558_v59 = vrot.slane %v3550_v50, %v9102_v57  ;;  %v3565_v17 = vrot.slane %v3551_v61, %v9102_v57  ;;  %3304 = vrot.lane.b32.xlu1 %v9745_v62, %s8577_s30 }
 0x34b   : > { %5618 = vst.msk [vmem:[%s10071_s14 + $0x40] sm:$0xff] %vm3177_vm1, %v5130_v19  ;;  %5634 = vst.msk [vmem:[%s10071_s14 + $0xc0] sm:$0xff] %vm3177_vm1, %v5131_v54  ;;  %v5866_v49 = vcombine.low %v9201_v37, %v10079_v38  ;;  %v5867_v10 = vcombine.high %v9201_v37, %v10079_v38  ;;  %v4078_v18 = vcombine.low %v10018_v45, %v4070_v7 }
 0x34c   : > { %5650 = vst.msk [vmem:[%s10071_s14 + $0x140] sm:$0xff] %vm3177_vm1, %v5132_v60  ;;  %5666 = vst.msk [vmem:[%s10071_s14 + $0x1c0] sm:$0xff] %vm3177_vm1, %v5133_v44  ;;  %v4590_v23 = vcombine.low %v3542_v28, %v3549_v31  ;;  %v8359_v46 = vcombine.high %v3542_v28, %v3549_v31  ;;  %v4606_v53 = vcombine.low %v3558_v59, %v3565_v17 }
 0x34d   : > { %v8360_v58 = vcombine.high %v3558_v59, %v3565_v17  ;;  %v4079_v39 = vcombine.high %v10018_v45, %v4070_v7  ;;  %v4094_v40 = vcombine.low %v10021_v3, %v4077_v30  ;;  %v4095_v43 = vcombine.high %v10021_v3, %v4077_v30  ;;  %3334 = vrot.lane.b32.xlu0 %v9751_v32, %s8577_s30 }
 0x34e   : > { %v4597_v41 = vrot.slane %v4590_v23, %v9080_v36  ;;  %v4605_v12 = vrot.slane %v8359_v46, %v9080_v36  ;;  %v4613_v35 = vrot.slane %v4606_v53, %v9080_v36  ;;  %v4086_v45 = vrot.slane %v4078_v18, %v9102_v57  ;;  %3320 = vrot.lane.b32.xlu1 %v9769_v24, %s8577_s30 }
 0x34f   : > { %v4621_v48 = vrot.slane %v8360_v58, %v9080_v36  ;;  %v4093_v0 = vrot.slane %v4079_v39, %v9102_v57  ;;  %v4102_v3 = vrot.slane %v4094_v40, %v9102_v57  ;;  %v4109_v33 = vrot.slane %v4095_v43, %v9102_v57  ;;  %v10165_v43 = vpop.permute.xlu1 %5756 }
 0x350   : > { %v4622_v1 = vcombine.low %v4597_v41, %v4605_v12  ;;  %v4623_v50 = vcombine.high %v4597_v41, %v4605_v12  ;;  %v5787_v41 = vpop.permute.xlu0 %5786  ;;  %v5882_v38 = vcombine.low %v10041_v52, %v10145_v14 }
 0x351   : > { %v4638_v61 = vcombine.low %v4613_v35, %v4621_v48  ;;  %v4639_v19 = vcombine.high %v4613_v35, %v4621_v48  ;;  %v5134_v54 = vcombine.low %v4086_v45, %v4093_v0  ;;  %v8375_v60 = vcombine.high %v4086_v45, %v4093_v0  ;;  %3350 = vrot.lane.b32.xlu0 %v9787_v29, %s8577_s30 }
 0x352   : > { %v5150_v44 = vcombine.low %v4102_v3, %v4109_v33  ;;  %v8376_v28 = vcombine.high %v4102_v3, %v4109_v33  ;;  %v4630_v31 = vrot.slane %v4622_v1, %v9102_v57  ;;  %v4637_v59 = vrot.slane %v4623_v50, %v9102_v57  ;;  %3336 = vrot.lane.b32.xlu1 %v9793_v5, %s8577_s30 }
 0x353   : > { %v4646_v17 = vrot.slane %v4638_v61, %v9102_v57  ;;  %v4653_v7 = vrot.slane %v4639_v19, %v9102_v57  ;;  %v5141_v30 = vrot.slane %v5134_v54, %v9080_v36  ;;  %v5149_v23 = vrot.slane %v8375_v60, %v9080_v36 }
 0x354   : > { %v5157_v46 = vrot.slane %v5150_v44, %v9080_v36  ;;  %v5165_v53 = vrot.slane %v8376_v28, %v9080_v36  ;;  %v6410_v0 = vcombine.low %v9251_v2, %v10109_v25  ;;  %v6411_v3 = vcombine.high %v9251_v2, %v10109_v25 }
 0x355   : > { %v4654_v58 = vcombine.low %v4630_v31, %v4646_v17  ;;  %v4655_v18 = vcombine.high %v4630_v31, %v4646_v17  ;;  %v4656_v39 = vcombine.low %v4637_v59, %v4653_v7  ;;  %v4657_v40 = vcombine.high %v4637_v59, %v4653_v7  ;;  %3366 = vrot.lane.b32.xlu0 %v9811_v63, %s8577_s30  ;;  %v10207_v59 = vpop.permute.xlu1 %5772 }
 0x356   : > { %v5166_v12 = vcombine.low %v5141_v30, %v5149_v23  ;;  %v5167_v35 = vcombine.high %v5141_v30, %v5149_v23  ;;  %v5182_v48 = vcombine.low %v5157_v46, %v5165_v53  ;;  %v5183_v45 = vcombine.high %v5157_v46, %v5165_v53  ;;  %3352 = vrot.lane.b32.xlu1 %v9821_v13, %s8577_s30 }
 0x357   : > { %5611 = vst.msk [vmem:[%s10071_s14 + $0x8] sm:$0xff] %vm3177_vm1, %v4654_v58  ;;  %5627 = vst.msk [vmem:[%s10071_s14 + $0x88] sm:$0xff] %vm3177_vm1, %v4655_v18  ;;  %v5874_v19 = vrot.slane %v5866_v49, %v9080_v36  ;;  %v5881_v2 = vrot.slane %v5867_v10, %v9080_v36  ;;  %v5934_v25 = vcombine.low %v9191_v56, %v10143_v8 }
 0x358   : > { %5643 = vst.msk [vmem:[%s10071_s14 + $0x108] sm:$0xff] %vm3177_vm1, %v4656_v39  ;;  %5659 = vst.msk [vmem:[%s10071_s14 + $0x188] sm:$0xff] %vm3177_vm1, %v4657_v40  ;;  %v5174_v33 = vrot.slane %v5166_v12, %v9102_v57  ;;  %v5181_v1 = vrot.slane %v5167_v35, %v9102_v57  ;;  %v5190_v50 = vrot.slane %v5182_v48, %v9102_v57 }
 0x359   : > { %v5197_v61 = vrot.slane %v5183_v45, %v9102_v57  ;;  %v5935_v54 = vcombine.high %v9191_v56, %v10143_v8  ;;  %5718 = vrot.lane.b32.xlu0 %v9703_v34, %s8578_s8  ;;  %v6418_v49 = vrot.slane %v6410_v0, %v9080_v36  ;;  %v6425_v37 = vrot.slane %v6411_v3, %v9080_v36  ;;  %v10209_v56 = vpop.permute.xlu0 %3278 }
 0x35a   : > { %v5198_v60 = vcombine.low %v5174_v33, %v5190_v50  ;;  %v5199_v44 = vcombine.high %v5174_v33, %v5190_v50  ;;  %v5883_v10 = vcombine.high %v10041_v52, %v10145_v14  ;;  %v10220_v34 = vrot.slane %v5934_v25, %v9080_v36  ;;  %3368 = vrot.lane.b32.xlu1 %v9839_v16, %s8577_s30 }
 0x35b   : > { %v5200_v28 = vcombine.low %v5181_v1, %v5197_v61  ;;  %v5201_v31 = vcombine.high %v5181_v1, %v5197_v61  ;;  %v10223_v8 = vrot.slane %v5935_v54, %v9080_v36  ;;  %v6426_v52 = vcombine.low %v10057_v20, %v5787_v41 }
 0x35c   : > { %5619 = vst.msk [vmem:[%s10071_s14 + $0x48] sm:$0xff] %vm3177_vm1, %v5198_v60  ;;  %5635 = vst.msk [vmem:[%s10071_s14 + $0xc8] sm:$0xff] %vm3177_vm1, %v5199_v44  ;;  %v6427_v14 = vcombine.high %v10057_v20, %v5787_v41  ;;  %v5890_v17 = vrot.slane %v5882_v38, %v9080_v36  ;;  %v5897_v7 = vrot.slane %v5883_v10, %v9080_v36 }
 0x35d   : > { %5651 = vst.msk [vmem:[%s10071_s14 + $0x148] sm:$0xff] %vm3177_vm1, %v5200_v28  ;;  %5667 = vst.msk [vmem:[%s10071_s14 + $0x1c8] sm:$0xff] %vm3177_vm1, %v5201_v31  ;;  %v6478_v30 = vcombine.low %v9223_v26, %v10165_v43  ;;  %v6479_v23 = vcombine.high %v9223_v26, %v10165_v43  ;;  %v6434_v46 = vrot.slane %v6426_v52, %v9080_v36  ;;  %5734 = vrot.lane.b32.xlu0 %v9719_v51, %s8578_s8  ;;  %v10249_v51 = vpop.permute.xlu1 %5788  ;;  %v10251_v50 = vpop.permute.xlu0 %3294 }
 0x35e   : > { %v6441_v53 = vrot.slane %v6427_v14, %v9080_v36  ;;  %v5950_v20 = vcombine.low %v10065_v42, %v10207_v59  ;;  %v5951_v58 = vcombine.high %v10065_v42, %v10207_v59  ;;  %v5898_v18 = vcombine.low %v5874_v19, %v5890_v17  ;;  %5720 = vrot.lane.b32.xlu1 %v9729_v15, %s8578_s8 }
 0x35f   : > { %v5899_v39 = vcombine.high %v5874_v19, %v5890_v17  ;;  %v5914_v40 = vcombine.low %v5881_v2, %v5897_v7  ;;  %v5915_v41 = vcombine.high %v5881_v2, %v5897_v7  ;;  %v6442_v12 = vcombine.low %v6418_v49, %v6434_v46 }
 0x360   : > { %v6443_v35 = vcombine.high %v6418_v49, %v6434_v46  ;;  %v6458_v48 = vcombine.low %v6425_v37, %v6441_v53  ;;  %v6459_v45 = vcombine.high %v6425_v37, %v6441_v53  ;;  %v5906_v0 = vrot.slane %v5898_v18, %v9102_v57 }
 0x361   : > { %v5913_v3 = vrot.slane %v5899_v39, %v9102_v57  ;;  %v5922_v33 = vrot.slane %v5914_v40, %v9102_v57  ;;  %v5929_v1 = vrot.slane %v5915_v41, %v9102_v57  ;;  %v6450_v61 = vrot.slane %v6442_v12, %v9102_v57  ;;  %5750 = vrot.lane.b32.xlu0 %v9735_v55, %s8578_s8  ;;  %v10271_v40 = vpop.permute.xlu1 %3280  ;;  %v10273_v41 = vpop.permute.xlu0 %3310 }
 0x362   : > { %v6457_v19 = vrot.slane %v6443_v35, %v9102_v57  ;;  %v6466_v2 = vrot.slane %v6458_v48, %v9102_v57  ;;  %v6473_v15 = vrot.slane %v6459_v45, %v9102_v57  ;;  %5736 = vrot.lane.b32.xlu1 %v9745_v62, %s8578_s8  ;;  %v6493_v42 = vrot.slane %v6479_v23, %v9080_v36 }
 0x363   : > { %v6954_v25 = vcombine.low %v5906_v0, %v5913_v3  ;;  %v8389_v54 = vcombine.high %v5906_v0, %v5913_v3  ;;  %v6970_v60 = vcombine.low %v5922_v33, %v5929_v1  ;;  %v8390_v44 = vcombine.high %v5922_v33, %v5929_v1 }
 0x364   : > { %v7498_v28 = vcombine.low %v6450_v61, %v6457_v19  ;;  %v8405_v31 = vcombine.high %v6450_v61, %v6457_v19  ;;  %v7514_v49 = vcombine.low %v6466_v2, %v6473_v15  ;;  %v8406_v37 = vcombine.high %v6466_v2, %v6473_v15 }
 0x365   : > { %v6961_v38 = vrot.slane %v6954_v25, %v9080_v36  ;;  %v6969_v10 = vrot.slane %v8389_v54, %v9080_v36  ;;  %v6977_v52 = vrot.slane %v6970_v60, %v9080_v36  ;;  %v6985_v14 = vrot.slane %v8390_v44, %v9080_v36  ;;  %5766 = vrot.lane.b32.xlu0 %v9751_v32, %s8578_s8 }
 0x366   : > { %v7505_v55 = vrot.slane %v7498_v28, %v9080_v36  ;;  %v7513_v17 = vrot.slane %v8405_v31, %v9080_v36  ;;  %v7521_v7 = vrot.slane %v7514_v49, %v9080_v36  ;;  %v7529_v46 = vrot.slane %v8406_v37, %v9080_v36  ;;  %5752 = vrot.lane.b32.xlu1 %v9769_v24, %s8578_s8 }
 0x367   : > { %v6986_v62 = vcombine.low %v6961_v38, %v6969_v10  ;;  %v6987_v53 = vcombine.high %v6961_v38, %v6969_v10  ;;  %v7002_v18 = vcombine.low %v6977_v52, %v6985_v14  ;;  %v7003_v39 = vcombine.high %v6977_v52, %v6985_v14  ;;  %v10315_v38 = vpop.permute.xlu1 %3296  ;;  %v10317_v10 = vpop.permute.xlu0 %3326  ;;  %v11505_v14 = vld [vmem:[#allocation4_spill] sm:$0xff] }
 0x368   : > { %v7530_v12 = vcombine.low %v7505_v55, %v7513_v17  ;;  %v7531_v35 = vcombine.high %v7505_v55, %v7513_v17  ;;  %v7546_v48 = vcombine.low %v7521_v7, %v7529_v46  ;;  %v7547_v45 = vcombine.high %v7521_v7, %v7529_v46 }
 0x369   : > { %v6994_v0 = vrot.slane %v6986_v62, %v9102_v57  ;;  %v7001_v32 = vrot.slane %v6987_v53, %v9102_v57  ;;  %v7010_v3 = vrot.slane %v7002_v18, %v9102_v57  ;;  %v7017_v33 = vrot.slane %v7003_v39, %v9102_v57  ;;  %5782 = vrot.lane.b32.xlu0 %v9787_v29, %s8578_s8 }
 0x36a   : > { %v7538_v1 = vrot.slane %v7530_v12, %v9102_v57  ;;  %v7545_v24 = vrot.slane %v7531_v35, %v9102_v57  ;;  %v7554_v61 = vrot.slane %v7546_v48, %v9102_v57  ;;  %v7561_v19 = vrot.slane %v7547_v45, %v9102_v57  ;;  %5768 = vrot.lane.b32.xlu1 %v9793_v5, %s8578_s8 }
 0x36b   : > { %v7018_v2 = vcombine.low %v6994_v0, %v7010_v3  ;;  %v7019_v15 = vcombine.high %v6994_v0, %v7010_v3  ;;  %v7020_v25 = vcombine.low %v7001_v32, %v7017_v33  ;;  %v7021_v54 = vcombine.high %v7001_v32, %v7017_v33  ;;  %v10357_v45 = vpop.permute.xlu1 %3312  ;;  %v10359_v0 = vpop.permute.xlu0 %3342 }
 0x36c   : > { %v7562_v60 = vcombine.low %v7538_v1, %v7554_v61  ;;  %v7563_v44 = vcombine.high %v7538_v1, %v7554_v61  ;;  %v7564_v28 = vcombine.low %v7545_v24, %v7561_v19  ;;  %v7565_v31 = vcombine.high %v7545_v24, %v7561_v19 }
 0x36d   : > { %8042 = vst.msk [vmem:[%s10285_s17] sm:$0xff] %vm3177_vm1, %v7018_v2  ;;  %8058 = vst.msk [vmem:[%s10285_s17 + $0x80] sm:$0xff] %vm3177_vm1, %v7019_v15  ;;  %v5958_v29 = vrot.slane %v5950_v20, %v9080_v36  ;;  %v5965_v49 = vrot.slane %v5951_v58, %v9080_v36  ;;  %v6494_v5 = vcombine.low %v10107_v9, %v10249_v51  ;;  %5798 = vrot.lane.b32.xlu0 %v9811_v63, %s8578_s8 }
 0x36e   : > { %8074 = vst.msk [vmem:[%s10285_s17 + $0x100] sm:$0xff] %vm3177_vm1, %v7020_v25  ;;  %8090 = vst.msk [vmem:[%s10285_s17 + $0x180] sm:$0xff] %vm3177_vm1, %v7021_v54  ;;  %v6495_v37 = vcombine.high %v10107_v9, %v10249_v51  ;;  %v6486_v20 = vrot.slane %v6478_v30, %v9080_v36  ;;  %v11504_v9 = vld [vmem:[#allocation2_spill] sm:$0xff]  ;;  %v4114_v55 = vcombine.low %v11505_v14, %v10317_v10  ;;  %5784 = vrot.lane.b32.xlu1 %v9821_v13, %s8578_s8 }
 0x36f   : > { %8050 = vst.msk [vmem:[%s10285_s17 + $0x40] sm:$0xff] %vm3177_vm1, %v7562_v60  ;;  %8066 = vst.msk [vmem:[%s10285_s17 + $0xc0] sm:$0xff] %vm3177_vm1, %v7563_v44  ;;  %v3570_v59 = vcombine.low %v11504_v9, %v10273_v41  ;;  %v3571_v58 = vcombine.high %v11504_v9, %v10273_v41  ;;  %v5966_v26 = vcombine.low %v10220_v34, %v5958_v29 }
 0x370   : > { %8082 = vst.msk [vmem:[%s10285_s17 + $0x140] sm:$0xff] %vm3177_vm1, %v7564_v28  ;;  %8098 = vst.msk [vmem:[%s10285_s17 + $0x1c0] sm:$0xff] %vm3177_vm1, %v7565_v31  ;;  %v5967_v43 = vcombine.high %v10220_v34, %v5958_v29  ;;  %v5982_v30 = vcombine.low %v10223_v8, %v5965_v49  ;;  %v5983_v23 = vcombine.high %v10223_v8, %v5965_v49 }
 0x371   : > { %v6502_v51 = vrot.slane %v6494_v5, %v9080_v36  ;;  %v6509_v52 = vrot.slane %v6495_v37, %v9080_v36  ;;  %v4115_v17 = vcombine.high %v11505_v14, %v10317_v10  ;;  %v5974_v63 = vrot.slane %v5966_v26, %v9102_v57 }
 0x372   : > { %v5981_v34 = vrot.slane %v5967_v43, %v9102_v57  ;;  %v5990_v7 = vrot.slane %v5982_v30, %v9102_v57  ;;  %v5997_v8 = vrot.slane %v5983_v23, %v9102_v57  ;;  %5800 = vrot.lane.b32.xlu1 %v9839_v16, %s8578_s8  ;;  %v10379_v43 = vpop.permute.xlu1 %3328  ;;  %v3359_v30 = vpop.permute.xlu0 %3358  ;;  %v3586_v9 = vcombine.low %v10209_v56, %v10359_v0 }
 0x373   : > { %v6510_v46 = vcombine.low %v6486_v20, %v6502_v51  ;;  %v6511_v62 = vcombine.high %v6486_v20, %v6502_v51  ;;  %v6526_v53 = vcombine.low %v6493_v42, %v6509_v52  ;;  %v6527_v18 = vcombine.high %v6493_v42, %v6509_v52 }
 0x374   : > { %v7022_v39 = vcombine.low %v5974_v63, %v5981_v34  ;;  %v8391_v12 = vcombine.high %v5974_v63, %v5981_v34  ;;  %v7038_v35 = vcombine.low %v5990_v7, %v5997_v8  ;;  %v8392_v48 = vcombine.high %v5990_v7, %v5997_v8 }
 0x375   : > { %v6518_v13 = vrot.slane %v6510_v46, %v9102_v57  ;;  %v6525_v32 = vrot.slane %v6511_v62, %v9102_v57  ;;  %v6534_v3 = vrot.slane %v6526_v53, %v9102_v57  ;;  %v6541_v33 = vrot.slane %v6527_v18, %v9102_v57 }
 0x376   : > { %v7029_v1 = vrot.slane %v7022_v39, %v9080_v36  ;;  %v7037_v24 = vrot.slane %v8391_v12, %v9080_v36  ;;  %v7045_v61 = vrot.slane %v7038_v35, %v9080_v36  ;;  %v7053_v19 = vrot.slane %v8392_v48, %v9080_v36  ;;  %v11506_v48 = vld [vmem:[#allocation3_spill] sm:$0xff] }
 0x377   : > { %v7566_v2 = vcombine.low %v6518_v13, %v6525_v32  ;;  %v8407_v15 = vcombine.high %v6518_v13, %v6525_v32  ;;  %v7582_v25 = vcombine.low %v6534_v3, %v6541_v33  ;;  %v8408_v54 = vcombine.high %v6534_v3, %v6541_v33 }
 0x378   : > { %v7054_v60 = vcombine.low %v7029_v1, %v7037_v24  ;;  %v7055_v44 = vcombine.high %v7029_v1, %v7037_v24  ;;  %v7070_v28 = vcombine.low %v7045_v61, %v7053_v19  ;;  %v7071_v31 = vcombine.high %v7045_v61, %v7053_v19  ;;  %v10419_v61 = vpop.permute.xlu0 %5710 }
 0x379   : > { %v7573_v29 = vrot.slane %v7566_v2, %v9080_v36  ;;  %v7581_v16 = vrot.slane %v8407_v15, %v9080_v36  ;;  %v7589_v49 = vrot.slane %v7582_v25, %v9080_v36  ;;  %v7597_v5 = vrot.slane %v8408_v54, %v9080_v36 }
 0x37a   : > { %v7062_v37 = vrot.slane %v7054_v60, %v9102_v57  ;;  %v7069_v20 = vrot.slane %v7055_v44, %v9102_v57  ;;  %v7078_v42 = vrot.slane %v7070_v28, %v9102_v57  ;;  %v7085_v26 = vrot.slane %v7071_v31, %v9102_v57 }
 0x37b   : > { %v7598_v23 = vcombine.low %v7573_v29, %v7581_v16  ;;  %v7599_v51 = vcombine.high %v7573_v29, %v7581_v16  ;;  %v7614_v52 = vcombine.low %v7589_v49, %v7597_v5  ;;  %v7615_v63 = vcombine.high %v7589_v49, %v7597_v5 }
 0x37c   : > { %v7086_v34 = vcombine.low %v7062_v37, %v7078_v42  ;;  %v7087_v7 = vcombine.high %v7062_v37, %v7078_v42  ;;  %v7088_v8 = vcombine.low %v7069_v20, %v7085_v26  ;;  %v7089_v46 = vcombine.high %v7069_v20, %v7085_v26 }
 0x37d   : > { %v7606_v62 = vrot.slane %v7598_v23, %v9102_v57  ;;  %v7613_v53 = vrot.slane %v7599_v51, %v9102_v57  ;;  %v7622_v18 = vrot.slane %v7614_v52, %v9102_v57  ;;  %v7629_v39 = vrot.slane %v7615_v63, %v9102_v57  ;;  %v10455_v23 = vpop.permute.xlu0 %5726 }
 0x37e   : > { %8043 = vst.msk [vmem:[%s10285_s17 + $0x8] sm:$0xff] %vm3177_vm1, %v7086_v34  ;;  %8059 = vst.msk [vmem:[%s10285_s17 + $0x88] sm:$0xff] %vm3177_vm1, %v7087_v7  ;;  %v3578_v12 = vrot.slane %v3570_v59, %v9080_v36  ;;  %v3585_v35 = vrot.slane %v3571_v58, %v9080_v36  ;;  %v3638_v13 = vcombine.low %v11506_v48, %v10357_v45 }
 0x37f   : > { %8075 = vst.msk [vmem:[%s10285_s17 + $0x108] sm:$0xff] %vm3177_vm1, %v7088_v8  ;;  %8091 = vst.msk [vmem:[%s10285_s17 + $0x188] sm:$0xff] %vm3177_vm1, %v7089_v46  ;;  %v3639_v32 = vcombine.high %v11506_v48, %v10357_v45  ;;  %v7630_v3 = vcombine.low %v7606_v62, %v7622_v18  ;;  %v7631_v33 = vcombine.high %v7606_v62, %v7622_v18  ;;  %v10417_v45 = vpop.permute.xlu1 %3344 }
 0x380   : > { %v7632_v1 = vcombine.low %v7613_v53, %v7629_v39  ;;  %v7633_v24 = vcombine.high %v7613_v53, %v7629_v39  ;;  %v4122_v59 = vrot.slane %v4114_v55, %v9080_v36  ;;  %v4129_v41 = vrot.slane %v4115_v17, %v9080_v36 }
 0x381   : > { %v3587_v58 = vcombine.high %v10209_v56, %v10359_v0  ;;  %8051 = vst.msk [vmem:[%s10285_s17 + $0x48] sm:$0xff] %vm3177_vm1, %v7630_v3  ;;  %8067 = vst.msk [vmem:[%s10285_s17 + $0xc8] sm:$0xff] %vm3177_vm1, %v7631_v33  ;;  %v10430_v10 = vrot.slane %v3638_v13, %v9080_v36  ;;  %v10433_v14 = vrot.slane %v3639_v32, %v9080_v36 }
 0x382   : > { %8083 = vst.msk [vmem:[%s10285_s17 + $0x148] sm:$0xff] %vm3177_vm1, %v7632_v1  ;;  %8099 = vst.msk [vmem:[%s10285_s17 + $0x1c8] sm:$0xff] %vm3177_vm1, %v7633_v24  ;;  %v4130_v56 = vcombine.low %v10251_v50, %v3359_v30  ;;  %v4131_v55 = vcombine.high %v10251_v50, %v3359_v30  ;;  %v3594_v17 = vrot.slane %v3586_v9, %v9080_v36 }
 0x383   : > { %v3601_v0 = vrot.slane %v3587_v58, %v9080_v36  ;;  %v4182_v19 = vcombine.low %v9393_v6, %v10379_v43  ;;  %v4183_v2 = vcombine.high %v9393_v6, %v10379_v43  ;;  %v3654_v54 = vcombine.low %v10271_v40, %v10417_v45  ;;  %v10453_v30 = vpop.permute.xlu1 %3360 }
 0x384   : > { %v4138_v15 = vrot.slane %v4130_v56, %v9080_v36  ;;  %v4145_v25 = vrot.slane %v4131_v55, %v9080_v36  ;;  %v3655_v50 = vcombine.high %v10271_v40, %v10417_v45  ;;  %v3602_v60 = vcombine.low %v3578_v12, %v3594_v17  ;;  %v10471_v55 = vpop.permute.xlu0 %5742 }
 0x385   : > { %v3603_v44 = vcombine.high %v3578_v12, %v3594_v17  ;;  %v3618_v28 = vcombine.low %v3585_v35, %v3601_v0  ;;  %v3619_v31 = vcombine.high %v3585_v35, %v3601_v0  ;;  %v4197_v40 = vrot.slane %v4183_v2, %v9080_v36 }
 0x386   : > { %v4146_v29 = vcombine.low %v4122_v59, %v4138_v15  ;;  %v4147_v16 = vcombine.high %v4122_v59, %v4138_v15  ;;  %v4162_v49 = vcombine.low %v4129_v41, %v4145_v25  ;;  %v4163_v5 = vcombine.high %v4129_v41, %v4145_v25 }
 0x387   : > { %v3610_v37 = vrot.slane %v3602_v60, %v9102_v57  ;;  %v3617_v20 = vrot.slane %v3603_v44, %v9102_v57  ;;  %v3626_v42 = vrot.slane %v3618_v28, %v9102_v57  ;;  %v3633_v26 = vrot.slane %v3619_v31, %v9102_v57  ;;  %v10469_v56 = vpop.permute.xlu1 %5712 }
 0x388   : > { %v4154_v51 = vrot.slane %v4146_v29, %v9102_v57  ;;  %v4161_v52 = vrot.slane %v4147_v16, %v9102_v57  ;;  %v4170_v63 = vrot.slane %v4162_v49, %v9102_v57  ;;  %v4177_v34 = vrot.slane %v4163_v5, %v9102_v57 }
 0x389   : > { %v4658_v7 = vcombine.low %v3610_v37, %v3617_v20  ;;  %v8361_v8 = vcombine.high %v3610_v37, %v3617_v20  ;;  %v4674_v46 = vcombine.low %v3626_v42, %v3633_v26  ;;  %v8362_v62 = vcombine.high %v3626_v42, %v3633_v26 }
 0x38a   : > { %v5202_v53 = vcombine.low %v4154_v51, %v4161_v52  ;;  %v8377_v18 = vcombine.high %v4154_v51, %v4161_v52  ;;  %v5218_v39 = vcombine.low %v4170_v63, %v4177_v34  ;;  %v8378_v12 = vcombine.high %v4170_v63, %v4177_v34 }
 0x38b   : > { %v4665_v35 = vrot.slane %v4658_v7, %v9080_v36  ;;  %v4673_v48 = vrot.slane %v8361_v8, %v9080_v36  ;;  %v4681_v13 = vrot.slane %v4674_v46, %v9080_v36  ;;  %v4689_v32 = vrot.slane %v8362_v62, %v9080_v36 }
 0x38c   : > { %v5209_v3 = vrot.slane %v5202_v53, %v9080_v36  ;;  %v5217_v33 = vrot.slane %v8377_v18, %v9080_v36  ;;  %v5225_v1 = vrot.slane %v5218_v39, %v9080_v36  ;;  %v5233_v24 = vrot.slane %v8378_v12, %v9080_v36  ;;  %v10501_v53 = vpop.permute.xlu1 %5728  ;;  %v10503_v18 = vpop.permute.xlu0 %5758  ;;  %v11508_v12 = vld [vmem:[#allocation7_spill] sm:$0xff] }
 0x38d   : > { %v4690_v59 = vcombine.low %v4665_v35, %v4673_v48  ;;  %v4691_v41 = vcombine.high %v4665_v35, %v4673_v48  ;;  %v4706_v9 = vcombine.low %v4681_v13, %v4689_v32  ;;  %v4707_v58 = vcombine.high %v4681_v13, %v4689_v32 }
 0x38e   : > { %v5234_v17 = vcombine.low %v5209_v3, %v5217_v33  ;;  %v5235_v0 = vcombine.high %v5209_v3, %v5217_v33  ;;  %v5250_v15 = vcombine.low %v5225_v1, %v5233_v24  ;;  %v5251_v25 = vcombine.high %v5225_v1, %v5233_v24 }
 0x38f   : > { %v4698_v60 = vrot.slane %v4690_v59, %v9102_v57  ;;  %v4705_v44 = vrot.slane %v4691_v41, %v9102_v57  ;;  %v4714_v28 = vrot.slane %v4706_v9, %v9102_v57  ;;  %v4721_v31 = vrot.slane %v4707_v58, %v9102_v57 }
 0x390   : > { %v5242_v29 = vrot.slane %v5234_v17, %v9102_v57  ;;  %v5249_v16 = vrot.slane %v5235_v0, %v9102_v57  ;;  %v5258_v49 = vrot.slane %v5250_v15, %v9102_v57  ;;  %v5265_v5 = vrot.slane %v5251_v25, %v9102_v57  ;;  %v10539_v17 = vpop.permute.xlu1 %5744  ;;  %v10541_v0 = vpop.permute.xlu0 %5774 }
 0x391   : > { %v4722_v37 = vcombine.low %v4698_v60, %v4714_v28  ;;  %v4723_v20 = vcombine.high %v4698_v60, %v4714_v28  ;;  %v4724_v42 = vcombine.low %v4705_v44, %v4721_v31  ;;  %v4725_v26 = vcombine.high %v4705_v44, %v4721_v31 }
 0x392   : > { %v5266_v51 = vcombine.low %v5242_v29, %v5258_v49  ;;  %v5267_v52 = vcombine.high %v5242_v29, %v5258_v49  ;;  %v5268_v63 = vcombine.low %v5249_v16, %v5265_v5  ;;  %v5269_v34 = vcombine.high %v5249_v16, %v5265_v5 }
 0x393   : > { %5612 = vst.msk [vmem:[%s10071_s14 + $0x10] sm:$0xff] %vm3177_vm1, %v4722_v37  ;;  %5628 = vst.msk [vmem:[%s10071_s14 + $0x90] sm:$0xff] %vm3177_vm1, %v4723_v20  ;;  %v3662_v7 = vrot.slane %v3654_v54, %v9080_v36  ;;  %v3669_v8 = vrot.slane %v3655_v50, %v9080_v36  ;;  %v4198_v46 = vcombine.low %v10315_v38, %v10453_v30 }
 0x394   : > { %5644 = vst.msk [vmem:[%s10071_s14 + $0x110] sm:$0xff] %vm3177_vm1, %v4724_v42  ;;  %5660 = vst.msk [vmem:[%s10071_s14 + $0x190] sm:$0xff] %vm3177_vm1, %v4725_v26  ;;  %v4199_v62 = vcombine.high %v10315_v38, %v10453_v30  ;;  %v4190_v54 = vrot.slane %v4182_v19, %v9080_v36  ;;  %v11507_v38 = vld [vmem:[#allocation5_spill] sm:$0xff]  ;;  %v6546_v35 = vcombine.low %v11508_v12, %v10503_v18 }
 0x395   : > { %5620 = vst.msk [vmem:[%s10071_s14 + $0x50] sm:$0xff] %vm3177_vm1, %v5266_v51  ;;  %5636 = vst.msk [vmem:[%s10071_s14 + $0xd0] sm:$0xff] %vm3177_vm1, %v5267_v52  ;;  %v6002_v45 = vcombine.low %v11507_v38, %v10471_v55  ;;  %v6003_v50 = vcombine.high %v11507_v38, %v10471_v55  ;;  %v3670_v19 = vcombine.low %v10430_v10, %v3662_v7 }
 0x396   : > { %5652 = vst.msk [vmem:[%s10071_s14 + $0x150] sm:$0xff] %vm3177_vm1, %v5268_v63  ;;  %5668 = vst.msk [vmem:[%s10071_s14 + $0x1d0] sm:$0xff] %vm3177_vm1, %v5269_v34  ;;  %v3671_v30 = vcombine.high %v10430_v10, %v3662_v7  ;;  %v3686_v6 = vcombine.low %v10433_v14, %v3669_v8  ;;  %v3687_v43 = vcombine.high %v10433_v14, %v3669_v8 }
 0x397   : > { %v4206_v2 = vrot.slane %v4198_v46, %v9080_v36  ;;  %v4213_v39 = vrot.slane %v4199_v62, %v9080_v36  ;;  %v6547_v48 = vcombine.high %v11508_v12, %v10503_v18  ;;  %v3678_v13 = vrot.slane %v3670_v19, %v9102_v57  ;;  %v10559_v19 = vpop.permute.xlu1 %5760 }
 0x398   : > { %v3685_v32 = vrot.slane %v3671_v30, %v9102_v57  ;;  %v3694_v10 = vrot.slane %v3686_v6, %v9102_v57  ;;  %v3701_v3 = vrot.slane %v3687_v43, %v9102_v57  ;;  %v5791_v30 = vpop.permute.xlu0 %5790  ;;  %v6018_v38 = vcombine.low %v10419_v61, %v10541_v0 }
 0x399   : > { %v4214_v33 = vcombine.low %v4190_v54, %v4206_v2  ;;  %v4215_v14 = vcombine.high %v4190_v54, %v4206_v2  ;;  %v4230_v1 = vcombine.low %v4197_v40, %v4213_v39  ;;  %v4231_v24 = vcombine.high %v4197_v40, %v4213_v39 }
 0x39a   : > { %v4726_v59 = vcombine.low %v3678_v13, %v3685_v32  ;;  %v8363_v41 = vcombine.high %v3678_v13, %v3685_v32  ;;  %v4742_v9 = vcombine.low %v3694_v10, %v3701_v3  ;;  %v8364_v58 = vcombine.high %v3694_v10, %v3701_v3 }
 0x39b   : > { %v4222_v15 = vrot.slane %v4214_v33, %v9102_v57  ;;  %v4229_v25 = vrot.slane %v4215_v14, %v9102_v57  ;;  %v4238_v60 = vrot.slane %v4230_v1, %v9102_v57  ;;  %v4245_v44 = vrot.slane %v4231_v24, %v9102_v57 }
 0x39c   : > { %v4733_v28 = vrot.slane %v4726_v59, %v9080_v36  ;;  %v4741_v31 = vrot.slane %v8363_v41, %v9080_v36  ;;  %v4749_v29 = vrot.slane %v4742_v9, %v9080_v36  ;;  %v4757_v16 = vrot.slane %v8364_v58, %v9080_v36  ;;  %v11509_v9 = vld [vmem:[#allocation6_spill] sm:$0xff] }
 0x39d   : > { %v5270_v49 = vcombine.low %v4222_v15, %v4229_v25  ;;  %v8379_v5 = vcombine.high %v4222_v15, %v4229_v25  ;;  %v5286_v37 = vcombine.low %v4238_v60, %v4245_v44  ;;  %v8380_v20 = vcombine.high %v4238_v60, %v4245_v44 }
 0x39e   : > { %v4758_v42 = vcombine.low %v4733_v28, %v4741_v31  ;;  %v4759_v26 = vcombine.high %v4733_v28, %v4741_v31  ;;  %v4774_v51 = vcombine.low %v4749_v29, %v4757_v16  ;;  %v4775_v52 = vcombine.high %v4749_v29, %v4757_v16  ;;  %v10599_v31 = vpop.permute.xlu0 %3282  ;;  %v11510_v29 = vld [vmem:[#allocation8_spill] sm:$0xff] }
 0x39f   : > { %v5277_v63 = vrot.slane %v5270_v49, %v9080_v36  ;;  %v5285_v34 = vrot.slane %v8379_v5, %v9080_v36  ;;  %v5293_v7 = vrot.slane %v5286_v37, %v9080_v36  ;;  %v5301_v8 = vrot.slane %v8380_v20, %v9080_v36 }
 0x3a0   : > { %v4766_v46 = vrot.slane %v4758_v42, %v9102_v57  ;;  %v4773_v62 = vrot.slane %v4759_v26, %v9102_v57  ;;  %v4782_v54 = vrot.slane %v4774_v51, %v9102_v57  ;;  %v4789_v40 = vrot.slane %v4775_v52, %v9102_v57 }
 0x3a1   : > { %v5302_v6 = vcombine.low %v5277_v63, %v5285_v34  ;;  %v5303_v43 = vcombine.high %v5277_v63, %v5285_v34  ;;  %v5318_v2 = vcombine.low %v5293_v7, %v5301_v8  ;;  %v5319_v39 = vcombine.high %v5293_v7, %v5301_v8 }
 0x3a2   : > { %v4790_v13 = vcombine.low %v4766_v46, %v4782_v54  ;;  %v4791_v32 = vcombine.high %v4766_v46, %v4782_v54  ;;  %v4792_v10 = vcombine.low %v4773_v62, %v4789_v40  ;;  %v4793_v3 = vcombine.high %v4773_v62, %v4789_v40 }
 0x3a3   : > { %v5310_v33 = vrot.slane %v5302_v6, %v9102_v57  ;;  %v5317_v14 = vrot.slane %v5303_v43, %v9102_v57  ;;  %v5326_v1 = vrot.slane %v5318_v2, %v9102_v57  ;;  %v5333_v24 = vrot.slane %v5319_v39, %v9102_v57  ;;  %v10635_v6 = vpop.permute.xlu0 %3298 }
 0x3a4   : > { %5613 = vst.msk [vmem:[%s10071_s14 + $0x18] sm:$0xff] %vm3177_vm1, %v4790_v13  ;;  %5629 = vst.msk [vmem:[%s10071_s14 + $0x98] sm:$0xff] %vm3177_vm1, %v4791_v32  ;;  %v6010_v59 = vrot.slane %v6002_v45, %v9080_v36  ;;  %v6017_v41 = vrot.slane %v6003_v50, %v9080_v36  ;;  %v6070_v58 = vcombine.low %v11509_v9, %v10539_v17 }
 0x3a5   : > { %5645 = vst.msk [vmem:[%s10071_s14 + $0x118] sm:$0xff] %vm3177_vm1, %v4792_v10  ;;  %5661 = vst.msk [vmem:[%s10071_s14 + $0x198] sm:$0xff] %vm3177_vm1, %v4793_v3  ;;  %v6071_v15 = vcombine.high %v11509_v9, %v10539_v17  ;;  %v5334_v25 = vcombine.low %v5310_v33, %v5326_v1  ;;  %v5335_v60 = vcombine.high %v5310_v33, %v5326_v1  ;;  %v10597_v17 = vpop.permute.xlu1 %5776 }
 0x3a6   : > { %v5336_v44 = vcombine.low %v5317_v14, %v5333_v24  ;;  %v5337_v28 = vcombine.high %v5317_v14, %v5333_v24  ;;  %v6554_v45 = vrot.slane %v6546_v35, %v9080_v36  ;;  %v6561_v55 = vrot.slane %v6547_v48, %v9080_v36 }
 0x3a7   : > { %v6019_v50 = vcombine.high %v10419_v61, %v10541_v0  ;;  %5621 = vst.msk [vmem:[%s10071_s14 + $0x58] sm:$0xff] %vm3177_vm1, %v5334_v25  ;;  %5637 = vst.msk [vmem:[%s10071_s14 + $0xd8] sm:$0xff] %vm3177_vm1, %v5335_v60  ;;  %v10610_v18 = vrot.slane %v6070_v58, %v9080_v36  ;;  %v10613_v12 = vrot.slane %v6071_v15, %v9080_v36 }
 0x3a8   : > { %5653 = vst.msk [vmem:[%s10071_s14 + $0x158] sm:$0xff] %vm3177_vm1, %v5336_v44  ;;  %5669 = vst.msk [vmem:[%s10071_s14 + $0x1d8] sm:$0xff] %vm3177_vm1, %v5337_v28  ;;  %v6562_v61 = vcombine.low %v10455_v23, %v5791_v30  ;;  %v6563_v35 = vcombine.high %v10455_v23, %v5791_v30  ;;  %v6026_v48 = vrot.slane %v6018_v38, %v9080_v36 }
 0x3a9   : > { %v6033_v0 = vrot.slane %v6019_v50, %v9080_v36  ;;  %v6614_v16 = vcombine.low %v11510_v29, %v10559_v19  ;;  %v6615_v49 = vcombine.high %v11510_v29, %v10559_v19  ;;  %v6086_v20 = vcombine.low %v10469_v56, %v10597_v17  ;;  %v10633_v30 = vpop.permute.xlu1 %5792 }
 0x3aa   : > { %v6570_v5 = vrot.slane %v6562_v61, %v9080_v36  ;;  %v6577_v37 = vrot.slane %v6563_v35, %v9080_v36  ;;  %v6087_v23 = vcombine.high %v10469_v56, %v10597_v17  ;;  %v6034_v42 = vcombine.low %v6010_v59, %v6026_v48  ;;  %v10651_v35 = vpop.permute.xlu0 %3314 }
 0x3ab   : > { %v6035_v26 = vcombine.high %v6010_v59, %v6026_v48  ;;  %v6050_v51 = vcombine.low %v6017_v41, %v6033_v0  ;;  %v6051_v52 = vcombine.high %v6017_v41, %v6033_v0  ;;  %v6629_v56 = vrot.slane %v6615_v49, %v9080_v36 }
 0x3ac   : > { %v6578_v63 = vcombine.low %v6554_v45, %v6570_v5  ;;  %v6579_v34 = vcombine.high %v6554_v45, %v6570_v5  ;;  %v6594_v7 = vcombine.low %v6561_v55, %v6577_v37  ;;  %v6595_v8 = vcombine.high %v6561_v55, %v6577_v37 }
 0x3ad   : > { %v6042_v46 = vrot.slane %v6034_v42, %v9102_v57  ;;  %v6049_v62 = vrot.slane %v6035_v26, %v9102_v57  ;;  %v6058_v54 = vrot.slane %v6050_v51, %v9102_v57  ;;  %v6065_v40 = vrot.slane %v6051_v52, %v9102_v57  ;;  %v10649_v61 = vpop.permute.xlu1 %3284 }
 0x3ae   : > { %v6586_v43 = vrot.slane %v6578_v63, %v9102_v57  ;;  %v6593_v2 = vrot.slane %v6579_v34, %v9102_v57  ;;  %v6602_v39 = vrot.slane %v6594_v7, %v9102_v57  ;;  %v6609_v13 = vrot.slane %v6595_v8, %v9102_v57 }
 0x3af   : > { %v7090_v32 = vcombine.low %v6042_v46, %v6049_v62  ;;  %v8393_v10 = vcombine.high %v6042_v46, %v6049_v62  ;;  %v7106_v3 = vcombine.low %v6058_v54, %v6065_v40  ;;  %v8394_v33 = vcombine.high %v6058_v54, %v6065_v40 }
 0x3b0   : > { %v7634_v14 = vcombine.low %v6586_v43, %v6593_v2  ;;  %v8409_v1 = vcombine.high %v6586_v43, %v6593_v2  ;;  %v7650_v24 = vcombine.low %v6602_v39, %v6609_v13  ;;  %v8410_v59 = vcombine.high %v6602_v39, %v6609_v13 }
 0x3b1   : > { %v7097_v41 = vrot.slane %v7090_v32, %v9080_v36  ;;  %v7105_v9 = vrot.slane %v8393_v10, %v9080_v36  ;;  %v7113_v58 = vrot.slane %v7106_v3, %v9080_v36  ;;  %v7121_v15 = vrot.slane %v8394_v33, %v9080_v36 }
 0x3b2   : > { %v7641_v25 = vrot.slane %v7634_v14, %v9080_v36  ;;  %v7649_v60 = vrot.slane %v8409_v1, %v9080_v36  ;;  %v7657_v44 = vrot.slane %v7650_v24, %v9080_v36  ;;  %v7665_v28 = vrot.slane %v8410_v59, %v9080_v36  ;;  %v10681_v14 = vpop.permute.xlu1 %3300  ;;  %v10683_v1 = vpop.permute.xlu0 %3330  ;;  %v11512_v59 = vld [vmem:[#allocation10_spill] sm:$0xff] }
 0x3b3   : > { %v7122_v45 = vcombine.low %v7097_v41, %v7105_v9  ;;  %v7123_v55 = vcombine.high %v7097_v41, %v7105_v9  ;;  %v7138_v38 = vcombine.low %v7113_v58, %v7121_v15  ;;  %v7139_v50 = vcombine.high %v7113_v58, %v7121_v15 }
 0x3b4   : > { %v7666_v48 = vcombine.low %v7641_v25, %v7649_v60  ;;  %v7667_v0 = vcombine.high %v7641_v25, %v7649_v60  ;;  %v7682_v5 = vcombine.low %v7657_v44, %v7665_v28  ;;  %v7683_v37 = vcombine.high %v7657_v44, %v7665_v28 }
 0x3b5   : > { %v7130_v42 = vrot.slane %v7122_v45, %v9102_v57  ;;  %v7137_v26 = vrot.slane %v7123_v55, %v9102_v57  ;;  %v7146_v51 = vrot.slane %v7138_v38, %v9102_v57  ;;  %v7153_v52 = vrot.slane %v7139_v50, %v9102_v57 }
 0x3b6   : > { %v7674_v63 = vrot.slane %v7666_v48, %v9102_v57  ;;  %v7681_v34 = vrot.slane %v7667_v0, %v9102_v57  ;;  %v7690_v7 = vrot.slane %v7682_v5, %v9102_v57  ;;  %v7697_v8 = vrot.slane %v7683_v37, %v9102_v57  ;;  %v10719_v48 = vpop.permute.xlu1 %3316  ;;  %v10721_v0 = vpop.permute.xlu0 %3346 }
 0x3b7   : > { %v7154_v46 = vcombine.low %v7130_v42, %v7146_v51  ;;  %v7155_v62 = vcombine.high %v7130_v42, %v7146_v51  ;;  %v7156_v54 = vcombine.low %v7137_v26, %v7153_v52  ;;  %v7157_v40 = vcombine.high %v7137_v26, %v7153_v52 }
 0x3b8   : > { %v7698_v43 = vcombine.low %v7674_v63, %v7690_v7  ;;  %v7699_v2 = vcombine.high %v7674_v63, %v7690_v7  ;;  %v7700_v39 = vcombine.low %v7681_v34, %v7697_v8  ;;  %v7701_v13 = vcombine.high %v7681_v34, %v7697_v8 }
 0x3b9   : > { %8044 = vst.msk [vmem:[%s10285_s17 + $0x10] sm:$0xff] %vm3177_vm1, %v7154_v46  ;;  %8060 = vst.msk [vmem:[%s10285_s17 + $0x90] sm:$0xff] %vm3177_vm1, %v7155_v62  ;;  %v6094_v32 = vrot.slane %v6086_v20, %v9080_v36  ;;  %v6101_v10 = vrot.slane %v6087_v23, %v9080_v36  ;;  %v6630_v3 = vcombine.low %v10501_v53, %v10633_v30 }
 0x3ba   : > { %8076 = vst.msk [vmem:[%s10285_s17 + $0x110] sm:$0xff] %vm3177_vm1, %v7156_v54  ;;  %8092 = vst.msk [vmem:[%s10285_s17 + $0x190] sm:$0xff] %vm3177_vm1, %v7157_v40  ;;  %v6631_v33 = vcombine.high %v10501_v53, %v10633_v30  ;;  %v6622_v20 = vrot.slane %v6614_v16, %v9080_v36  ;;  %v11511_v53 = vld [vmem:[#allocation9_spill] sm:$0xff]  ;;  %v4250_v41 = vcombine.low %v11512_v59, %v10683_v1 }
 0x3bb   : > { %8052 = vst.msk [vmem:[%s10285_s17 + $0x50] sm:$0xff] %vm3177_vm1, %v7698_v43  ;;  %8068 = vst.msk [vmem:[%s10285_s17 + $0xd0] sm:$0xff] %vm3177_vm1, %v7699_v2  ;;  %v3706_v17 = vcombine.low %v11511_v53, %v10651_v35  ;;  %v3707_v23 = vcombine.high %v11511_v53, %v10651_v35  ;;  %v6102_v16 = vcombine.low %v10610_v18, %v6094_v32 }
 0x3bc   : > { %8084 = vst.msk [vmem:[%s10285_s17 + $0x150] sm:$0xff] %vm3177_vm1, %v7700_v39  ;;  %8100 = vst.msk [vmem:[%s10285_s17 + $0x1d0] sm:$0xff] %vm3177_vm1, %v7701_v13  ;;  %v6103_v30 = vcombine.high %v10610_v18, %v6094_v32  ;;  %v6118_v19 = vcombine.low %v10613_v12, %v6101_v10  ;;  %v6119_v29 = vcombine.high %v10613_v12, %v6101_v10 }
 0x3bd   : > { %v6638_v49 = vrot.slane %v6630_v3, %v9080_v36  ;;  %v6645_v24 = vrot.slane %v6631_v33, %v9080_v36  ;;  %v4251_v9 = vcombine.high %v11512_v59, %v10683_v1  ;;  %v6110_v58 = vrot.slane %v6102_v16, %v9102_v57  ;;  %v10739_v16 = vpop.permute.xlu1 %3332 }
 0x3be   : > { %v6117_v15 = vrot.slane %v6103_v30, %v9102_v57  ;;  %v6126_v18 = vrot.slane %v6118_v19, %v9102_v57  ;;  %v6133_v25 = vrot.slane %v6119_v29, %v9102_v57  ;;  %v3363_v30 = vpop.permute.xlu0 %3362  ;;  %v3722_v53 = vcombine.low %v10599_v31, %v10721_v0 }
 0x3bf   : > { %v6646_v60 = vcombine.low %v6622_v20, %v6638_v49  ;;  %v6647_v12 = vcombine.high %v6622_v20, %v6638_v49  ;;  %v6662_v44 = vcombine.low %v6629_v56, %v6645_v24  ;;  %v6663_v28 = vcombine.high %v6629_v56, %v6645_v24 }
 0x3c0   : > { %v7158_v45 = vcombine.low %v6110_v58, %v6117_v15  ;;  %v8395_v55 = vcombine.high %v6110_v58, %v6117_v15  ;;  %v7174_v38 = vcombine.low %v6126_v18, %v6133_v25  ;;  %v8396_v50 = vcombine.high %v6126_v18, %v6133_v25 }
 0x3c1   : > { %v6654_v5 = vrot.slane %v6646_v60, %v9102_v57  ;;  %v6661_v37 = vrot.slane %v6647_v12, %v9102_v57  ;;  %v6670_v42 = vrot.slane %v6662_v44, %v9102_v57  ;;  %v6677_v26 = vrot.slane %v6663_v28, %v9102_v57 }
 0x3c2   : > { %v7165_v51 = vrot.slane %v7158_v45, %v9080_v36  ;;  %v7173_v52 = vrot.slane %v8395_v55, %v9080_v36  ;;  %v7181_v63 = vrot.slane %v7174_v38, %v9080_v36  ;;  %v7189_v34 = vrot.slane %v8396_v50, %v9080_v36 }
 0x3c3   : > { %v7702_v7 = vcombine.low %v6654_v5, %v6661_v37  ;;  %v8411_v8 = vcombine.high %v6654_v5, %v6661_v37  ;;  %v7718_v46 = vcombine.low %v6670_v42, %v6677_v26  ;;  %v8412_v62 = vcombine.high %v6670_v42, %v6677_v26 }
 0x3c4   : > { %v7190_v54 = vcombine.low %v7165_v51, %v7173_v52  ;;  %v7191_v40 = vcombine.high %v7165_v51, %v7173_v52  ;;  %v7206_v43 = vcombine.low %v7181_v63, %v7189_v34  ;;  %v7207_v2 = vcombine.high %v7181_v63, %v7189_v34 }
 0x3c5   : > { %v7709_v39 = vrot.slane %v7702_v7, %v9080_v36  ;;  %v7717_v13 = vrot.slane %v8411_v8, %v9080_v36  ;;  %v7725_v32 = vrot.slane %v7718_v46, %v9080_v36  ;;  %v7733_v10 = vrot.slane %v8412_v62, %v9080_v36 }
 0x3c6   : > { %v7198_v3 = vrot.slane %v7190_v54, %v9102_v57  ;;  %v7205_v33 = vrot.slane %v7191_v40, %v9102_v57  ;;  %v7214_v20 = vrot.slane %v7206_v43, %v9102_v57  ;;  %v7221_v56 = vrot.slane %v7207_v2, %v9102_v57 }
 0x3c7   : > { %v7734_v19 = vcombine.low %v7709_v39, %v7717_v13  ;;  %v7735_v29 = vcombine.high %v7709_v39, %v7717_v13  ;;  %v7750_v49 = vcombine.low %v7725_v32, %v7733_v10  ;;  %v7751_v24 = vcombine.high %v7725_v32, %v7733_v10 }
 0x3c8   : > { %v7222_v58 = vcombine.low %v7198_v3, %v7214_v20  ;;  %v7223_v15 = vcombine.high %v7198_v3, %v7214_v20  ;;  %v7224_v18 = vcombine.low %v7205_v33, %v7221_v56  ;;  %v7225_v25 = vcombine.high %v7205_v33, %v7221_v56 }
 0x3c9   : > { %v7742_v60 = vrot.slane %v7734_v19, %v9102_v57  ;;  %v7749_v12 = vrot.slane %v7735_v29, %v9102_v57  ;;  %v7758_v44 = vrot.slane %v7750_v49, %v9102_v57  ;;  %v7765_v28 = vrot.slane %v7751_v24, %v9102_v57 }
 0x3ca   : > { %8045 = vst.msk [vmem:[%s10285_s17 + $0x18] sm:$0xff] %vm3177_vm1, %v7222_v58  ;;  %8061 = vst.msk [vmem:[%s10285_s17 + $0x98] sm:$0xff] %vm3177_vm1, %v7223_v15  ;;  %v3714_v45 = vrot.slane %v3706_v17, %v9080_v36  ;;  %v3721_v55 = vrot.slane %v3707_v23, %v9080_v36  ;;  %v3774_v38 = vcombine.low %v9633_v47, %v10719_v48  ;;  %v10777_v23 = vpop.permute.xlu1 %3348 }
 0x3cb   : > { %8077 = vst.msk [vmem:[%s10285_s17 + $0x118] sm:$0xff] %vm3177_vm1, %v7224_v18  ;;  %8093 = vst.msk [vmem:[%s10285_s17 + $0x198] sm:$0xff] %vm3177_vm1, %v7225_v25  ;;  %v3775_v50 = vcombine.high %v9633_v47, %v10719_v48  ;;  %v7766_v5 = vcombine.low %v7742_v60, %v7758_v44  ;;  %v7767_v37 = vcombine.high %v7742_v60, %v7758_v44  ;;  %v10779_v48 = vpop.permute.xlu0 %5714 }
 0x3cc   : > { %v7768_v42 = vcombine.low %v7749_v12, %v7765_v28  ;;  %v7769_v26 = vcombine.high %v7749_v12, %v7765_v28  ;;  %v4258_v17 = vrot.slane %v4250_v41, %v9080_v36  ;;  %v4265_v35 = vrot.slane %v4251_v9, %v9080_v36 }
 0x3cd   : > { %v3723_v47 = vcombine.high %v10599_v31, %v10721_v0  ;;  %8053 = vst.msk [vmem:[%s10285_s17 + $0x58] sm:$0xff] %vm3177_vm1, %v7766_v5  ;;  %8069 = vst.msk [vmem:[%s10285_s17 + $0xd8] sm:$0xff] %vm3177_vm1, %v7767_v37  ;;  %v10790_v1 = vrot.slane %v3774_v38, %v9080_v36  ;;  %v10793_v59 = vrot.slane %v3775_v50, %v9080_v36 }
 0x3ce   : > { %8085 = vst.msk [vmem:[%s10285_s17 + $0x158] sm:$0xff] %vm3177_vm1, %v7768_v42  ;;  %8101 = vst.msk [vmem:[%s10285_s17 + $0x1d8] sm:$0xff] %vm3177_vm1, %v7769_v26  ;;  %v4266_v31 = vcombine.low %v10635_v6, %v3363_v30  ;;  %v4267_v41 = vcombine.high %v10635_v6, %v3363_v30  ;;  %v3730_v9 = vrot.slane %v3722_v53, %v9080_v36  ;;  %v10813_v33 = vpop.permute.xlu1 %3364 }
 0x3cf   : > { %v3737_v0 = vrot.slane %v3723_v47, %v9080_v36  ;;  %v4318_v51 = vcombine.low %v9649_v11, %v10739_v16  ;;  %v4319_v52 = vcombine.high %v9649_v11, %v10739_v16  ;;  %v3790_v7 = vcombine.low %v10649_v61, %v10777_v23  ;;  %v10815_v20 = vpop.permute.xlu0 %5730 }
 0x3d0   : > { %v4274_v63 = vrot.slane %v4266_v31, %v9080_v36  ;;  %v4281_v34 = vrot.slane %v4267_v41, %v9080_v36  ;;  %v3791_v6 = vcombine.high %v10649_v61, %v10777_v23  ;;  %v3738_v8 = vcombine.low %v3714_v45, %v3730_v9 }
 0x3d1   : > { %v3739_v46 = vcombine.high %v3714_v45, %v3730_v9  ;;  %v3754_v62 = vcombine.low %v3721_v55, %v3737_v0  ;;  %v3755_v54 = vcombine.high %v3721_v55, %v3737_v0  ;;  %v4333_v61 = vrot.slane %v4319_v52, %v9080_v36 }
 0x3d2   : > { %v4282_v40 = vcombine.low %v4258_v17, %v4274_v63  ;;  %v4283_v43 = vcombine.high %v4258_v17, %v4274_v63  ;;  %v4298_v2 = vcombine.low %v4265_v35, %v4281_v34  ;;  %v4299_v39 = vcombine.high %v4265_v35, %v4281_v34  ;;  %v10829_v53 = vpop.permute.xlu1 %5716 }
 0x3d3   : > { %v3746_v13 = vrot.slane %v3738_v8, %v9102_v57  ;;  %v3753_v32 = vrot.slane %v3739_v46, %v9102_v57  ;;  %v3762_v10 = vrot.slane %v3754_v62, %v9102_v57  ;;  %v3769_v3 = vrot.slane %v3755_v54, %v9102_v57  ;;  %v10831_v47 = vpop.permute.xlu0 %5746 }
 0x3d4   : > { %v4290_v56 = vrot.slane %v4282_v40, %v9102_v57  ;;  %v4297_v30 = vrot.slane %v4283_v43, %v9102_v57  ;;  %v4306_v19 = vrot.slane %v4298_v2, %v9102_v57  ;;  %v4313_v29 = vrot.slane %v4299_v39, %v9102_v57 }
 0x3d5   : > { %v4794_v49 = vcombine.low %v3746_v13, %v3753_v32  ;;  %v8365_v24 = vcombine.high %v3746_v13, %v3753_v32  ;;  %v4810_v58 = vcombine.low %v3762_v10, %v3769_v3  ;;  %v8366_v15 = vcombine.high %v3762_v10, %v3769_v3 }
 0x3d6   : > { %v5338_v18 = vcombine.low %v4290_v56, %v4297_v30  ;;  %v8381_v25 = vcombine.high %v4290_v56, %v4297_v30  ;;  %v5354_v60 = vcombine.low %v4306_v19, %v4313_v29  ;;  %v8382_v12 = vcombine.high %v4306_v19, %v4313_v29 }
 0x3d7   : > { %v4801_v44 = vrot.slane %v4794_v49, %v9080_v36  ;;  %v4809_v28 = vrot.slane %v8365_v24, %v9080_v36  ;;  %v4817_v45 = vrot.slane %v4810_v58, %v9080_v36  ;;  %v4825_v55 = vrot.slane %v8366_v15, %v9080_v36  ;;  %v10861_v58 = vpop.permute.xlu1 %5732  ;;  %v10863_v15 = vpop.permute.xlu0 %5762 }
 0x3d8   : > { %v5345_v38 = vrot.slane %v5338_v18, %v9080_v36  ;;  %v5353_v50 = vrot.slane %v8381_v25, %v9080_v36  ;;  %v5361_v5 = vrot.slane %v5354_v60, %v9080_v36  ;;  %v5369_v37 = vrot.slane %v8382_v12, %v9080_v36  ;;  %v11514_v25 = vld [vmem:[#allocation12_spill] sm:$0xff] }
 0x3d9   : > { %v4826_v42 = vcombine.low %v4801_v44, %v4809_v28  ;;  %v4827_v26 = vcombine.high %v4801_v44, %v4809_v28  ;;  %v4842_v17 = vcombine.low %v4817_v45, %v4825_v55  ;;  %v4843_v35 = vcombine.high %v4817_v45, %v4825_v55 }
 0x3da   : > { %v5370_v31 = vcombine.low %v5345_v38, %v5353_v50  ;;  %v5371_v41 = vcombine.high %v5345_v38, %v5353_v50  ;;  %v5386_v9 = vcombine.low %v5361_v5, %v5369_v37  ;;  %v5387_v0 = vcombine.high %v5361_v5, %v5369_v37 }
 0x3db   : > { %v4834_v63 = vrot.slane %v4826_v42, %v9102_v57  ;;  %v4841_v34 = vrot.slane %v4827_v26, %v9102_v57  ;;  %v4850_v8 = vrot.slane %v4842_v17, %v9102_v57  ;;  %v4857_v46 = vrot.slane %v4843_v35, %v9102_v57  ;;  %v10899_v17 = vpop.permute.xlu1 %5748  ;;  %v10901_v35 = vpop.permute.xlu0 %5778 }
 0x3dc   : > { %v5378_v62 = vrot.slane %v5370_v31, %v9102_v57  ;;  %v5385_v54 = vrot.slane %v5371_v41, %v9102_v57  ;;  %v5394_v40 = vrot.slane %v5386_v9, %v9102_v57  ;;  %v5401_v43 = vrot.slane %v5387_v0, %v9102_v57 }
 0x3dd   : > { %v4858_v2 = vcombine.low %v4834_v63, %v4850_v8  ;;  %v4859_v39 = vcombine.high %v4834_v63, %v4850_v8  ;;  %v4860_v13 = vcombine.low %v4841_v34, %v4857_v46  ;;  %v4861_v32 = vcombine.high %v4841_v34, %v4857_v46 }
 0x3de   : > { %v5402_v10 = vcombine.low %v5378_v62, %v5394_v40  ;;  %v5403_v3 = vcombine.high %v5378_v62, %v5394_v40  ;;  %v5404_v56 = vcombine.low %v5385_v54, %v5401_v43  ;;  %v5405_v30 = vcombine.high %v5385_v54, %v5401_v43 }
 0x3df   : > { %5614 = vst.msk [vmem:[%s10071_s14 + $0x20] sm:$0xff] %vm3177_vm1, %v4858_v2  ;;  %5630 = vst.msk [vmem:[%s10071_s14 + $0xa0] sm:$0xff] %vm3177_vm1, %v4859_v39  ;;  %v3798_v19 = vrot.slane %v3790_v7, %v9080_v36  ;;  %v3805_v29 = vrot.slane %v3791_v6, %v9080_v36  ;;  %v4334_v49 = vcombine.low %v10681_v14, %v10813_v33 }
 0x3e0   : > { %5646 = vst.msk [vmem:[%s10071_s14 + $0x120] sm:$0xff] %vm3177_vm1, %v4860_v13  ;;  %5662 = vst.msk [vmem:[%s10071_s14 + $0x1a0] sm:$0xff] %vm3177_vm1, %v4861_v32  ;;  %v4335_v24 = vcombine.high %v10681_v14, %v10813_v33  ;;  %v4326_v7 = vrot.slane %v4318_v51, %v9080_v36  ;;  %v11513_v14 = vld [vmem:[#allocation11_spill] sm:$0xff]  ;;  %v6682_v60 = vcombine.low %v11514_v25, %v10863_v15 }
 0x3e1   : > { %5622 = vst.msk [vmem:[%s10071_s14 + $0x60] sm:$0xff] %vm3177_vm1, %v5402_v10  ;;  %5638 = vst.msk [vmem:[%s10071_s14 + $0xe0] sm:$0xff] %vm3177_vm1, %v5403_v3  ;;  %v6138_v23 = vcombine.low %v11513_v14, %v10831_v47  ;;  %v6139_v6 = vcombine.high %v11513_v14, %v10831_v47  ;;  %v3806_v51 = vcombine.low %v10790_v1, %v3798_v19 }
 0x3e2   : > { %5654 = vst.msk [vmem:[%s10071_s14 + $0x160] sm:$0xff] %vm3177_vm1, %v5404_v56  ;;  %5670 = vst.msk [vmem:[%s10071_s14 + $0x1e0] sm:$0xff] %vm3177_vm1, %v5405_v30  ;;  %v3807_v33 = vcombine.high %v10790_v1, %v3798_v19  ;;  %v3822_v11 = vcombine.low %v10793_v59, %v3805_v29  ;;  %v3823_v16 = vcombine.high %v10793_v59, %v3805_v29 }
 0x3e3   : > { %v4342_v52 = vrot.slane %v4334_v49, %v9080_v36  ;;  %v4349_v18 = vrot.slane %v4335_v24, %v9080_v36  ;;  %v6683_v12 = vcombine.high %v11514_v25, %v10863_v15  ;;  %v3814_v44 = vrot.slane %v3806_v51, %v9102_v57 }
 0x3e4   : > { %v3821_v28 = vrot.slane %v3807_v33, %v9102_v57  ;;  %v3830_v1 = vrot.slane %v3822_v11, %v9102_v57  ;;  %v3837_v45 = vrot.slane %v3823_v16, %v9102_v57  ;;  %v6154_v14 = vcombine.low %v10779_v48, %v10901_v35 }
 0x3e5   : > { %v4350_v55 = vcombine.low %v4326_v7, %v4342_v52  ;;  %v4351_v59 = vcombine.high %v4326_v7, %v4342_v52  ;;  %v4366_v38 = vcombine.low %v4333_v61, %v4349_v18  ;;  %v4367_v50 = vcombine.high %v4333_v61, %v4349_v18  ;;  %v10919_v7 = vpop.permute.xlu1 %5764  ;;  %v5795_v61 = vpop.permute.xlu0 %5794 }
 0x3e6   : > { %v4862_v5 = vcombine.low %v3814_v44, %v3821_v28  ;;  %v8367_v37 = vcombine.high %v3814_v44, %v3821_v28  ;;  %v4878_v42 = vcombine.low %v3830_v1, %v3837_v45  ;;  %v8368_v26 = vcombine.high %v3830_v1, %v3837_v45 }
 0x3e7   : > { %v4358_v31 = vrot.slane %v4350_v55, %v9102_v57  ;;  %v4365_v41 = vrot.slane %v4351_v59, %v9102_v57  ;;  %v4374_v9 = vrot.slane %v4366_v38, %v9102_v57  ;;  %v4381_v0 = vrot.slane %v4367_v50, %v9102_v57 }
 0x3e8   : > { %v4869_v63 = vrot.slane %v4862_v5, %v9080_v36  ;;  %v4877_v34 = vrot.slane %v8367_v37, %v9080_v36  ;;  %v4885_v8 = vrot.slane %v4878_v42, %v9080_v36  ;;  %v4893_v46 = vrot.slane %v8368_v26, %v9080_v36 }
 0x3e9   : > { %v5406_v62 = vcombine.low %v4358_v31, %v4365_v41  ;;  %v8383_v54 = vcombine.high %v4358_v31, %v4365_v41  ;;  %v5422_v40 = vcombine.low %v4374_v9, %v4381_v0  ;;  %v8384_v43 = vcombine.high %v4374_v9, %v4381_v0  ;;  %v11515_v9 = vld [vmem:[#allocation13_spill] sm:$0xff] }
 0x3ea   : > { %v4894_v2 = vcombine.low %v4869_v63, %v4877_v34  ;;  %v4895_v39 = vcombine.high %v4869_v63, %v4877_v34  ;;  %v4910_v13 = vcombine.low %v4885_v8, %v4893_v46  ;;  %v4911_v32 = vcombine.high %v4885_v8, %v4893_v46 }
 0x3eb   : > { %v5413_v10 = vrot.slane %v5406_v62, %v9080_v36  ;;  %v5421_v3 = vrot.slane %v8383_v54, %v9080_v36  ;;  %v5429_v56 = vrot.slane %v5422_v40, %v9080_v36  ;;  %v5437_v30 = vrot.slane %v8384_v43, %v9080_v36 }
 0x3ec   : > { %v4902_v19 = vrot.slane %v4894_v2, %v9102_v57  ;;  %v4909_v29 = vrot.slane %v4895_v39, %v9102_v57  ;;  %v4918_v49 = vrot.slane %v4910_v13, %v9102_v57  ;;  %v4925_v24 = vrot.slane %v4911_v32, %v9102_v57 }
 0x3ed   : > { %v5438_v51 = vcombine.low %v5413_v10, %v5421_v3  ;;  %v5439_v33 = vcombine.high %v5413_v10, %v5421_v3  ;;  %v5454_v11 = vcombine.low %v5429_v56, %v5437_v30  ;;  %v5455_v16 = vcombine.high %v5429_v56, %v5437_v30 }
 0x3ee   : > { %v4926_v52 = vcombine.low %v4902_v19, %v4918_v49  ;;  %v4927_v18 = vcombine.high %v4902_v19, %v4918_v49  ;;  %v4928_v44 = vcombine.low %v4909_v29, %v4925_v24  ;;  %v4929_v28 = vcombine.high %v4909_v29, %v4925_v24 }
 0x3ef   : > { %v5446_v1 = vrot.slane %v5438_v51, %v9102_v57  ;;  %v5453_v45 = vrot.slane %v5439_v33, %v9102_v57  ;;  %v5462_v55 = vrot.slane %v5454_v11, %v9102_v57  ;;  %v5469_v59 = vrot.slane %v5455_v16, %v9102_v57 }
 0x3f0   : > { %5615 = vst.msk [vmem:[%s10071_s14 + $0x28] sm:$0xff] %vm3177_vm1, %v4926_v52  ;;  %5631 = vst.msk [vmem:[%s10071_s14 + $0xa8] sm:$0xff] %vm3177_vm1, %v4927_v18  ;;  %v6146_v38 = vrot.slane %v6138_v23, %v9080_v36  ;;  %v6153_v50 = vrot.slane %v6139_v6, %v9080_v36  ;;  %v6206_v5 = vcombine.low %v9681_v27, %v10899_v17  ;;  %v10957_v6 = vpop.permute.xlu1 %5780 }
 0x3f1   : > { %5647 = vst.msk [vmem:[%s10071_s14 + $0x128] sm:$0xff] %vm3177_vm1, %v4928_v44  ;;  %5663 = vst.msk [vmem:[%s10071_s14 + $0x1a8] sm:$0xff] %vm3177_vm1, %v4929_v28  ;;  %v6207_v37 = vcombine.high %v9681_v27, %v10899_v17  ;;  %v5470_v42 = vcombine.low %v5446_v1, %v5462_v55  ;;  %v5471_v26 = vcombine.high %v5446_v1, %v5462_v55  ;;  %v10959_v17 = vpop.permute.xlu0 %3286 }
 0x3f2   : > { %v5472_v31 = vcombine.low %v5453_v45, %v5469_v59  ;;  %v5473_v41 = vcombine.high %v5453_v45, %v5469_v59  ;;  %v6690_v23 = vrot.slane %v6682_v60, %v9080_v36  ;;  %v6697_v47 = vrot.slane %v6683_v12, %v9080_v36 }
 0x3f3   : > { %v6155_v27 = vcombine.high %v10779_v48, %v10901_v35  ;;  %5623 = vst.msk [vmem:[%s10071_s14 + $0x68] sm:$0xff] %vm3177_vm1, %v5470_v42  ;;  %5639 = vst.msk [vmem:[%s10071_s14 + $0xe8] sm:$0xff] %vm3177_vm1, %v5471_v26  ;;  %v10970_v15 = vrot.slane %v6206_v5, %v9080_v36  ;;  %v10973_v25 = vrot.slane %v6207_v37, %v9080_v36 }
 0x3f4   : > { %5655 = vst.msk [vmem:[%s10071_s14 + $0x168] sm:$0xff] %vm3177_vm1, %v5472_v31  ;;  %5671 = vst.msk [vmem:[%s10071_s14 + $0x1e8] sm:$0xff] %vm3177_vm1, %v5473_v41  ;;  %v6698_v48 = vcombine.low %v10815_v20, %v5795_v61  ;;  %v6699_v60 = vcombine.high %v10815_v20, %v5795_v61  ;;  %v6162_v12 = vrot.slane %v6154_v14, %v9080_v36  ;;  %v10993_v19 = vpop.permute.xlu1 %5796 }
 0x3f5   : > { %v6169_v35 = vrot.slane %v6155_v27, %v9080_v36  ;;  %v6750_v0 = vcombine.low %v11515_v9, %v10919_v7  ;;  %v6751_v63 = vcombine.high %v11515_v9, %v10919_v7  ;;  %v6222_v46 = vcombine.low %v10829_v53, %v10957_v6  ;;  %v10995_v29 = vpop.permute.xlu0 %3302 }
 0x3f6   : > { %v6706_v34 = vrot.slane %v6698_v48, %v9080_v36  ;;  %v6713_v8 = vrot.slane %v6699_v60, %v9080_v36  ;;  %v6223_v20 = vcombine.high %v10829_v53, %v10957_v6  ;;  %v6170_v62 = vcombine.low %v6146_v38, %v6162_v12 }
 0x3f7   : > { %v6171_v54 = vcombine.high %v6146_v38, %v6162_v12  ;;  %v6186_v40 = vcombine.low %v6153_v50, %v6169_v35  ;;  %v6187_v43 = vcombine.high %v6153_v50, %v6169_v35  ;;  %v6765_v53 = vrot.slane %v6751_v63, %v9080_v36 }
 0x3f8   : > { %v6714_v2 = vcombine.low %v6690_v23, %v6706_v34  ;;  %v6715_v39 = vcombine.high %v6690_v23, %v6706_v34  ;;  %v6730_v13 = vcombine.low %v6697_v47, %v6713_v8  ;;  %v6731_v32 = vcombine.high %v6697_v47, %v6713_v8  ;;  %v11009_v47 = vpop.permute.xlu1 %3288 }
 0x3f9   : > { %v6178_v10 = vrot.slane %v6170_v62, %v9102_v57  ;;  %v6185_v3 = vrot.slane %v6171_v54, %v9102_v57  ;;  %v6194_v56 = vrot.slane %v6186_v40, %v9102_v57  ;;  %v6201_v30 = vrot.slane %v6187_v43, %v9102_v57  ;;  %v11011_v14 = vpop.permute.xlu0 %3318 }
 0x3fa   : > { %v6722_v49 = vrot.slane %v6714_v2, %v9102_v57  ;;  %v6729_v24 = vrot.slane %v6715_v39, %v9102_v57  ;;  %v6738_v61 = vrot.slane %v6730_v13, %v9102_v57  ;;  %v6745_v51 = vrot.slane %v6731_v32, %v9102_v57 }
 0x3fb   : > { %v7226_v33 = vcombine.low %v6178_v10, %v6185_v3  ;;  %v8397_v11 = vcombine.high %v6178_v10, %v6185_v3  ;;  %v7242_v16 = vcombine.low %v6194_v56, %v6201_v30  ;;  %v8398_v52 = vcombine.high %v6194_v56, %v6201_v30 }
 0x3fc   : > { %v7770_v18 = vcombine.low %v6722_v49, %v6729_v24  ;;  %v8413_v44 = vcombine.high %v6722_v49, %v6729_v24  ;;  %v7786_v28 = vcombine.low %v6738_v61, %v6745_v51  ;;  %v8414_v1 = vcombine.high %v6738_v61, %v6745_v51 }
 0x3fd   : > { %v7233_v45 = vrot.slane %v7226_v33, %v9080_v36  ;;  %v7241_v55 = vrot.slane %v8397_v11, %v9080_v36  ;;  %v7249_v59 = vrot.slane %v7242_v16, %v9080_v36  ;;  %v7257_v38 = vrot.slane %v8398_v52, %v9080_v36  ;;  %v11041_v11 = vpop.permute.xlu1 %3304  ;;  %v11043_v16 = vpop.permute.xlu0 %3334 }
 0x3fe   : > { %v7777_v50 = vrot.slane %v7770_v18, %v9080_v36  ;;  %v7785_v5 = vrot.slane %v8413_v44, %v9080_v36  ;;  %v7793_v37 = vrot.slane %v7786_v28, %v9080_v36  ;;  %v7801_v42 = vrot.slane %v8414_v1, %v9080_v36  ;;  %v11517_v18 = vld [vmem:[#allocation15_spill] sm:$0xff] }
 0x3ff   : > { %v7258_v26 = vcombine.low %v7233_v45, %v7241_v55  ;;  %v7259_v31 = vcombine.high %v7233_v45, %v7241_v55  ;;  %v7274_v41 = vcombine.low %v7249_v59, %v7257_v38  ;;  %v7275_v23 = vcombine.high %v7249_v59, %v7257_v38 }
 0x400   : > { %v7802_v27 = vcombine.low %v7777_v50, %v7785_v5  ;;  %v7803_v48 = vcombine.high %v7777_v50, %v7785_v5  ;;  %v7818_v60 = vcombine.low %v7793_v37, %v7801_v42  ;;  %v7819_v12 = vcombine.high %v7793_v37, %v7801_v42 }
 0x401   : > { %v7266_v35 = vrot.slane %v7258_v26, %v9102_v57  ;;  %v7273_v34 = vrot.slane %v7259_v31, %v9102_v57  ;;  %v7282_v8 = vrot.slane %v7274_v41, %v9102_v57  ;;  %v7289_v62 = vrot.slane %v7275_v23, %v9102_v57  ;;  %v11079_v31 = vpop.permute.xlu1 %3320  ;;  %v11081_v41 = vpop.permute.xlu0 %3350 }
 0x402   : > { %v7810_v54 = vrot.slane %v7802_v27, %v9102_v57  ;;  %v7817_v40 = vrot.slane %v7803_v48, %v9102_v57  ;;  %v7826_v43 = vrot.slane %v7818_v60, %v9102_v57  ;;  %v7833_v2 = vrot.slane %v7819_v12, %v9102_v57 }
 0x403   : > { %v7290_v39 = vcombine.low %v7266_v35, %v7282_v8  ;;  %v7291_v13 = vcombine.high %v7266_v35, %v7282_v8  ;;  %v7292_v32 = vcombine.low %v7273_v34, %v7289_v62  ;;  %v7293_v10 = vcombine.high %v7273_v34, %v7289_v62 }
 0x404   : > { %v7834_v3 = vcombine.low %v7810_v54, %v7826_v43  ;;  %v7835_v56 = vcombine.high %v7810_v54, %v7826_v43  ;;  %v7836_v30 = vcombine.low %v7817_v40, %v7833_v2  ;;  %v7837_v49 = vcombine.high %v7817_v40, %v7833_v2 }
 0x405   : > { %8046 = vst.msk [vmem:[%s10285_s17 + $0x20] sm:$0xff] %vm3177_vm1, %v7290_v39  ;;  %8062 = vst.msk [vmem:[%s10285_s17 + $0xa0] sm:$0xff] %vm3177_vm1, %v7291_v13  ;;  %v6230_v24 = vrot.slane %v6222_v46, %v9080_v36  ;;  %v6237_v61 = vrot.slane %v6223_v20, %v9080_v36  ;;  %v6766_v51 = vcombine.low %v10861_v58, %v10993_v19 }
 0x406   : > { %8078 = vst.msk [vmem:[%s10285_s17 + $0x120] sm:$0xff] %vm3177_vm1, %v7292_v32  ;;  %8094 = vst.msk [vmem:[%s10285_s17 + $0x1a0] sm:$0xff] %vm3177_vm1, %v7293_v10  ;;  %v6767_v33 = vcombine.high %v10861_v58, %v10993_v19  ;;  %v6758_v46 = vrot.slane %v6750_v0, %v9080_v36  ;;  %v11516_v58 = vld [vmem:[#allocation14_spill] sm:$0xff]  ;;  %v4386_v44 = vcombine.low %v11517_v18, %v11043_v16 }
 0x407   : > { %8054 = vst.msk [vmem:[%s10285_s17 + $0x60] sm:$0xff] %vm3177_vm1, %v7834_v3  ;;  %8070 = vst.msk [vmem:[%s10285_s17 + $0xe0] sm:$0xff] %vm3177_vm1, %v7835_v56  ;;  %v3842_v6 = vcombine.low %v11516_v58, %v11011_v14  ;;  %v3843_v20 = vcombine.high %v11516_v58, %v11011_v14  ;;  %v6238_v0 = vcombine.low %v10970_v15, %v6230_v24 }
 0x408   : > { %8086 = vst.msk [vmem:[%s10285_s17 + $0x160] sm:$0xff] %vm3177_vm1, %v7836_v30  ;;  %8102 = vst.msk [vmem:[%s10285_s17 + $0x1e0] sm:$0xff] %vm3177_vm1, %v7837_v49  ;;  %v6239_v19 = vcombine.high %v10970_v15, %v6230_v24  ;;  %v6254_v7 = vcombine.low %v10973_v25, %v6237_v61  ;;  %v6255_v9 = vcombine.high %v10973_v25, %v6237_v61 }
 0x409   : > { %v6774_v63 = vrot.slane %v6766_v51, %v9080_v36  ;;  %v6781_v52 = vrot.slane %v6767_v33, %v9080_v36  ;;  %v4387_v28 = vcombine.high %v11517_v18, %v11043_v16  ;;  %v6246_v1 = vrot.slane %v6238_v0, %v9102_v57  ;;  %v11099_v33 = vpop.permute.xlu1 %3336 }
 0x40a   : > { %v6253_v45 = vrot.slane %v6239_v19, %v9102_v57  ;;  %v6262_v15 = vrot.slane %v6254_v7, %v9102_v57  ;;  %v6269_v55 = vrot.slane %v6255_v9, %v9102_v57  ;;  %v3858_v58 = vcombine.low %v10959_v17, %v11081_v41 }
 0x40b   : > { %v6782_v59 = vcombine.low %v6758_v46, %v6774_v63  ;;  %v6783_v25 = vcombine.high %v6758_v46, %v6774_v63  ;;  %v6798_v38 = vcombine.low %v6765_v53, %v6781_v52  ;;  %v6799_v50 = vcombine.high %v6765_v53, %v6781_v52  ;;  %v3367_v46 = vpop.permute.xlu0 %3366 }
 0x40c   : > { %v7294_v5 = vcombine.low %v6246_v1, %v6253_v45  ;;  %v8399_v37 = vcombine.high %v6246_v1, %v6253_v45  ;;  %v7310_v42 = vcombine.low %v6262_v15, %v6269_v55  ;;  %v8400_v26 = vcombine.high %v6262_v15, %v6269_v55 }
 0x40d   : > { %v6790_v23 = vrot.slane %v6782_v59, %v9102_v57  ;;  %v6797_v27 = vrot.slane %v6783_v25, %v9102_v57  ;;  %v6806_v48 = vrot.slane %v6798_v38, %v9102_v57  ;;  %v6813_v60 = vrot.slane %v6799_v50, %v9102_v57 }
 0x40e   : > { %v7301_v12 = vrot.slane %v7294_v5, %v9080_v36  ;;  %v7309_v35 = vrot.slane %v8399_v37, %v9080_v36  ;;  %v7317_v34 = vrot.slane %v7310_v42, %v9080_v36  ;;  %v7325_v8 = vrot.slane %v8400_v26, %v9080_v36 }
 0x40f   : > { %v7838_v62 = vcombine.low %v6790_v23, %v6797_v27  ;;  %v8415_v54 = vcombine.high %v6790_v23, %v6797_v27  ;;  %v7854_v40 = vcombine.low %v6806_v48, %v6813_v60  ;;  %v8416_v43 = vcombine.high %v6806_v48, %v6813_v60 }
 0x410   : > { %v7326_v2 = vcombine.low %v7301_v12, %v7309_v35  ;;  %v7327_v39 = vcombine.high %v7301_v12, %v7309_v35  ;;  %v7342_v13 = vcombine.low %v7317_v34, %v7325_v8  ;;  %v7343_v32 = vcombine.high %v7317_v34, %v7325_v8 }
 0x411   : > { %v7845_v10 = vrot.slane %v7838_v62, %v9080_v36  ;;  %v7853_v3 = vrot.slane %v8415_v54, %v9080_v36  ;;  %v7861_v56 = vrot.slane %v7854_v40, %v9080_v36  ;;  %v7869_v30 = vrot.slane %v8416_v43, %v9080_v36 }
 0x412   : > { %v7334_v49 = vrot.slane %v7326_v2, %v9102_v57  ;;  %v7341_v24 = vrot.slane %v7327_v39, %v9102_v57  ;;  %v7350_v61 = vrot.slane %v7342_v13, %v9102_v57  ;;  %v7357_v51 = vrot.slane %v7343_v32, %v9102_v57 }
 0x413   : > { %v7870_v53 = vcombine.low %v7845_v10, %v7853_v3  ;;  %v7871_v0 = vcombine.high %v7845_v10, %v7853_v3  ;;  %v7886_v19 = vcombine.low %v7861_v56, %v7869_v30  ;;  %v7887_v7 = vcombine.high %v7861_v56, %v7869_v30 }
 0x414   : > { %v7358_v9 = vcombine.low %v7334_v49, %v7350_v61  ;;  %v7359_v63 = vcombine.high %v7334_v49, %v7350_v61  ;;  %v7360_v52 = vcombine.low %v7341_v24, %v7357_v51  ;;  %v7361_v1 = vcombine.high %v7341_v24, %v7357_v51 }
 0x415   : > { %v7878_v45 = vrot.slane %v7870_v53, %v9102_v57  ;;  %v7885_v15 = vrot.slane %v7871_v0, %v9102_v57  ;;  %v7894_v55 = vrot.slane %v7886_v19, %v9102_v57  ;;  %v7901_v59 = vrot.slane %v7887_v7, %v9102_v57 }
 0x416   : > { %8047 = vst.msk [vmem:[%s10285_s17 + $0x28] sm:$0xff] %vm3177_vm1, %v7358_v9  ;;  %8063 = vst.msk [vmem:[%s10285_s17 + $0xa8] sm:$0xff] %vm3177_vm1, %v7359_v63  ;;  %v3850_v25 = vrot.slane %v3842_v6, %v9080_v36  ;;  %v3857_v38 = vrot.slane %v3843_v20, %v9080_v36  ;;  %v3910_v50 = vcombine.low %v9855_v22, %v11079_v31  ;;  %v11137_v20 = vpop.permute.xlu1 %3352 }
 0x417   : > { %8079 = vst.msk [vmem:[%s10285_s17 + $0x128] sm:$0xff] %vm3177_vm1, %v7360_v52  ;;  %8095 = vst.msk [vmem:[%s10285_s17 + $0x1a8] sm:$0xff] %vm3177_vm1, %v7361_v1  ;;  %v3911_v5 = vcombine.high %v9855_v22, %v11079_v31  ;;  %v7902_v37 = vcombine.low %v7878_v45, %v7894_v55  ;;  %v7903_v42 = vcombine.high %v7878_v45, %v7894_v55  ;;  %v11139_v31 = vpop.permute.xlu0 %5718 }
 0x418   : > { %v7904_v26 = vcombine.low %v7885_v15, %v7901_v59  ;;  %v7905_v23 = vcombine.high %v7885_v15, %v7901_v59  ;;  %v4394_v6 = vrot.slane %v4386_v44, %v9080_v36  ;;  %v4401_v14 = vrot.slane %v4387_v28, %v9080_v36 }
 0x419   : > { %v3859_v22 = vcombine.high %v10959_v17, %v11081_v41  ;;  %8055 = vst.msk [vmem:[%s10285_s17 + $0x68] sm:$0xff] %vm3177_vm1, %v7902_v37  ;;  %8071 = vst.msk [vmem:[%s10285_s17 + $0xe8] sm:$0xff] %vm3177_vm1, %v7903_v42  ;;  %v11150_v16 = vrot.slane %v3910_v50, %v9080_v36  ;;  %v11153_v18 = vrot.slane %v3911_v5, %v9080_v36 }
 0x41a   : > { %8087 = vst.msk [vmem:[%s10285_s17 + $0x168] sm:$0xff] %vm3177_vm1, %v7904_v26  ;;  %8103 = vst.msk [vmem:[%s10285_s17 + $0x1e8] sm:$0xff] %vm3177_vm1, %v7905_v23  ;;  %v4402_v17 = vcombine.low %v10995_v29, %v3367_v46  ;;  %v4403_v44 = vcombine.high %v10995_v29, %v3367_v46  ;;  %v3866_v28 = vrot.slane %v3858_v58, %v9080_v36  ;;  %v11173_v56 = vpop.permute.xlu1 %3368 }
 0x41b   : > { %v3873_v41 = vrot.slane %v3859_v22, %v9080_v36  ;;  %v4454_v27 = vcombine.low %v9871_v4, %v11099_v33  ;;  %v4455_v48 = vcombine.high %v9871_v4, %v11099_v33  ;;  %v3926_v35 = vcombine.low %v11009_v47, %v11137_v20  ;;  %v11175_v30 = vpop.permute.xlu0 %5734 }
 0x41c   : > { %v4410_v60 = vrot.slane %v4402_v17, %v9080_v36  ;;  %v4417_v12 = vrot.slane %v4403_v44, %v9080_v36  ;;  %v3927_v29 = vcombine.high %v11009_v47, %v11137_v20  ;;  %v3874_v34 = vcombine.low %v3850_v25, %v3866_v28 }
 0x41d   : > { %v3875_v8 = vcombine.high %v3850_v25, %v3866_v28  ;;  %v3890_v62 = vcombine.low %v3857_v38, %v3873_v41  ;;  %v3891_v54 = vcombine.high %v3857_v38, %v3873_v41  ;;  %v4469_v47 = vrot.slane %v4455_v48, %v9080_v36 }
 0x41e   : > { %v4418_v40 = vcombine.low %v4394_v6, %v4410_v60  ;;  %v4419_v43 = vcombine.high %v4394_v6, %v4410_v60  ;;  %v4434_v2 = vcombine.low %v4401_v14, %v4417_v12  ;;  %v4435_v39 = vcombine.high %v4401_v14, %v4417_v12  ;;  %v11189_v23 = vpop.permute.xlu1 %5720 }
 0x41f   : > { %v3882_v13 = vrot.slane %v3874_v34, %v9102_v57  ;;  %v3889_v32 = vrot.slane %v3875_v8, %v9102_v57  ;;  %v3898_v10 = vrot.slane %v3890_v62, %v9102_v57  ;;  %v3905_v3 = vrot.slane %v3891_v54, %v9102_v57  ;;  %v11191_v6 = vpop.permute.xlu0 %5750 }
 0x420   : > { %v4426_v49 = vrot.slane %v4418_v40, %v9102_v57  ;;  %v4433_v24 = vrot.slane %v4419_v43, %v9102_v57  ;;  %v4442_v61 = vrot.slane %v4434_v2, %v9102_v57  ;;  %v4449_v51 = vrot.slane %v4435_v39, %v9102_v57 }
 0x421   : > { %v4930_v46 = vcombine.low %v3882_v13, %v3889_v32  ;;  %v8369_v53 = vcombine.high %v3882_v13, %v3889_v32  ;;  %v4946_v0 = vcombine.low %v3898_v10, %v3905_v3  ;;  %v8370_v19 = vcombine.high %v3898_v10, %v3905_v3 }
 0x422   : > { %v5474_v7 = vcombine.low %v4426_v49, %v4433_v24  ;;  %v8385_v9 = vcombine.high %v4426_v49, %v4433_v24  ;;  %v5490_v63 = vcombine.low %v4442_v61, %v4449_v51  ;;  %v8386_v52 = vcombine.high %v4442_v61, %v4449_v51  ;;  %v11221_v51 = vpop.permute.xlu1 %5736 }
 0x423   : > { %v4937_v1 = vrot.slane %v4930_v46, %v9080_v36  ;;  %v4945_v45 = vrot.slane %v8369_v53, %v9080_v36  ;;  %v4953_v15 = vrot.slane %v4946_v0, %v9080_v36  ;;  %v4961_v55 = vrot.slane %v8370_v19, %v9080_v36  ;;  %v11223_v46 = vpop.permute.xlu0 %5766  ;;  %v11518_v53 = vld [vmem:[#allocation16_spill] sm:$0xff] }
 0x424   : > { %v5481_v59 = vrot.slane %v5474_v7, %v9080_v36  ;;  %v5489_v25 = vrot.slane %v8385_v9, %v9080_v36  ;;  %v5497_v38 = vrot.slane %v5490_v63, %v9080_v36  ;;  %v5505_v50 = vrot.slane %v8386_v52, %v9080_v36 }
 0x425   : > { %v4962_v5 = vcombine.low %v4937_v1, %v4945_v45  ;;  %v4963_v37 = vcombine.high %v4937_v1, %v4945_v45  ;;  %v4978_v42 = vcombine.low %v4953_v15, %v4961_v55  ;;  %v4979_v26 = vcombine.high %v4953_v15, %v4961_v55 }
 0x426   : > { %v5506_v14 = vcombine.low %v5481_v59, %v5489_v25  ;;  %v5507_v58 = vcombine.high %v5481_v59, %v5489_v25  ;;  %v5522_v22 = vcombine.low %v5497_v38, %v5505_v50  ;;  %v5523_v17 = vcombine.high %v5497_v38, %v5505_v50  ;;  %v11259_v38 = vpop.permute.xlu1 %5752 }
 0x427   : > { %v4970_v44 = vrot.slane %v4962_v5, %v9102_v57  ;;  %v4977_v28 = vrot.slane %v4963_v37, %v9102_v57  ;;  %v4986_v41 = vrot.slane %v4978_v42, %v9102_v57  ;;  %v4993_v60 = vrot.slane %v4979_v26, %v9102_v57 }
 0x428   : > { %v5514_v12 = vrot.slane %v5506_v14, %v9102_v57  ;;  %v5521_v34 = vrot.slane %v5507_v58, %v9102_v57  ;;  %v5530_v8 = vrot.slane %v5522_v22, %v9102_v57  ;;  %v5537_v62 = vrot.slane %v5523_v17, %v9102_v57 }
 0x429   : > { %v4994_v54 = vcombine.low %v4970_v44, %v4986_v41  ;;  %v4995_v40 = vcombine.high %v4970_v44, %v4986_v41  ;;  %v4996_v43 = vcombine.low %v4977_v28, %v4993_v60  ;;  %v4997_v2 = vcombine.high %v4977_v28, %v4993_v60 }
 0x42a   : > { %v5538_v39 = vcombine.low %v5514_v12, %v5530_v8  ;;  %v5539_v13 = vcombine.high %v5514_v12, %v5530_v8  ;;  %v5540_v32 = vcombine.low %v5521_v34, %v5537_v62  ;;  %v5541_v10 = vcombine.high %v5521_v34, %v5537_v62  ;;  %v5783_v62 = vpop.permute.xlu0 %5782 }
 0x42b   : > { %5616 = vst.msk [vmem:[%s10071_s14 + $0x30] sm:$0xff] %vm3177_vm1, %v4994_v54  ;;  %5632 = vst.msk [vmem:[%s10071_s14 + $0xb0] sm:$0xff] %vm3177_vm1, %v4995_v40  ;;  %v3934_v3 = vrot.slane %v3926_v35, %v9080_v36  ;;  %v3941_v49 = vrot.slane %v3927_v29, %v9080_v36  ;;  %v4470_v24 = vcombine.low %v11041_v11, %v11173_v56 }
 0x42c   : > { %5648 = vst.msk [vmem:[%s10071_s14 + $0x130] sm:$0xff] %vm3177_vm1, %v4996_v43  ;;  %5664 = vst.msk [vmem:[%s10071_s14 + $0x1b0] sm:$0xff] %vm3177_vm1, %v4997_v2  ;;  %v4471_v61 = vcombine.high %v11041_v11, %v11173_v56  ;;  %v4462_v35 = vrot.slane %v4454_v27, %v9080_v36  ;;  %v6274_v11 = vcombine.low %v9869_v21, %v11191_v6 }
 0x42d   : > { %5624 = vst.msk [vmem:[%s10071_s14 + $0x70] sm:$0xff] %vm3177_vm1, %v5538_v39  ;;  %5640 = vst.msk [vmem:[%s10071_s14 + $0xf0] sm:$0xff] %vm3177_vm1, %v5539_v13  ;;  %v6275_v20 = vcombine.high %v9869_v21, %v11191_v6  ;;  %v3942_v27 = vcombine.low %v11150_v16, %v3934_v3  ;;  %v3943_v29 = vcombine.high %v11150_v16, %v3934_v3  ;;  %v11277_v3 = vpop.permute.xlu1 %5768 }
 0x42e   : > { %5656 = vst.msk [vmem:[%s10071_s14 + $0x170] sm:$0xff] %vm3177_vm1, %v5540_v32  ;;  %5672 = vst.msk [vmem:[%s10071_s14 + $0x1f0] sm:$0xff] %vm3177_vm1, %v5541_v10  ;;  %v3958_v4 = vcombine.low %v11153_v18, %v3941_v49  ;;  %v3959_v33 = vcombine.high %v11153_v18, %v3941_v49  ;;  %v4478_v48 = vrot.slane %v4470_v24, %v9080_v36 }
 0x42f   : > { %v4485_v56 = vrot.slane %v4471_v61, %v9080_v36  ;;  %v6818_v0 = vcombine.low %v11518_v53, %v11223_v46  ;;  %v6819_v19 = vcombine.high %v11518_v53, %v11223_v46  ;;  %v3950_v7 = vrot.slane %v3942_v27, %v9102_v57 }
 0x430   : > { %v3957_v9 = vrot.slane %v3943_v29, %v9102_v57  ;;  %v3966_v16 = vrot.slane %v3958_v4, %v9102_v57  ;;  %v3973_v63 = vrot.slane %v3959_v33, %v9102_v57  ;;  %v4486_v52 = vcombine.low %v4462_v35, %v4478_v48 }
 0x431   : > { %v4487_v18 = vcombine.high %v4462_v35, %v4478_v48  ;;  %v4502_v1 = vcombine.low %v4469_v47, %v4485_v56  ;;  %v4503_v45 = vcombine.high %v4469_v47, %v4485_v56  ;;  %v6833_v21 = vrot.slane %v6819_v19, %v9080_v36 }
 0x432   : > { %v4998_v15 = vcombine.low %v3950_v7, %v3957_v9  ;;  %v8371_v55 = vcombine.high %v3950_v7, %v3957_v9  ;;  %v5014_v59 = vcombine.low %v3966_v16, %v3973_v63  ;;  %v8372_v25 = vcombine.high %v3966_v16, %v3973_v63  ;;  %v11519_v63 = vld [vmem:[#allocation17_spill] sm:$0xff] }
 0x433   : > { %v4494_v50 = vrot.slane %v4486_v52, %v9102_v57  ;;  %v4501_v5 = vrot.slane %v4487_v18, %v9102_v57  ;;  %v4510_v37 = vrot.slane %v4502_v1, %v9102_v57  ;;  %v4517_v42 = vrot.slane %v4503_v45, %v9102_v57  ;;  %v5799_v1 = vpop.permute.xlu0 %5798 }
 0x434   : > { %v5005_v26 = vrot.slane %v4998_v15, %v9080_v36  ;;  %v5013_v14 = vrot.slane %v8371_v55, %v9080_v36  ;;  %v5021_v58 = vrot.slane %v5014_v59, %v9080_v36  ;;  %v5029_v22 = vrot.slane %v8372_v25, %v9080_v36  ;;  %v11313_v25 = vpop.permute.xlu1 %5784 }
 0x435   : > { %v5542_v17 = vcombine.low %v4494_v50, %v4501_v5  ;;  %v8387_v44 = vcombine.high %v4494_v50, %v4501_v5  ;;  %v5558_v28 = vcombine.low %v4510_v37, %v4517_v42  ;;  %v8388_v41 = vcombine.high %v4510_v37, %v4517_v42  ;;  %v11520_v50 = vld [vmem:[#allocation18_spill] sm:$0xff] }
 0x436   : > { %v5030_v60 = vcombine.low %v5005_v26, %v5013_v14  ;;  %v5031_v12 = vcombine.high %v5005_v26, %v5013_v14  ;;  %v5046_v34 = vcombine.low %v5021_v58, %v5029_v22  ;;  %v5047_v8 = vcombine.high %v5021_v58, %v5029_v22 }
 0x437   : > { %v5549_v54 = vrot.slane %v5542_v17, %v9080_v36  ;;  %v5557_v40 = vrot.slane %v8387_v44, %v9080_v36  ;;  %v5565_v43 = vrot.slane %v5558_v28, %v9080_v36  ;;  %v5573_v2 = vrot.slane %v8388_v41, %v9080_v36 }
 0x438   : > { %v5038_v39 = vrot.slane %v5030_v60, %v9102_v57  ;;  %v5045_v13 = vrot.slane %v5031_v12, %v9102_v57  ;;  %v5054_v32 = vrot.slane %v5046_v34, %v9102_v57  ;;  %v5061_v10 = vrot.slane %v5047_v8, %v9102_v57 }
 0x439   : > { %v5574_v49 = vcombine.low %v5549_v54, %v5557_v40  ;;  %v5575_v24 = vcombine.high %v5549_v54, %v5557_v40  ;;  %v5590_v61 = vcombine.low %v5565_v43, %v5573_v2  ;;  %v5591_v35 = vcombine.high %v5565_v43, %v5573_v2 }
 0x43a   : > { %v5062_v47 = vcombine.low %v5038_v39, %v5054_v32  ;;  %v5063_v27 = vcombine.high %v5038_v39, %v5054_v32  ;;  %v5064_v29 = vcombine.low %v5045_v13, %v5061_v10  ;;  %v5065_v4 = vcombine.high %v5045_v13, %v5061_v10 }
 0x43b   : > { %v5582_v33 = vrot.slane %v5574_v49, %v9102_v57  ;;  %v5589_v48 = vrot.slane %v5575_v24, %v9102_v57  ;;  %v5598_v56 = vrot.slane %v5590_v61, %v9102_v57  ;;  %v5605_v7 = vrot.slane %v5591_v35, %v9102_v57 }
 0x43c   : > { %5617 = vst.msk [vmem:[%s10071_s14 + $0x38] sm:$0xff] %vm3177_vm1, %v5062_v47  ;;  %5633 = vst.msk [vmem:[%s10071_s14 + $0xb8] sm:$0xff] %vm3177_vm1, %v5063_v27  ;;  %v6282_v9 = vrot.slane %v6274_v11, %v9080_v36  ;;  %v6289_v16 = vrot.slane %v6275_v20, %v9080_v36  ;;  %v6342_v52 = vcombine.low %v11519_v63, %v11259_v38 }
 0x43d   : > { %5649 = vst.msk [vmem:[%s10071_s14 + $0x138] sm:$0xff] %vm3177_vm1, %v5064_v29  ;;  %5665 = vst.msk [vmem:[%s10071_s14 + $0x1b8] sm:$0xff] %vm3177_vm1, %v5065_v4  ;;  %v6343_v18 = vcombine.high %v11519_v63, %v11259_v38  ;;  %v5606_v45 = vcombine.low %v5582_v33, %v5598_v56  ;;  %v5607_v15 = vcombine.high %v5582_v33, %v5598_v56 }
 0x43e   : > { %v5608_v55 = vcombine.low %v5589_v48, %v5605_v7  ;;  %v5609_v59 = vcombine.high %v5589_v48, %v5605_v7  ;;  %v6826_v11 = vrot.slane %v6818_v0, %v9080_v36  ;;  %v6290_v6 = vcombine.low %v11139_v31, %v5783_v62 }
 0x43f   : > { %v6291_v20 = vcombine.high %v11139_v31, %v5783_v62  ;;  %5625 = vst.msk [vmem:[%s10071_s14 + $0x78] sm:$0xff] %vm3177_vm1, %v5606_v45  ;;  %5641 = vst.msk [vmem:[%s10071_s14 + $0xf8] sm:$0xff] %vm3177_vm1, %v5607_v15  ;;  %v11324_v0 = vrot.slane %v6342_v52, %v9080_v36  ;;  %v11327_v46 = vrot.slane %v6343_v18, %v9080_v36 }
 0x440   : > { %5657 = vst.msk [vmem:[%s10071_s14 + $0x178] sm:$0xff] %vm3177_vm1, %v5608_v55  ;;  %5673 = vst.msk [vmem:[%s10071_s14 + $0x1f8] sm:$0xff] %vm3177_vm1, %v5609_v59  ;;  %v6834_v53 = vcombine.low %v11175_v30, %v5799_v1  ;;  %v6835_v31 = vcombine.high %v11175_v30, %v5799_v1  ;;  %v6298_v19 = vrot.slane %v6290_v6, %v9080_v36 }
 0x441   : > { %v6305_v38 = vrot.slane %v6291_v20, %v9080_v36  ;;  %v6886_v5 = vcombine.low %v11520_v50, %v11277_v3  ;;  %v6887_v37 = vcombine.high %v11520_v50, %v11277_v3  ;;  %v6358_v14 = vcombine.low %v11189_v23, %v11313_v25 }
 0x442   : > { %v6842_v42 = vrot.slane %v6834_v53, %v9080_v36  ;;  %v6849_v26 = vrot.slane %v6835_v31, %v9080_v36  ;;  %v6359_v30 = vcombine.high %v11189_v23, %v11313_v25  ;;  %v6306_v58 = vcombine.low %v6282_v9, %v6298_v19 }
 0x443   : > { %v6307_v22 = vcombine.high %v6282_v9, %v6298_v19  ;;  %v6322_v17 = vcombine.low %v6289_v16, %v6305_v38  ;;  %v6323_v44 = vcombine.high %v6289_v16, %v6305_v38  ;;  %v5801_v38 = vpop.permute.xlu1 %5800  ;;  %v6901_v25 = vrot.slane %v6887_v37, %v9080_v36 }
 0x444   : > { %v6850_v28 = vcombine.low %v6826_v11, %v6842_v42  ;;  %v6851_v41 = vcombine.high %v6826_v11, %v6842_v42  ;;  %v6866_v60 = vcombine.low %v6833_v21, %v6849_v26  ;;  %v6867_v12 = vcombine.high %v6833_v21, %v6849_v26 }
 0x445   : > { %v6314_v34 = vrot.slane %v6306_v58, %v9102_v57  ;;  %v6321_v8 = vrot.slane %v6307_v22, %v9102_v57  ;;  %v6330_v62 = vrot.slane %v6322_v17, %v9102_v57  ;;  %v6337_v54 = vrot.slane %v6323_v44, %v9102_v57 }
 0x446   : > { %v6858_v40 = vrot.slane %v6850_v28, %v9102_v57  ;;  %v6865_v43 = vrot.slane %v6851_v41, %v9102_v57  ;;  %v6874_v2 = vrot.slane %v6866_v60, %v9102_v57  ;;  %v6881_v39 = vrot.slane %v6867_v12, %v9102_v57 }
 0x447   : > { %v7362_v13 = vcombine.low %v6314_v34, %v6321_v8  ;;  %v8401_v32 = vcombine.high %v6314_v34, %v6321_v8  ;;  %v7378_v10 = vcombine.low %v6330_v62, %v6337_v54  ;;  %v8402_v49 = vcombine.high %v6330_v62, %v6337_v54 }
 0x448   : > { %v7906_v24 = vcombine.low %v6858_v40, %v6865_v43  ;;  %v8417_v61 = vcombine.high %v6858_v40, %v6865_v43  ;;  %v7922_v35 = vcombine.low %v6874_v2, %v6881_v39  ;;  %v8418_v47 = vcombine.high %v6874_v2, %v6881_v39 }
 0x449   : > { %v7369_v27 = vrot.slane %v7362_v13, %v9080_v36  ;;  %v7377_v29 = vrot.slane %v8401_v32, %v9080_v36  ;;  %v7385_v4 = vrot.slane %v7378_v10, %v9080_v36  ;;  %v7393_v33 = vrot.slane %v8402_v49, %v9080_v36 }
 0x44a   : > { %v7913_v48 = vrot.slane %v7906_v24, %v9080_v36  ;;  %v7921_v56 = vrot.slane %v8417_v61, %v9080_v36  ;;  %v7929_v7 = vrot.slane %v7922_v35, %v9080_v36  ;;  %v7937_v9 = vrot.slane %v8418_v47, %v9080_v36 }
 0x44b   : > { %v7394_v16 = vcombine.low %v7369_v27, %v7377_v29  ;;  %v7395_v63 = vcombine.high %v7369_v27, %v7377_v29  ;;  %v7410_v52 = vcombine.low %v7385_v4, %v7393_v33  ;;  %v7411_v18 = vcombine.high %v7385_v4, %v7393_v33 }
 0x44c   : > { %v7938_v1 = vcombine.low %v7913_v48, %v7921_v56  ;;  %v7939_v45 = vcombine.high %v7913_v48, %v7921_v56  ;;  %v7954_v15 = vcombine.low %v7929_v7, %v7937_v9  ;;  %v7955_v55 = vcombine.high %v7929_v7, %v7937_v9 }
 0x44d   : > { %v7402_v59 = vrot.slane %v7394_v16, %v9102_v57  ;;  %v7409_v11 = vrot.slane %v7395_v63, %v9102_v57  ;;  %v7418_v21 = vrot.slane %v7410_v52, %v9102_v57  ;;  %v7425_v6 = vrot.slane %v7411_v18, %v9102_v57 }
 0x44e   : > { %v7946_v20 = vrot.slane %v7938_v1, %v9102_v57  ;;  %v7953_v53 = vrot.slane %v7939_v45, %v9102_v57  ;;  %v7962_v31 = vrot.slane %v7954_v15, %v9102_v57  ;;  %v7969_v19 = vrot.slane %v7955_v55, %v9102_v57 }
 0x44f   : > { %v7426_v42 = vcombine.low %v7402_v59, %v7418_v21  ;;  %v7427_v26 = vcombine.high %v7402_v59, %v7418_v21  ;;  %v7428_v58 = vcombine.low %v7409_v11, %v7425_v6  ;;  %v7429_v22 = vcombine.high %v7409_v11, %v7425_v6 }
 0x450   : > { %v7970_v17 = vcombine.low %v7946_v20, %v7962_v31  ;;  %v7971_v44 = vcombine.high %v7946_v20, %v7962_v31  ;;  %v7972_v28 = vcombine.low %v7953_v53, %v7969_v19  ;;  %v7973_v41 = vcombine.high %v7953_v53, %v7969_v19 }
 0x451   : > { %8048 = vst.msk [vmem:[%s10285_s17 + $0x30] sm:$0xff] %vm3177_vm1, %v7426_v42  ;;  %8064 = vst.msk [vmem:[%s10285_s17 + $0xb0] sm:$0xff] %vm3177_vm1, %v7427_v26  ;;  %v6366_v60 = vrot.slane %v6358_v14, %v9080_v36  ;;  %v6373_v12 = vrot.slane %v6359_v30, %v9080_v36  ;;  %v6902_v34 = vcombine.low %v11221_v51, %v5801_v38 }
 0x452   : > { %8080 = vst.msk [vmem:[%s10285_s17 + $0x130] sm:$0xff] %vm3177_vm1, %v7428_v58  ;;  %8096 = vst.msk [vmem:[%s10285_s17 + $0x1b0] sm:$0xff] %vm3177_vm1, %v7429_v22  ;;  %v6903_v8 = vcombine.high %v11221_v51, %v5801_v38  ;;  %v6894_v51 = vrot.slane %v6886_v5, %v9080_v36 }
 0x453   : > { %8056 = vst.msk [vmem:[%s10285_s17 + $0x70] sm:$0xff] %vm3177_vm1, %v7970_v17  ;;  %8072 = vst.msk [vmem:[%s10285_s17 + $0xf0] sm:$0xff] %vm3177_vm1, %v7971_v44  ;;  %v6374_v62 = vcombine.low %v11324_v0, %v6366_v60  ;;  %v6375_v14 = vcombine.high %v11324_v0, %v6366_v60  ;;  %v6390_v54 = vcombine.low %v11327_v46, %v6373_v12 }
 0x454   : > { %8088 = vst.msk [vmem:[%s10285_s17 + $0x170] sm:$0xff] %vm3177_vm1, %v7972_v28  ;;  %8104 = vst.msk [vmem:[%s10285_s17 + $0x1f0] sm:$0xff] %vm3177_vm1, %v7973_v41  ;;  %v6391_v23 = vcombine.high %v11327_v46, %v6373_v12  ;;  %v6910_v30 = vrot.slane %v6902_v34, %v9080_v36  ;;  %v6917_v40 = vrot.slane %v6903_v8, %v9080_v36 }
 0x455   : > { %v6382_v0 = vrot.slane %v6374_v62, %v9102_v57  ;;  %v6389_v43 = vrot.slane %v6375_v14, %v9102_v57  ;;  %v6398_v46 = vrot.slane %v6390_v54, %v9102_v57 }
 0x456   : > { %v6405_v2 = vrot.slane %v6391_v23, %v9102_v57  ;;  %v6918_v39 = vcombine.low %v6894_v51, %v6910_v30  ;;  %v6919_v13 = vcombine.high %v6894_v51, %v6910_v30  ;;  %v6934_v5 = vcombine.low %v6901_v25, %v6917_v40 }
 0x457   : > { %v6935_v32 = vcombine.high %v6901_v25, %v6917_v40  ;;  %v7430_v10 = vcombine.low %v6382_v0, %v6389_v43  ;;  %v8403_v49 = vcombine.high %v6382_v0, %v6389_v43 }
 0x458   : > { %v7446_v3 = vcombine.low %v6398_v46, %v6405_v2  ;;  %v8404_v50 = vcombine.high %v6398_v46, %v6405_v2  ;;  %v6926_v37 = vrot.slane %v6918_v39, %v9102_v57  ;;  %v6933_v24 = vrot.slane %v6919_v13, %v9102_v57 }
 0x459   : > { %v6942_v61 = vrot.slane %v6934_v5, %v9102_v57  ;;  %v6949_v35 = vrot.slane %v6935_v32, %v9102_v57  ;;  %v7437_v47 = vrot.slane %v7430_v10, %v9080_v36  ;;  %v7445_v27 = vrot.slane %v8403_v49, %v9080_v36 }
 0x45a   : > { %v7453_v29 = vrot.slane %v7446_v3, %v9080_v36  ;;  %v7461_v4 = vrot.slane %v8404_v50, %v9080_v36  ;;  %v7974_v33 = vcombine.low %v6926_v37, %v6933_v24  ;;  %v8419_v48 = vcombine.high %v6926_v37, %v6933_v24 }
 0x45b   : > { %v7990_v56 = vcombine.low %v6942_v61, %v6949_v35  ;;  %v8420_v7 = vcombine.high %v6942_v61, %v6949_v35  ;;  %v7462_v9 = vcombine.low %v7437_v47, %v7445_v27  ;;  %v7463_v16 = vcombine.high %v7437_v47, %v7445_v27 }
 0x45c   : > { %v7478_v63 = vcombine.low %v7453_v29, %v7461_v4  ;;  %v7479_v52 = vcombine.high %v7453_v29, %v7461_v4  ;;  %v7981_v18 = vrot.slane %v7974_v33, %v9080_v36  ;;  %v7989_v1 = vrot.slane %v8419_v48, %v9080_v36 }
 0x45d   : > { %v7997_v45 = vrot.slane %v7990_v56, %v9080_v36  ;;  %v8005_v15 = vrot.slane %v8420_v7, %v9080_v36  ;;  %v7470_v55 = vrot.slane %v7462_v9, %v9102_v57  ;;  %v7477_v59 = vrot.slane %v7463_v16, %v9102_v57 }
 0x45e   : > { %v7486_v11 = vrot.slane %v7478_v63, %v9102_v57  ;;  %v7493_v21 = vrot.slane %v7479_v52, %v9102_v57  ;;  %v8006_v6 = vcombine.low %v7981_v18, %v7989_v1  ;;  %v8007_v20 = vcombine.high %v7981_v18, %v7989_v1 }
 0x45f   : > { %v8022_v53 = vcombine.low %v7997_v45, %v8005_v15  ;;  %v8023_v31 = vcombine.high %v7997_v45, %v8005_v15 }
 0x460   : > { %v7494_v19 = vcombine.low %v7470_v55, %v7486_v11  ;;  %v7495_v38 = vcombine.high %v7470_v55, %v7486_v11  ;;  %v7496_v36 = vcombine.low %v7477_v59, %v7493_v21  ;;  %v7497_v42 = vcombine.high %v7477_v59, %v7493_v21 }
 0x461   : > { %v8014_v26 = vrot.slane %v8006_v6, %v9102_v57  ;;  %v8021_v58 = vrot.slane %v8007_v20, %v9102_v57  ;;  %v8030_v22 = vrot.slane %v8022_v53, %v9102_v57  ;;  %v8037_v17 = vrot.slane %v8023_v31, %v9102_v57 }
 0x462   : > { %8049 = vst.msk [vmem:[%s10285_s17 + $0x38] sm:$0xff] %vm3177_vm1, %v7494_v19  ;;  %8065 = vst.msk [vmem:[%s10285_s17 + $0xb8] sm:$0xff] %vm3177_vm1, %v7495_v38 }
 0x463   : > { %8081 = vst.msk [vmem:[%s10285_s17 + $0x138] sm:$0xff] %vm3177_vm1, %v7496_v36  ;;  %8097 = vst.msk [vmem:[%s10285_s17 + $0x1b8] sm:$0xff] %vm3177_vm1, %v7497_v42  ;;  %v8038_v44 = vcombine.low %v8014_v26, %v8030_v22  ;;  %v8039_v28 = vcombine.high %v8014_v26, %v8030_v22  ;;  %v8040_v41 = vcombine.low %v8021_v58, %v8037_v17 }
 0x464   : > { %v8041_v60 = vcombine.high %v8021_v58, %v8037_v17 }
 0x465   : > { %8057 = vst.msk [vmem:[%s10285_s17 + $0x78] sm:$0xff] %vm3177_vm1, %v8038_v44  ;;  %8073 = vst.msk [vmem:[%s10285_s17 + $0xf8] sm:$0xff] %vm3177_vm1, %v8039_v28 }
 0x466   : > { %8089 = vst.msk [vmem:[%s10285_s17 + $0x178] sm:$0xff] %vm3177_vm1, %v8040_v41  ;;  %8105 = vst.msk [vmem:[%s10285_s17 + $0x1f8] sm:$0xff] %vm3177_vm1, %v8041_v60 }
 0x467 PF: > { %s18_s26 = sadd.s32 1, %s8572_s26   ;;  %s11521_s24 = smov %s8568_s25 }
 0x468   : > { %p15_p5 = scmp.ge.s32.totalorder %s18_s26, 4   ;;  %s11522_s25 = smov %s11524_s27 }
 0x46a   :  { %17 = sbr.rel (!%p15_p5) target bundleno = 2 (0x2), region = 94 }

</bundles_post_ra>
